<compile_context>
chip_gen: v7x
topology: tpu7x:2x2x1
jax: 0.10.0
libtpu: 0.0.40
codegen_flags: <defaults>
</compile_context>

<pallas_src>
import functools

import jax
import jax.numpy as jnp
from jax.experimental import pallas as pl
from jax.experimental.pallas import tpu as pltpu


# ----------------------------- tiling helpers ------------------------------

def _pick_tile(dim, target, align):
    """Largest `align`-multiple divisor of dim that is <= target (or full dim)."""
    if dim <= target:
        return dim
    t = (target // align) * align
    while t >= align:
        if dim % t == 0:
            return t
        t -= align
    return dim  # fallback: full dim (always legal)


_SEM3 = pltpu.CompilerParams(
    dimension_semantics=("parallel", "parallel", "arbitrary"))


# ----------------------------- matmul kernels ------------------------------

def _mm_kernel(x_ref, w_ref, o_ref, acc_ref):
    k = pl.program_id(2)

    @pl.when(k == 0)
    def _():
        acc_ref[...] = jnp.zeros_like(acc_ref)

    acc_ref[...] += jnp.dot(x_ref[...].astype(jnp.bfloat16), w_ref[...],
                            preferred_element_type=jnp.float32)

    @pl.when(k == pl.num_programs(2) - 1)
    def _():
        o_ref[...] = acc_ref[...].astype(o_ref.dtype)


def _mm_bias_kernel(x_ref, w_ref, b_ref, o_ref, acc_ref):
    k = pl.program_id(2)

    @pl.when(k == 0)
    def _():
        acc_ref[...] = jnp.zeros_like(acc_ref)

    acc_ref[...] += jnp.dot(x_ref[...].astype(jnp.bfloat16), w_ref[...],
                            preferred_element_type=jnp.float32)

    @pl.when(k == pl.num_programs(2) - 1)
    def _():
        o_ref[...] = (acc_ref[...] + b_ref[...]).astype(o_ref.dtype)


def _mm_bias_res_kernel(x_ref, w_ref, b_ref, r_ref, o_ref, acc_ref):
    k = pl.program_id(2)

    @pl.when(k == 0)
    def _():
        acc_ref[...] = jnp.zeros_like(acc_ref)

    acc_ref[...] += jnp.dot(x_ref[...].astype(jnp.bfloat16), w_ref[...],
                            preferred_element_type=jnp.float32)

    @pl.when(k == pl.num_programs(2) - 1)
    def _():
        o_ref[...] = (acc_ref[...] + b_ref[...] + r_ref[...]).astype(o_ref.dtype)


def linear(x2d, w, b=None, residual=None, out_dtype=jnp.float32):
    """y = x @ w (+ b) (+ residual).  w is bf16 (K, N); b/residual are f32."""
    M, K = x2d.shape
    _, N = w.shape
    tm = _pick_tile(M, 512, 8)
    tn = _pick_tile(N, 256, 128)
    tk = _pick_tile(K, 512, 128)
    grid = (M // tm, N // tn, K // tk)

    in_specs = [pl.BlockSpec((tm, tk), lambda i, j, k: (i, k)),
                pl.BlockSpec((tk, tn), lambda i, j, k: (k, j))]
    args = [x2d, w]
    if residual is not None:
        assert b is not None
        kernel = _mm_bias_res_kernel
        in_specs += [pl.BlockSpec((1, tn), lambda i, j, k: (0, j)),
                     pl.BlockSpec((tm, tn), lambda i, j, k: (i, j))]
        args += [b.reshape(1, N), residual]
    elif b is not None:
        kernel = _mm_bias_kernel
        in_specs += [pl.BlockSpec((1, tn), lambda i, j, k: (0, j))]
        args += [b.reshape(1, N)]
    else:
        kernel = _mm_kernel  # no dead zero-bias buffer is materialized

    return pl.pallas_call(
        kernel,
        grid=grid,
        in_specs=in_specs,
        out_specs=pl.BlockSpec((tm, tn), lambda i, j, k: (i, j)),
        out_shape=jax.ShapeDtypeStruct((M, N), out_dtype),
        scratch_shapes=[pltpu.VMEM((tm, tn), jnp.float32)],
        compiler_params=_SEM3,
    )(*args)


# --------------------- fused QKV / per-head plane projection ----------------

def _proj_heads_kernel(x_ref, w_ref, o_ref, acc_ref):
    k = pl.program_id(2)

    @pl.when(k == 0)
    def _():
        acc_ref[...] = jnp.zeros_like(acc_ref)

    acc_ref[...] += jnp.dot(x_ref[...].astype(jnp.bfloat16), w_ref[0],
                            preferred_element_type=jnp.float32)

    @pl.when(k == pl.num_programs(2) - 1)
    def _():
        o_ref[0] = acc_ref[...].astype(o_ref.dtype)


def project_heads(x2d, w_planes):
    """x:(M,K) @ w_planes:(P,K,dh) -> (P,M,dh) bf16 (P head-planes, e.g. 3H fused QKV)."""
    M, K = x2d.shape
    P, _, dh = w_planes.shape
    tm = _pick_tile(M, 512, 8)
    tk = _pick_tile(K, 512, 128)
    grid = (P, M // tm, K // tk)
    return pl.pallas_call(
        _proj_heads_kernel,
        grid=grid,
        in_specs=[pl.BlockSpec((tm, tk), lambda p, i, k: (i, k)),
                  pl.BlockSpec((1, tk, dh), lambda p, i, k: (p, k, 0))],
        out_specs=pl.BlockSpec((1, tm, dh), lambda p, i, k: (p, i, 0)),
        out_shape=jax.ShapeDtypeStruct((P, M, dh), jnp.bfloat16),
        scratch_shapes=[pltpu.VMEM((tm, dh), jnp.float32)],
        compiler_params=_SEM3,
    )(x2d, w_planes)


# ------------------------ flash attention (online softmax) ------------------

def _flash_attn_kernel(q_ref, k_ref, v_ref, o_ref, m_sc, l_sc, acc_sc):
    # 1/sqrt(d_head) is pre-folded into the Q projection weights.
    ki = pl.program_id(3)

    @pl.when(ki == 0)
    def _():
        m_sc[...] = jnp.full_like(m_sc, -jnp.inf)
        l_sc[...] = jnp.zeros_like(l_sc)
        acc_sc[...] = jnp.zeros_like(acc_sc)

    q = q_ref[0, 0]                       # (tq, dh) bf16
    k = k_ref[0, 0]                       # (tk, dh) bf16
    v = v_ref[0, 0]                       # (tk, dh) bf16
    s = jax.lax.dot_general(q, k, (((1,), (1,)), ((), ())),
                            preferred_element_type=jnp.float32)      # (tq, tk) f32

    m_prev = m_sc[...]
    m_new = jnp.maximum(m_prev, jnp.max(s, axis=-1, keepdims=True))
    alpha = jnp.exp(m_prev - m_new)
    p = jnp.exp(s - m_new)
    l_sc[...] = alpha * l_sc[...] + jnp.sum(p, axis=-1, keepdims=True)
    acc_sc[...] = alpha * acc_sc[...] + jnp.dot(
        p.astype(jnp.bfloat16), v, preferred_element_type=jnp.float32)
    m_sc[...] = m_new

    @pl.when(ki == pl.num_programs(3) - 1)
    def _():
        o_ref[0, 0] = (acc_sc[...] *
                       pl.reciprocal(l_sc[...], approx=True)).astype(o_ref.dtype)


def flash_attention(q_arr, kv_arr, *, n_heads, q_base, k_base, v_base):
    """q_arr:(Pq,B,N,dh), kv_arr:(Pkv,B,M,dh) head-plane layouts -> (H,B,N,dh) bf16."""
    _, B, N, dh = q_arr.shape
    Mk = kv_arr.shape[2]
    tq = _pick_tile(N, 256, 8)
    tk = _pick_tile(Mk, 512, 8)
    grid = (B, n_heads, N // tq, Mk // tk)
    return pl.pallas_call(
        _flash_attn_kernel,
        grid=grid,
        in_specs=[
            pl.BlockSpec((1, 1, tq, dh), lambda b, h, qi, ki: (q_base + h, b, qi, 0)),
            pl.BlockSpec((1, 1, tk, dh), lambda b, h, qi, ki: (k_base + h, b, ki, 0)),
            pl.BlockSpec((1, 1, tk, dh), lambda b, h, qi, ki: (v_base + h, b, ki, 0)),
        ],
        out_specs=pl.BlockSpec((1, 1, tq, dh), lambda b, h, qi, ki: (h, b, qi, 0)),
        out_shape=jax.ShapeDtypeStruct((n_heads, B, N, dh), jnp.bfloat16),
        scratch_shapes=[pltpu.VMEM((tq, 1), jnp.float32),
                        pltpu.VMEM((tq, 1), jnp.float32),
                        pltpu.VMEM((tq, dh), jnp.float32)],
        compiler_params=pltpu.CompilerParams(
            dimension_semantics=("parallel", "parallel", "parallel", "arbitrary")),
    )(q_arr, kv_arr, kv_arr)


# -------------- fused head-merge + to_out projection + residual -------------

def _attn_out_kernel(o_ref, w_ref, b_ref, r_ref, out_ref, acc_ref):
    h = pl.program_id(2)

    @pl.when(h == 0)
    def _():
        acc_ref[...] = jnp.zeros_like(acc_ref)

    acc_ref[...] += jnp.dot(o_ref[0], w_ref[0],
                            preferred_element_type=jnp.float32)

    @pl.when(h == pl.num_programs(2) - 1)
    def _():
        out_ref[...] = (acc_ref[...] + b_ref[...] + r_ref[...]).astype(out_ref.dtype)


def attn_out_proj(o_planes, w_planes, b, residual):
    """(H,M,dh) x (H,dh,D) summed over heads + bias + residual -> (M,D) f32."""
    H, M, dh = o_planes.shape
    D = w_planes.shape[2]
    tm = _pick_tile(M, 512, 8)
    tn = _pick_tile(D, 256, 128)
    grid = (M // tm, D // tn, H)
    return pl.pallas_call(
        _attn_out_kernel,
        grid=grid,
        in_specs=[pl.BlockSpec((1, tm, dh), lambda i, j, h: (h, i, 0)),
                  pl.BlockSpec((1, dh, tn), lambda i, j, h: (h, 0, j)),
                  pl.BlockSpec((1, tn), lambda i, j, h: (0, j)),
                  pl.BlockSpec((tm, tn), lambda i, j, h: (i, j))],
        out_specs=pl.BlockSpec((tm, tn), lambda i, j, h: (i, j)),
        out_shape=jax.ShapeDtypeStruct((M, D), jnp.float32),
        scratch_shapes=[pltpu.VMEM((tm, tn), jnp.float32)],
        compiler_params=_SEM3,
    )(o_planes, w_planes, b.reshape(1, D), residual)


# ------------------------------- AdaLayerNorm -------------------------------

def _adaln_kernel(x_ref, scale_ref, shift_ref, o_ref):
    # LayerNorm over last dim (no affine, eps=1e-5), then * (1 + scale) + shift.
    x = x_ref[0]                                    # (tr, D) f32
    mean = jnp.mean(x, axis=-1, keepdims=True)
    xc = x - mean
    var = jnp.mean(xc * xc, axis=-1, keepdims=True)
    xn = xc * jax.lax.rsqrt(var + 1e-5)
    o_ref[0] = (xn * (1.0 + scale_ref[0]) + shift_ref[0]).astype(o_ref.dtype)


def ada_layer_norm(x, scale, shift):
    """x:(B,N,D) f32, scale/shift:(B,1,D) f32 -> (B,N,D) bf16 (feeds matmuls only)."""
    B, N, D = x.shape
    tr = _pick_tile(N, 512, 8)
    return pl.pallas_call(
        _adaln_kernel,
        grid=(B, N // tr),
        in_specs=[pl.BlockSpec((1, tr, D), lambda b, i: (b, i, 0)),
                  pl.BlockSpec((1, 1, D), lambda b, i: (b, 0, 0)),
                  pl.BlockSpec((1, 1, D), lambda b, i: (b, 0, 0))],
        out_specs=pl.BlockSpec((1, tr, D), lambda b, i: (b, i, 0)),
        out_shape=jax.ShapeDtypeStruct((B, N, D), jnp.bfloat16),
        compiler_params=pltpu.CompilerParams(
            dimension_semantics=("parallel", "parallel")),
    )(x, scale, shift)


# ------------------------- GEGLU (split a / gate halves) --------------------

def _geglu_kernel(x_ref, wa_ref, wg_ref, ba_ref, bg_ref, o_ref, acc_a, acc_g):
    k = pl.program_id(2)

    @pl.when(k == 0)
    def _():
        acc_a[...] = jnp.zeros_like(acc_a)
        acc_g[...] = jnp.zeros_like(acc_g)

    xb = x_ref[...].astype(jnp.bfloat16)
    acc_a[...] += jnp.dot(xb, wa_ref[...], preferred_element_type=jnp.float32)
    acc_g[...] += jnp.dot(xb, wg_ref[...], preferred_element_type=jnp.float32)

    @pl.when(k == pl.num_programs(2) - 1)
    def _():
        a = acc_a[...] + ba_ref[...]
        g = acc_g[...] + bg_ref[...]
        # TODO(synk): tanh-approx GELU (EUP-friendly); PyTorch F.gelu default is
        # exact erf (activation-level difference ~1e-3).
        gelu_g = 0.5 * g * (1.0 + jnp.tanh(0.7978845608028654 *
                                           (g + 0.044715 * g * g * g)))
        o_ref[...] = (a * gelu_g).astype(o_ref.dtype)


def geglu(x2d, wa, wg, ba, bg):
    M, K = x2d.shape
    N = wa.shape[1]
    tm = _pick_tile(M, 512, 8)
    tn = _pick_tile(N, 256, 128)
    tk = _pick_tile(K, 512, 128)
    grid = (M // tm, N // tn, K // tk)
    return pl.pallas_call(
        _geglu_kernel,
        grid=grid,
        in_specs=[pl.BlockSpec((tm, tk), lambda i, j, k: (i, k)),
                  pl.BlockSpec((tk, tn), lambda i, j, k: (k, j)),
                  pl.BlockSpec((tk, tn), lambda i, j, k: (k, j)),
                  pl.BlockSpec((1, tn), lambda i, j, k: (0, j)),
                  pl.BlockSpec((1, tn), lambda i, j, k: (0, j))],
        out_specs=pl.BlockSpec((tm, tn), lambda i, j, k: (i, j)),
        out_shape=jax.ShapeDtypeStruct((M, N), jnp.bfloat16),
        scratch_shapes=[pltpu.VMEM((tm, tn), jnp.float32),
                        pltpu.VMEM((tm, tn), jnp.float32)],
        compiler_params=_SEM3,
    )(x2d, wa, wg, ba.reshape(1, N), bg.reshape(1, N))


# ----------------------- parameters (deterministic init) --------------------

def init_math_params(key, in_channels, n_heads, d_head, out_channels=None,
                     depth=1, context_dim=None, zero_proj_out=True):
    """Plain f32 weights mirroring the PyTorch module (stored as (in, out))."""
    D = n_heads * d_head
    ctx_dim = D if context_dim is None else context_dim
    out_channels = in_channels if out_channels is None else out_channels

    def lin(k, din, dout, std=0.02):
        kw, kb = jax.random.split(k)
        return (jax.random.normal(kw, (din, dout), jnp.float32) * std,
                jax.random.normal(kb, (dout,), jnp.float32) * std)

    keys = jax.random.split(key, 4 + depth)
    proj_in_w, _ = lin(keys[0], in_channels, D)
    t_proj_w, t_proj_b = lin(keys[1], 1280, D)
    if zero_proj_out:
        proj_out_w = jnp.zeros((D, out_channels), jnp.float32)   # zero_module
    else:
        proj_out_w, _ = lin(keys[2], D, out_channels)

    blocks = []
    for d in range(depth):
        bk = jax.random.split(keys[4 + d], 16)
        n1w, n1b = lin(bk[0], D, 2 * D)
        n2w, n2b = lin(bk[1], D, 2 * D)
        n3w, n3b = lin(bk[2], D, 2 * D)
        a1q, _ = lin(bk[3], D, D)
        a1k, _ = lin(bk[4], D, D)
        a1v, _ = lin(bk[5], D, D)
        a1o, a1ob = lin(bk[6], D, D)
        a2q, _ = lin(bk[7], D, D)
        a2k, _ = lin(bk[8], ctx_dim, D)
        a2v, _ = lin(bk[9], ctx_dim, D)
        a2o, a2ob = lin(bk[10], D, D)
        ffw1, ffb1 = lin(bk[11], D, 8 * D)
        ffw2, ffb2 = lin(bk[12], 4 * D, D)
        blocks.append(dict(
            n1_w=n1w, n1_b=n1b, n2_w=n2w, n2_b=n2b, n3_w=n3w, n3_b=n3b,
            attn1=dict(wq=a1q, wk=a1k, wv=a1v, wo=a1o, bo=a1ob),
            attn2=dict(wq=a2q, wk=a2k, wv=a2v, wo=a2o, bo=a2ob),
            ff=dict(w1=ffw1, b1=ffb1, w2=ffw2, b2=ffb2)))
    return dict(proj_in_w=proj_in_w, t_proj_w=t_proj_w, t_proj_b=t_proj_b,
                proj_out_w=proj_out_w, blocks=blocks)


def prepare_params(mp, n_heads, d_head):
    """Kernel-layout params: bf16 weights, fused QKV / AdaLN weights, head planes,
    1/sqrt(d_head) folded into Q."""
    D = n_heads * d_head
    scale = d_head ** -0.5
    bf = lambda w: w.astype(jnp.bfloat16)

    def planes(w, s=1.0):
        K = w.shape[0]
        return jnp.transpose((w * s).reshape(K, n_heads, d_head),
                             (1, 0, 2)).astype(jnp.bfloat16)   # (H, K, dh)

    blocks = []
    for b in mp["blocks"]:
        a1, a2, ff = b["attn1"], b["attn2"], b["ff"]
        blocks.append(dict(
            norm_w=bf(jnp.concatenate([b["n1_w"], b["n2_w"], b["n3_w"]], axis=1)),
            norm_b=jnp.concatenate([b["n1_b"], b["n2_b"], b["n3_b"]], axis=0),
            attn1=dict(
                qkv=jnp.concatenate([planes(a1["wq"], scale), planes(a1["wk"]),
                                     planes(a1["wv"])], axis=0),      # (3H, D, dh)
                out_w=bf(a1["wo"]).reshape(n_heads, d_head, D),
                out_b=a1["bo"]),
            attn2=dict(
                q=planes(a2["wq"], scale),                            # (H, D, dh)
                kv=jnp.concatenate([planes(a2["wk"]), planes(a2["wv"])], axis=0),
                out_w=bf(a2["wo"]).reshape(n_heads, d_head, D),
                out_b=a2["bo"]),
            ff=dict(wa=bf(ff["w1"][:, :4 * D]), wg=bf(ff["w1"][:, 4 * D:]),
                    ba=ff["b1"][:4 * D], bg=ff["b1"][4 * D:],
                    w2=bf(ff["w2"]), b2=ff["b2"])))
    return dict(proj_in_w=bf(mp["proj_in_w"]),
                t_proj_w=bf(mp["t_proj_w"]), t_proj_b=mp["t_proj_b"],
                proj_out_w=bf(mp["proj_out_w"]), blocks=blocks)


# ------------------------------ forward pass --------------------------------

def transformer_forward(params, x, t, context=None, attention_mask=None,
                        *, n_heads, d_head):
    # TODO(synk): attention_mask (masked_fill) path not implemented in the flash
    # attention kernel; the module's default mask=None path is reproduced.
    assert attention_mask is None
    B, N, C = x.shape
    D = n_heads * d_head
    H = n_heads

    h = linear(x.reshape(B * N, C), params["proj_in_w"]).reshape(B, N, D)   # f32
    t_emb = linear(t, params["t_proj_w"], params["t_proj_b"])               # (B, D)

    for blk in params["blocks"]:
        # one fused matmul for the three AdaLayerNorm linears (depend only on t_emb)
        emb = linear(t_emb, blk["norm_w"], blk["norm_b"])                   # (B, 6D)

        def ss(i):
            return (emb[:, 2 * i * D:(2 * i + 1) * D].reshape(B, 1, D),
                    emb[:, (2 * i + 1) * D:(2 * i + 2) * D].reshape(B, 1, D))

        # --- self attention ---
        sc1, sh1 = ss(0)
        n1 = ada_layer_norm(h, sc1, sh1)
        qkv = project_heads(n1.reshape(B * N, D), blk["attn1"]["qkv"])      # (3H,BN,dh)
        qkv = qkv.reshape(3 * H, B, N, d_head)
        oh = flash_attention(qkv, qkv, n_heads=H, q_base=0, k_base=H, v_base=2 * H)
        h = attn_out_proj(oh.reshape(H, B * N, d_head), blk["attn1"]["out_w"],
                          blk["attn1"]["out_b"], h.reshape(B * N, D)).reshape(B, N, D)

        # --- cross attention (context defaults to the normalized hidden state) ---
        sc2, sh2 = ss(1)
        n2 = ada_layer_norm(h, sc2, sh2)
        ctx = n2 if context is None else context
        Bc, Mc, Dc = ctx.shape
        q_pl = project_heads(n2.reshape(B * N, D), blk["attn2"]["q"])
        kv_pl = project_heads(ctx.reshape(Bc * Mc, Dc), blk["attn2"]["kv"])
        oh2 = flash_attention(q_pl.reshape(H, B, N, d_head),
                              kv_pl.reshape(2 * H, B, Mc, d_head),
                              n_heads=H, q_base=0, k_base=0, v_base=H)
        h = attn_out_proj(oh2.reshape(H, B * N, d_head), blk["attn2"]["out_w"],
                          blk["attn2"]["out_b"], h.reshape(B * N, D)).reshape(B, N, D)

        # --- feed-forward (GEGLU) ---
        sc3, sh3 = ss(2)
        n3 = ada_layer_norm(h, sc3, sh3)
        g = geglu(n3.reshape(B * N, D), blk["ff"]["wa"], blk["ff"]["wg"],
                  blk["ff"]["ba"], blk["ff"]["bg"])
        h = linear(g, blk["ff"]["w2"], blk["ff"]["b2"],
                   residual=h.reshape(B * N, D)).reshape(B, N, D)

    out = linear(h.reshape(B * N, D), params["proj_out_w"])
    return out.reshape(B, N, out.shape[-1])


# ------------------------- pure-JAX reference (f32) --------------------------

def reference_forward(mp, x, t, *, n_heads, d_head, context=None):
    D = n_heads * d_head
    h = x @ mp["proj_in_w"]
    temb = (t @ mp["t_proj_w"] + mp["t_proj_b"])[:, None, :]

    def adaln(xx, w, b):
        e = temb @ w + b
        sc, sh = e[..., :D], e[..., D:]
        mean = xx.mean(-1, keepdims=True)
        var = ((xx - mean) ** 2).mean(-1, keepdims=True)
        return (xx - mean) / jnp.sqrt(var + 1e-5) * (1 + sc) + sh

    def attn(xq, ctx, ap):
        q, k, v = xq @ ap["wq"], ctx @ ap["wk"], ctx @ ap["wv"]
        B_, Nq, _ = q.shape
        Mk = k.shape[1]
        sh_ = lambda z, L: z.reshape(B_, L, n_heads, d_head).transpose(0, 2, 1, 3)
        s = jnp.einsum('bhqd,bhkd->bhqk', sh_(q, Nq), sh_(k, Mk)) * (d_head ** -0.5)
        p = jax.nn.softmax(s, axis=-1)
        o = jnp.einsum('bhqk,bhkd->bhqd', p, sh_(v, Mk))
        o = o.transpose(0, 2, 1, 3).reshape(B_, Nq, D)
        return o @ ap["wo"] + ap["bo"]

    for b in mp["blocks"]:
        n1 = adaln(h, b["n1_w"], b["n1_b"])
        h = attn(n1, n1, b["attn1"]) + h
        n2 = adaln(h, b["n2_w"], b["n2_b"])
        ctx = n2 if context is None else context
        h = attn(n2, ctx, b["attn2"]) + h
        n3 = adaln(h, b["n3_w"], b["n3_b"])
        proj = n3 @ b["ff"]["w1"] + b["ff"]["b1"]
        a, g = proj[..., :4 * D], proj[..., 4 * D:]
        gelu_g = 0.5 * g * (1 + jnp.tanh(0.7978845608028654 * (g + 0.044715 * g ** 3)))
        h = (a * gelu_g) @ b["ff"]["w2"] + b["ff"]["b2"] + h
    return h @ mp["proj_out_w"]


# ---------------------------------- demo ------------------------------------

if __name__ == "__main__":
    B, N = 2, 8
    in_channels = 8
    n_heads, d_head = 2, 64           # inner_dim = 128
    key = jax.random.PRNGKey(0)
    kp, kx, kt = jax.random.split(key, 3)

    x = jax.random.normal(kx, (B, N, in_channels), jnp.float32)
    t = jax.random.normal(kt, (B, 1280), jnp.float32)

    fwd = jax.jit(functools.partial(transformer_forward,
                                    n_heads=n_heads, d_head=d_head))

    # faithful init (proj_out zero-initialized like zero_module)
    mp = init_math_params(kp, in_channels, n_heads, d_head, depth=1,
                          zero_proj_out=True)
    out = fwd(prepare_params(mp, n_heads, d_head), x, t)
    jax.block_until_ready(out)
    assert out.shape == (B, N, in_channels)
    assert bool(jnp.all(jnp.isfinite(out)))

    # non-vacuous numeric check: re-run with a random (non-zero) proj_out and
    # compare against the pure-JAX f32 reference (bf16 matmuls + approx recip
    # => lenient tolerance).
    mp2 = init_math_params(kp, in_channels, n_heads, d_head, depth=1,
                           zero_proj_out=False)
    out2 = fwd(prepare_params(mp2, n_heads, d_head), x, t)
    ref2 = reference_forward(mp2, x, t, n_heads=n_heads, d_head=d_head)
    jax.block_until_ready(out2)
    err = float(jnp.max(jnp.abs(out2 - ref2)))
    assert err < 5e-2, f"max abs err {err}"

    print("KERNEL_OK")
</pallas_src>

<mosaic_0001>
module attributes {stable_mosaic.version = 11 : i64} {
  func.func @_mm_bias_kernel(%arg0: i32, %arg1: i32, %arg2: i32, %arg3: memref<2x256xf32, #tpu.memory_space<vmem>>, %arg4: memref<256x128xbf16, #tpu.memory_space<vmem>>, %arg5: memref<1x128xf32, #tpu.memory_space<vmem>>, %arg6: memref<2x128xf32, #tpu.memory_space<vmem>>, %arg7: memref<2x128xf32, #tpu.memory_space<vmem>>) attributes {dimension_semantics = [#tpu.dimension_semantics<parallel>, #tpu.dimension_semantics<parallel>, #tpu.dimension_semantics<arbitrary>], iteration_bounds = array<i64: 1, 1, 5>, scalar_prefetch = 0 : i64, scratch_operands = 1 : i64, tpu.core_type = #tpu.core_type<tc>, window_params = [{transform_indices = @transform_0, window_bounds = array<i64: 2, 256>}, {transform_indices = @transform_1, window_bounds = array<i64: 256, 128>}, {transform_indices = @transform_2, window_bounds = array<i64: 1, 128>}, {transform_indices = @transform_3, window_bounds = array<i64: 2, 128>}]} {
    %c0_i32 = arith.constant 0 : i32
    %0 = arith.cmpi eq, %arg2, %c0_i32 : i32
    %1 = arith.extui %0 : i1 to i32
    %c0_i32_0 = arith.constant 0 : i32
    %2 = arith.cmpi ne, %1, %c0_i32_0 : i32
    scf.if %2 {
      %cst_9 = arith.constant 0.000000e+00 : f32
      %13 = vector.broadcast %cst_9 : f32 to vector<2x128xf32>
      %c0_10 = arith.constant 0 : index
      %c0_11 = arith.constant 0 : index
      %14 = vector.load %arg7[%c0_10, %c0_11] : memref<2x128xf32, #tpu.memory_space<vmem>>, vector<2x128xf32>
      tpu.vector_store %arg7[%c0_10, %c0_11], %13 {strides = array<i32>} : memref<2x128xf32, #tpu.memory_space<vmem>>, vector<2x128xf32>,
    } else {
    }
    %c0 = arith.constant 0 : index
    %c0_1 = arith.constant 0 : index
    %3 = vector.load %arg7[%c0, %c0_1] : memref<2x128xf32, #tpu.memory_space<vmem>>, vector<2x128xf32>
    %c0_2 = arith.constant 0 : index
    %c0_3 = arith.constant 0 : index
    %4 = vector.load %arg3[%c0_2, %c0_3] : memref<2x256xf32, #tpu.memory_space<vmem>>, vector<2x256xf32>
    %5 = arith.truncf %4 : vector<2x256xf32> to vector<2x256xbf16>
    %c0_4 = arith.constant 0 : index
    %c0_5 = arith.constant 0 : index
    %6 = vector.load %arg4[%c0_4, %c0_5] : memref<256x128xbf16, #tpu.memory_space<vmem>>, vector<256x128xbf16>
    %cst = arith.constant dense<0.000000e+00> : vector<2x128xf32>
    %7 = tpu.matmul %5, %6, %cst {dimension_numbers = #tpu.dot_dimension_numbers<[1], [0], [0], [1], [0, 0, 1, 1], [], []>} : vector<2x256xbf16>, vector<256x128xbf16>, vector<2x128xf32> -> vector<2x128xf32>
    %8 = arith.addf %3, %7 : vector<2x128xf32>
    %c0_6 = arith.constant 0 : index
    %c0_7 = arith.constant 0 : index
    %9 = vector.load %arg7[%c0_6, %c0_7] : memref<2x128xf32, #tpu.memory_space<vmem>>, vector<2x128xf32>
    tpu.vector_store %arg7[%c0_6, %c0_7], %8 {strides = array<i32>} : memref<2x128xf32, #tpu.memory_space<vmem>>, vector<2x128xf32>,
    %c4_i32 = arith.constant 4 : i32
    %10 = arith.cmpi eq, %arg2, %c4_i32 : i32
    %11 = arith.extui %10 : i1 to i32
    %c0_i32_8 = arith.constant 0 : i32
    %12 = arith.cmpi ne, %11, %c0_i32_8 : i32
    scf.if %12 {
      %c0_9 = arith.constant 0 : index
      %c0_10 = arith.constant 0 : index
      %13 = vector.load %arg7[%c0_9, %c0_10] : memref<2x128xf32, #tpu.memory_space<vmem>>, vector<2x128xf32>
      %c0_11 = arith.constant 0 : index
      %c0_12 = arith.constant 0 : index
      %14 = vector.load %arg5[%c0_11, %c0_12] : memref<1x128xf32, #tpu.memory_space<vmem>>, vector<1x128xf32>
      %15 = vector.broadcast %14 : vector<1x128xf32> to vector<2x128xf32>
      %16 = arith.addf %13, %15 : vector<2x128xf32>
      %c0_13 = arith.constant 0 : index
      %c0_14 = arith.constant 0 : index
      %17 = vector.load %arg6[%c0_13, %c0_14] : memref<2x128xf32, #tpu.memory_space<vmem>>, vector<2x128xf32>
      tpu.vector_store %arg6[%c0_13, %c0_14], %16 {strides = array<i32>} : memref<2x128xf32, #tpu.memory_space<vmem>>, vector<2x128xf32>,
    } else {
    }
    return
  }
  func.func @transform_0(%arg0: i32, %arg1: i32, %arg2: i32) -> (i32, i32) {
    %c0_i32 = arith.constant 0 : i32
    return %arg0, %arg2 : i32, i32
  }
  func.func @transform_1(%arg0: i32, %arg1: i32, %arg2: i32) -> (i32, i32) {
    %c0_i32 = arith.constant 0 : i32
    return %arg2, %arg1 : i32, i32
  }
  func.func @transform_2(%arg0: i32, %arg1: i32, %arg2: i32) -> (i32, i32) {
    %c0_i32 = arith.constant 0 : i32
    %c0_i32_0 = arith.constant 0 : i32
    return %c0_i32, %arg1 : i32, i32
  }
  func.func @transform_3(%arg0: i32, %arg1: i32, %arg2: i32) -> (i32, i32) {
    %c0_i32 = arith.constant 0 : i32
    return %arg0, %arg1 : i32, i32
  }
}

module attributes {stable_mosaic.version = 11 : i64} {
  func.func @_mm_bias_kernel(%arg0: i32, %arg1: i32, %arg2: i32, %arg3: memref<2x128xf32, #tpu.memory_space<vmem>>, %arg4: memref<128x256xbf16, #tpu.memory_space<vmem>>, %arg5: memref<1x256xf32, #tpu.memory_space<vmem>>, %arg6: memref<2x256xf32, #tpu.memory_space<vmem>>, %arg7: memref<2x256xf32, #tpu.memory_space<vmem>>) attributes {dimension_semantics = [#tpu.dimension_semantics<parallel>, #tpu.dimension_semantics<parallel>, #tpu.dimension_semantics<arbitrary>], iteration_bounds = array<i64: 1, 3, 1>, scalar_prefetch = 0 : i64, scratch_operands = 1 : i64, tpu.core_type = #tpu.core_type<tc>, window_params = [{transform_indices = @transform_0, window_bounds = array<i64: 2, 128>}, {transform_indices = @transform_1, window_bounds = array<i64: 128, 256>}, {transform_indices = @transform_2, window_bounds = array<i64: 1, 256>}, {transform_indices = @transform_3, window_bounds = array<i64: 2, 256>}]} {
    %c0_i32 = arith.constant 0 : i32
    %0 = arith.cmpi eq, %arg2, %c0_i32 : i32
    %1 = arith.extui %0 : i1 to i32
    %c0_i32_0 = arith.constant 0 : i32
    %2 = arith.cmpi ne, %1, %c0_i32_0 : i32
    scf.if %2 {
      %cst_10 = arith.constant 0.000000e+00 : f32
      %13 = vector.broadcast %cst_10 : f32 to vector<2x256xf32>
      %c0_11 = arith.constant 0 : index
      %c0_12 = arith.constant 0 : index
      %14 = vector.load %arg7[%c0_11, %c0_12] : memref<2x256xf32, #tpu.memory_space<vmem>>, vector<2x256xf32>
      tpu.vector_store %arg7[%c0_11, %c0_12], %13 {strides = array<i32>} : memref<2x256xf32, #tpu.memory_space<vmem>>, vector<2x256xf32>,
    } else {
    }
    %c0 = arith.constant 0 : index
    %c0_1 = arith.constant 0 : index
    %3 = vector.load %arg7[%c0, %c0_1] : memref<2x256xf32, #tpu.memory_space<vmem>>, vector<2x256xf32>
    %c0_2 = arith.constant 0 : index
    %c0_3 = arith.constant 0 : index
    %4 = vector.load %arg3[%c0_2, %c0_3] : memref<2x128xf32, #tpu.memory_space<vmem>>, vector<2x128xf32>
    %5 = arith.truncf %4 : vector<2x128xf32> to vector<2x128xbf16>
    %c0_4 = arith.constant 0 : index
    %c0_5 = arith.constant 0 : index
    %6 = vector.load %arg4[%c0_4, %c0_5] : memref<128x256xbf16, #tpu.memory_space<vmem>>, vector<128x256xbf16>
    %cst = arith.constant dense<0.000000e+00> : vector<2x256xf32>
    %7 = tpu.matmul %5, %6, %cst {dimension_numbers = #tpu.dot_dimension_numbers<[1], [0], [0], [1], [0, 0, 1, 1], [], []>} : vector<2x128xbf16>, vector<128x256xbf16>, vector<2x256xf32> -> vector<2x256xf32>
    %8 = arith.addf %3, %7 : vector<2x256xf32>
    %c0_6 = arith.constant 0 : index
    %c0_7 = arith.constant 0 : index
    %9 = vector.load %arg7[%c0_6, %c0_7] : memref<2x256xf32, #tpu.memory_space<vmem>>, vector<2x256xf32>
    tpu.vector_store %arg7[%c0_6, %c0_7], %8 {strides = array<i32>} : memref<2x256xf32, #tpu.memory_space<vmem>>, vector<2x256xf32>,
    %c0_i32_8 = arith.constant 0 : i32
    %10 = arith.cmpi eq, %arg2, %c0_i32_8 : i32
    %11 = arith.extui %10 : i1 to i32
    %c0_i32_9 = arith.constant 0 : i32
    %12 = arith.cmpi ne, %11, %c0_i32_9 : i32
    scf.if %12 {
      %c0_10 = arith.constant 0 : index
      %c0_11 = arith.constant 0 : index
      %13 = vector.load %arg7[%c0_10, %c0_11] : memref<2x256xf32, #tpu.memory_space<vmem>>, vector<2x256xf32>
      %c0_12 = arith.constant 0 : index
      %c0_13 = arith.constant 0 : index
      %14 = vector.load %arg5[%c0_12, %c0_13] : memref<1x256xf32, #tpu.memory_space<vmem>>, vector<1x256xf32>
      %15 = vector.broadcast %14 : vector<1x256xf32> to vector<2x256xf32>
      %16 = arith.addf %13, %15 : vector<2x256xf32>
      %c0_14 = arith.constant 0 : index
      %c0_15 = arith.constant 0 : index
      %17 = vector.load %arg6[%c0_14, %c0_15] : memref<2x256xf32, #tpu.memory_space<vmem>>, vector<2x256xf32>
      tpu.vector_store %arg6[%c0_14, %c0_15], %16 {strides = array<i32>} : memref<2x256xf32, #tpu.memory_space<vmem>>, vector<2x256xf32>,
    } else {
    }
    return
  }
  func.func @transform_0(%arg0: i32, %arg1: i32, %arg2: i32) -> (i32, i32) {
    %c0_i32 = arith.constant 0 : i32
    return %arg0, %arg2 : i32, i32
  }
  func.func @transform_1(%arg0: i32, %arg1: i32, %arg2: i32) -> (i32, i32) {
    %c0_i32 = arith.constant 0 : i32
    return %arg2, %arg1 : i32, i32
  }
  func.func @transform_2(%arg0: i32, %arg1: i32, %arg2: i32) -> (i32, i32) {
    %c0_i32 = arith.constant 0 : i32
    %c0_i32_0 = arith.constant 0 : i32
    return %c0_i32, %arg1 : i32, i32
  }
  func.func @transform_3(%arg0: i32, %arg1: i32, %arg2: i32) -> (i32, i32) {
    %c0_i32 = arith.constant 0 : i32
    return %arg0, %arg1 : i32, i32
  }
}

module attributes {stable_mosaic.version = 11 : i64} {
  func.func @_mm_kernel(%arg0: i32, %arg1: i32, %arg2: i32, %arg3: memref<16x8xf32, #tpu.memory_space<vmem>>, %arg4: memref<8x128xbf16, #tpu.memory_space<vmem>>, %arg5: memref<16x128xf32, #tpu.memory_space<vmem>>, %arg6: memref<16x128xf32, #tpu.memory_space<vmem>>) attributes {dimension_semantics = [#tpu.dimension_semantics<parallel>, #tpu.dimension_semantics<parallel>, #tpu.dimension_semantics<arbitrary>], iteration_bounds = array<i64: 1, 1, 1>, scalar_prefetch = 0 : i64, scratch_operands = 1 : i64, tpu.core_type = #tpu.core_type<tc>, window_params = [{transform_indices = @transform_0, window_bounds = array<i64: 16, 8>}, {transform_indices = @transform_1, window_bounds = array<i64: 8, 128>}, {transform_indices = @transform_2, window_bounds = array<i64: 16, 128>}]} {
    %c0_i32 = arith.constant 0 : i32
    %0 = arith.cmpi eq, %arg2, %c0_i32 : i32
    %1 = arith.extui %0 : i1 to i32
    %c0_i32_0 = arith.constant 0 : i32
    %2 = arith.cmpi ne, %1, %c0_i32_0 : i32
    scf.if %2 {
      %cst_10 = arith.constant 0.000000e+00 : f32
      %13 = vector.broadcast %cst_10 : f32 to vector<16x128xf32>
      %c0_11 = arith.constant 0 : index
      %c0_12 = arith.constant 0 : index
      %14 = vector.load %arg6[%c0_11, %c0_12] : memref<16x128xf32, #tpu.memory_space<vmem>>, vector<16x128xf32>
      tpu.vector_store %arg6[%c0_11, %c0_12], %13 {strides = array<i32>} : memref<16x128xf32, #tpu.memory_space<vmem>>, vector<16x128xf32>,
    } else {
    }
    %c0 = arith.constant 0 : index
    %c0_1 = arith.constant 0 : index
    %3 = vector.load %arg6[%c0, %c0_1] : memref<16x128xf32, #tpu.memory_space<vmem>>, vector<16x128xf32>
    %c0_2 = arith.constant 0 : index
    %c0_3 = arith.constant 0 : index
    %4 = vector.load %arg3[%c0_2, %c0_3] : memref<16x8xf32, #tpu.memory_space<vmem>>, vector<16x8xf32>
    %5 = arith.truncf %4 : vector<16x8xf32> to vector<16x8xbf16>
    %c0_4 = arith.constant 0 : index
    %c0_5 = arith.constant 0 : index
    %6 = vector.load %arg4[%c0_4, %c0_5] : memref<8x128xbf16, #tpu.memory_space<vmem>>, vector<8x128xbf16>
    %cst = arith.constant dense<0.000000e+00> : vector<16x128xf32>
    %7 = tpu.matmul %5, %6, %cst {dimension_numbers = #tpu.dot_dimension_numbers<[1], [0], [0], [1], [0, 0, 1, 1], [], []>} : vector<16x8xbf16>, vector<8x128xbf16>, vector<16x128xf32> -> vector<16x128xf32>
    %8 = arith.addf %3, %7 : vector<16x128xf32>
    %c0_6 = arith.constant 0 : index
    %c0_7 = arith.constant 0 : index
    %9 = vector.load %arg6[%c0_6, %c0_7] : memref<16x128xf32, #tpu.memory_space<vmem>>, vector<16x128xf32>
    tpu.vector_store %arg6[%c0_6, %c0_7], %8 {strides = array<i32>} : memref<16x128xf32, #tpu.memory_space<vmem>>, vector<16x128xf32>,
    %c0_i32_8 = arith.constant 0 : i32
    %10 = arith.cmpi eq, %arg2, %c0_i32_8 : i32
    %11 = arith.extui %10 : i1 to i32
    %c0_i32_9 = arith.constant 0 : i32
    %12 = arith.cmpi ne, %11, %c0_i32_9 : i32
    scf.if %12 {
      %c0_10 = arith.constant 0 : index
      %c0_11 = arith.constant 0 : index
      %13 = vector.load %arg6[%c0_10, %c0_11] : memref<16x128xf32, #tpu.memory_space<vmem>>, vector<16x128xf32>
      %c0_12 = arith.constant 0 : index
      %c0_13 = arith.constant 0 : index
      %14 = vector.load %arg5[%c0_12, %c0_13] : memref<16x128xf32, #tpu.memory_space<vmem>>, vector<16x128xf32>
      tpu.vector_store %arg5[%c0_12, %c0_13], %13 {strides = array<i32>} : memref<16x128xf32, #tpu.memory_space<vmem>>, vector<16x128xf32>,
    } else {
    }
    return
  }
  func.func @transform_0(%arg0: i32, %arg1: i32, %arg2: i32) -> (i32, i32) {
    %c0_i32 = arith.constant 0 : i32
    return %arg0, %arg2 : i32, i32
  }
  func.func @transform_1(%arg0: i32, %arg1: i32, %arg2: i32) -> (i32, i32) {
    %c0_i32 = arith.constant 0 : i32
    return %arg2, %arg1 : i32, i32
  }
  func.func @transform_2(%arg0: i32, %arg1: i32, %arg2: i32) -> (i32, i32) {
    %c0_i32 = arith.constant 0 : i32
    return %arg0, %arg1 : i32, i32
  }
}

module attributes {stable_mosaic.version = 11 : i64} {
  func.func @_adaln_kernel(%arg0: i32, %arg1: i32, %arg2: memref<1x8x128xf32, #tpu.memory_space<vmem>>, %arg3: memref<1x1x128xf32, #tpu.memory_space<vmem>>, %arg4: memref<1x1x128xf32, #tpu.memory_space<vmem>>, %arg5: memref<1x8x128xbf16, #tpu.memory_space<vmem>>) attributes {dimension_semantics = [#tpu.dimension_semantics<parallel>, #tpu.dimension_semantics<parallel>], iteration_bounds = array<i64: 2, 1>, scalar_prefetch = 0 : i64, scratch_operands = 0 : i64, tpu.core_type = #tpu.core_type<tc>, window_params = [{transform_indices = @transform_0, window_bounds = array<i64: 1, 8, 128>}, {transform_indices = @transform_1, window_bounds = array<i64: 1, 1, 128>}, {transform_indices = @transform_2, window_bounds = array<i64: 1, 1, 128>}, {transform_indices = @transform_3, window_bounds = array<i64: 1, 8, 128>}]} {
    %c0 = arith.constant 0 : index
    %c0_0 = arith.constant 0 : index
    %c0_1 = arith.constant 0 : index
    %0 = vector.load %arg2[%c0, %c0_0, %c0_1] : memref<1x8x128xf32, #tpu.memory_space<vmem>>, vector<1x8x128xf32>
    %1 = vector.shape_cast %0 : vector<1x8x128xf32> to vector<8x128xf32>
    %cst = arith.constant dense<0.000000e+00> : vector<8xf32>
    %2 = vector.multi_reduction <add>, %1, %cst [1] : vector<8x128xf32> to vector<8xf32>
    %3 = vector.shape_cast %2 : vector<8xf32> to vector<8x1xf32>
    %cst_2 = arith.constant 1.280000e+02 : f32
    %4 = vector.broadcast %cst_2 : f32 to vector<8x1xf32>
    %5 = arith.divf %3, %4 : vector<8x1xf32>
    %6 = vector.broadcast %5 : vector<8x1xf32> to vector<8x128xf32>
    %7 = arith.subf %1, %6 : vector<8x128xf32>
    %8 = arith.mulf %7, %7 : vector<8x128xf32>
    %cst_3 = arith.constant dense<0.000000e+00> : vector<8xf32>
    %9 = vector.multi_reduction <add>, %8, %cst_3 [1] : vector<8x128xf32> to vector<8xf32>
    %10 = vector.shape_cast %9 : vector<8xf32> to vector<8x1xf32>
    %cst_4 = arith.constant 1.280000e+02 : f32
    %11 = vector.broadcast %cst_4 : f32 to vector<8x1xf32>
    %12 = arith.divf %10, %11 : vector<8x1xf32>
    %cst_5 = arith.constant 9.99999974E-6 : f32
    %13 = vector.broadcast %cst_5 : f32 to vector<8x1xf32>
    %14 = arith.addf %12, %13 : vector<8x1xf32>
    %15 = math.rsqrt %14 : vector<8x1xf32>
    %16 = vector.broadcast %15 : vector<8x1xf32> to vector<8x128xf32>
    %17 = arith.mulf %7, %16 : vector<8x128xf32>
    %c0_6 = arith.constant 0 : index
    %c0_7 = arith.constant 0 : index
    %c0_8 = arith.constant 0 : index
    %18 = vector.load %arg3[%c0_6, %c0_7, %c0_8] : memref<1x1x128xf32, #tpu.memory_space<vmem>>, vector<1x1x128xf32>
    %19 = vector.shape_cast %18 : vector<1x1x128xf32> to vector<1x128xf32>
    %cst_9 = arith.constant 1.000000e+00 : f32
    %20 = vector.broadcast %cst_9 : f32 to vector<1x128xf32>
    %21 = arith.addf %20, %19 : vector<1x128xf32>
    %22 = vector.broadcast %21 : vector<1x128xf32> to vector<8x128xf32>
    %23 = arith.mulf %17, %22 : vector<8x128xf32>
    %c0_10 = arith.constant 0 : index
    %c0_11 = arith.constant 0 : index
    %c0_12 = arith.constant 0 : index
    %24 = vector.load %arg4[%c0_10, %c0_11, %c0_12] : memref<1x1x128xf32, #tpu.memory_space<vmem>>, vector<1x1x128xf32>
    %25 = vector.shape_cast %24 : vector<1x1x128xf32> to vector<1x128xf32>
    %26 = vector.broadcast %25 : vector<1x128xf32> to vector<8x128xf32>
    %27 = arith.addf %23, %26 : vector<8x128xf32>
    %28 = arith.truncf %27 : vector<8x128xf32> to vector<8x128xbf16>
    %c0_13 = arith.constant 0 : index
    %c0_14 = arith.constant 0 : index
    %c0_15 = arith.constant 0 : index
    %29 = vector.load %arg5[%c0_13, %c0_14, %c0_15] : memref<1x8x128xbf16, #tpu.memory_space<vmem>>, vector<1x8x128xbf16>
    %30 = vector.shape_cast %29 : vector<1x8x128xbf16> to vector<8x128xbf16>
    %31 = vector.shape_cast %28 : vector<8x128xbf16> to vector<1x8x128xbf16>
    tpu.vector_store %arg5[%c0_13, %c0_14, %c0_15], %31 {strides = array<i32>} : memref<1x8x128xbf16, #tpu.memory_space<vmem>>, vector<1x8x128xbf16>,
    return
  }
  func.func @transform_0(%arg0: i32, %arg1: i32) -> (i32, i32, i32) {
    %c0_i32 = arith.constant 0 : i32
    %c0_i32_0 = arith.constant 0 : i32
    return %arg0, %arg1, %c0_i32 : i32, i32, i32
  }
  func.func @transform_1(%arg0: i32, %arg1: i32) -> (i32, i32, i32) {
    %c0_i32 = arith.constant 0 : i32
    %c0_i32_0 = arith.constant 0 : i32
    %c0_i32_1 = arith.constant 0 : i32
    return %arg0, %c0_i32, %c0_i32_0 : i32, i32, i32
  }
  func.func @transform_2(%arg0: i32, %arg1: i32) -> (i32, i32, i32) {
    %c0_i32 = arith.constant 0 : i32
    %c0_i32_0 = arith.constant 0 : i32
    %c0_i32_1 = arith.constant 0 : i32
    return %arg0, %c0_i32, %c0_i32_0 : i32, i32, i32
  }
  func.func @transform_3(%arg0: i32, %arg1: i32) -> (i32, i32, i32) {
    %c0_i32 = arith.constant 0 : i32
    %c0_i32_0 = arith.constant 0 : i32
    return %arg0, %arg1, %c0_i32 : i32, i32, i32
  }
}

module attributes {stable_mosaic.version = 11 : i64} {
  func.func @_proj_heads_kernel(%arg0: i32, %arg1: i32, %arg2: i32, %arg3: memref<16x128xbf16, #tpu.memory_space<vmem>>, %arg4: memref<1x128x64xbf16, #tpu.memory_space<vmem>>, %arg5: memref<1x16x64xbf16, #tpu.memory_space<vmem>>, %arg6: memref<16x64xf32, #tpu.memory_space<vmem>>) attributes {dimension_semantics = [#tpu.dimension_semantics<parallel>, #tpu.dimension_semantics<parallel>, #tpu.dimension_semantics<arbitrary>], iteration_bounds = array<i64: 6, 1, 1>, scalar_prefetch = 0 : i64, scratch_operands = 1 : i64, tpu.core_type = #tpu.core_type<tc>, window_params = [{transform_indices = @transform_0, window_bounds = array<i64: 16, 128>}, {transform_indices = @transform_1, window_bounds = array<i64: 1, 128, 64>}, {transform_indices = @transform_2, window_bounds = array<i64: 1, 16, 64>}]} {
    %c0_i32 = arith.constant 0 : i32
    %0 = arith.cmpi eq, %arg2, %c0_i32 : i32
    %1 = arith.extui %0 : i1 to i32
    %c0_i32_0 = arith.constant 0 : i32
    %2 = arith.cmpi ne, %1, %c0_i32_0 : i32
    scf.if %2 {
      %cst_11 = arith.constant 0.000000e+00 : f32
      %13 = vector.broadcast %cst_11 : f32 to vector<16x64xf32>
      %c0_12 = arith.constant 0 : index
      %c0_13 = arith.constant 0 : index
      %14 = vector.load %arg6[%c0_12, %c0_13] : memref<16x64xf32, #tpu.memory_space<vmem>>, vector<16x64xf32>
      tpu.vector_store %arg6[%c0_12, %c0_13], %13 {strides = array<i32>} : memref<16x64xf32, #tpu.memory_space<vmem>>, vector<16x64xf32>,
    } else {
    }
    %c0 = arith.constant 0 : index
    %c0_1 = arith.constant 0 : index
    %3 = vector.load %arg6[%c0, %c0_1] : memref<16x64xf32, #tpu.memory_space<vmem>>, vector<16x64xf32>
    %c0_2 = arith.constant 0 : index
    %c0_3 = arith.constant 0 : index
    %4 = vector.load %arg3[%c0_2, %c0_3] : memref<16x128xbf16, #tpu.memory_space<vmem>>, vector<16x128xbf16>
    %c0_4 = arith.constant 0 : index
    %c0_5 = arith.constant 0 : index
    %c0_6 = arith.constant 0 : index
    %5 = vector.load %arg4[%c0_4, %c0_5, %c0_6] : memref<1x128x64xbf16, #tpu.memory_space<vmem>>, vector<1x128x64xbf16>
    %6 = vector.shape_cast %5 : vector<1x128x64xbf16> to vector<128x64xbf16>
    %cst = arith.constant dense<0.000000e+00> : vector<16x64xf32>
    %7 = tpu.matmul %4, %6, %cst {dimension_numbers = #tpu.dot_dimension_numbers<[1], [0], [0], [1], [0, 0, 1, 1], [], []>} : vector<16x128xbf16>, vector<128x64xbf16>, vector<16x64xf32> -> vector<16x64xf32>
    %8 = arith.addf %3, %7 : vector<16x64xf32>
    %c0_7 = arith.constant 0 : index
    %c0_8 = arith.constant 0 : index
    %9 = vector.load %arg6[%c0_7, %c0_8] : memref<16x64xf32, #tpu.memory_space<vmem>>, vector<16x64xf32>
    tpu.vector_store %arg6[%c0_7, %c0_8], %8 {strides = array<i32>} : memref<16x64xf32, #tpu.memory_space<vmem>>, vector<16x64xf32>,
    %c0_i32_9 = arith.constant 0 : i32
    %10 = arith.cmpi eq, %arg2, %c0_i32_9 : i32
    %11 = arith.extui %10 : i1 to i32
    %c0_i32_10 = arith.constant 0 : i32
    %12 = arith.cmpi ne, %11, %c0_i32_10 : i32
    scf.if %12 {
      %c0_11 = arith.constant 0 : index
      %c0_12 = arith.constant 0 : index
      %13 = vector.load %arg6[%c0_11, %c0_12] : memref<16x64xf32, #tpu.memory_space<vmem>>, vector<16x64xf32>
      %14 = arith.truncf %13 : vector<16x64xf32> to vector<16x64xbf16>
      %c0_13 = arith.constant 0 : index
      %c0_14 = arith.constant 0 : index
      %c0_15 = arith.constant 0 : index
      %15 = vector.load %arg5[%c0_13, %c0_14, %c0_15] : memref<1x16x64xbf16, #tpu.memory_space<vmem>>, vector<1x16x64xbf16>
      %16 = vector.shape_cast %15 : vector<1x16x64xbf16> to vector<16x64xbf16>
      %17 = vector.shape_cast %14 : vector<16x64xbf16> to vector<1x16x64xbf16>
      tpu.vector_store %arg5[%c0_13, %c0_14, %c0_15], %17 {strides = array<i32>} : memref<1x16x64xbf16, #tpu.memory_space<vmem>>, vector<1x16x64xbf16>,
    } else {
    }
    return
  }
  func.func @transform_0(%arg0: i32, %arg1: i32, %arg2: i32) -> (i32, i32) {
    %c0_i32 = arith.constant 0 : i32
    return %arg1, %arg2 : i32, i32
  }
  func.func @transform_1(%arg0: i32, %arg1: i32, %arg2: i32) -> (i32, i32, i32) {
    %c0_i32 = arith.constant 0 : i32
    %c0_i32_0 = arith.constant 0 : i32
    return %arg0, %arg2, %c0_i32 : i32, i32, i32
  }
  func.func @transform_2(%arg0: i32, %arg1: i32, %arg2: i32) -> (i32, i32, i32) {
    %c0_i32 = arith.constant 0 : i32
    %c0_i32_0 = arith.constant 0 : i32
    return %arg0, %arg1, %c0_i32 : i32, i32, i32
  }
}

module attributes {stable_mosaic.version = 11 : i64} {
  func.func @_flash_attn_kernel(%arg0: i32, %arg1: i32, %arg2: i32, %arg3: i32, %arg4: memref<1x1x8x64xbf16, #tpu.memory_space<vmem>>, %arg5: memref<1x1x8x64xbf16, #tpu.memory_space<vmem>>, %arg6: memref<1x1x8x64xbf16, #tpu.memory_space<vmem>>, %arg7: memref<1x1x8x64xbf16, #tpu.memory_space<vmem>>, %arg8: memref<8x1xf32, #tpu.memory_space<vmem>>, %arg9: memref<8x1xf32, #tpu.memory_space<vmem>>, %arg10: memref<8x64xf32, #tpu.memory_space<vmem>>) attributes {dimension_semantics = [#tpu.dimension_semantics<parallel>, #tpu.dimension_semantics<parallel>, #tpu.dimension_semantics<parallel>, #tpu.dimension_semantics<arbitrary>], iteration_bounds = array<i64: 2, 2, 1, 1>, scalar_prefetch = 0 : i64, scratch_operands = 3 : i64, tpu.core_type = #tpu.core_type<tc>, window_params = [{transform_indices = @transform_0, window_bounds = array<i64: 1, 1, 8, 64>}, {transform_indices = @transform_1, window_bounds = array<i64: 1, 1, 8, 64>}, {transform_indices = @transform_2, window_bounds = array<i64: 1, 1, 8, 64>}, {transform_indices = @transform_3, window_bounds = array<i64: 1, 1, 8, 64>}]} {
    %c0_i32 = arith.constant 0 : i32
    %0 = arith.cmpi eq, %arg3, %c0_i32 : i32
    %1 = arith.extui %0 : i1 to i32
    %c0_i32_0 = arith.constant 0 : i32
    %2 = arith.cmpi ne, %1, %c0_i32_0 : i32
    scf.if %2 {
      %cst_29 = arith.constant 0xFF800000 : f32
      %36 = vector.broadcast %cst_29 : f32 to vector<8x1xf32>
      %c0_30 = arith.constant 0 : index
      %c0_31 = arith.constant 0 : index
      %37 = vector.load %arg8[%c0_30, %c0_31] : memref<8x1xf32, #tpu.memory_space<vmem>>, vector<8x1xf32>
      tpu.vector_store %arg8[%c0_30, %c0_31], %36 {strides = array<i32>} : memref<8x1xf32, #tpu.memory_space<vmem>>, vector<8x1xf32>,
      %cst_32 = arith.constant 0.000000e+00 : f32
      %38 = vector.broadcast %cst_32 : f32 to vector<8x1xf32>
      %c0_33 = arith.constant 0 : index
      %c0_34 = arith.constant 0 : index
      %39 = vector.load %arg9[%c0_33, %c0_34] : memref<8x1xf32, #tpu.memory_space<vmem>>, vector<8x1xf32>
      tpu.vector_store %arg9[%c0_33, %c0_34], %38 {strides = array<i32>} : memref<8x1xf32, #tpu.memory_space<vmem>>, vector<8x1xf32>,
      %cst_35 = arith.constant 0.000000e+00 : f32
      %40 = vector.broadcast %cst_35 : f32 to vector<8x64xf32>
      %c0_36 = arith.constant 0 : index
      %c0_37 = arith.constant 0 : index
      %41 = vector.load %arg10[%c0_36, %c0_37] : memref<8x64xf32, #tpu.memory_space<vmem>>, vector<8x64xf32>
      tpu.vector_store %arg10[%c0_36, %c0_37], %40 {strides = array<i32>} : memref<8x64xf32, #tpu.memory_space<vmem>>, vector<8x64xf32>,
    } else {
    }
    %c0 = arith.constant 0 : index
    %c0_1 = arith.constant 0 : index
    %c0_2 = arith.constant 0 : index
    %c0_3 = arith.constant 0 : index
    %3 = vector.load %arg4[%c0, %c0_1, %c0_2, %c0_3] : memref<1x1x8x64xbf16, #tpu.memory_space<vmem>>, vector<1x1x8x64xbf16>
    %4 = vector.shape_cast %3 : vector<1x1x8x64xbf16> to vector<8x64xbf16>
    %c0_4 = arith.constant 0 : index
    %c0_5 = arith.constant 0 : index
    %c0_6 = arith.constant 0 : index
    %c0_7 = arith.constant 0 : index
    %5 = vector.load %arg5[%c0_4, %c0_5, %c0_6, %c0_7] : memref<1x1x8x64xbf16, #tpu.memory_space<vmem>>, vector<1x1x8x64xbf16>
    %6 = vector.shape_cast %5 : vector<1x1x8x64xbf16> to vector<8x64xbf16>
    %c0_8 = arith.constant 0 : index
    %c0_9 = arith.constant 0 : index
    %c0_10 = arith.constant 0 : index
    %c0_11 = arith.constant 0 : index
    %7 = vector.load %arg6[%c0_8, %c0_9, %c0_10, %c0_11] : memref<1x1x8x64xbf16, #tpu.memory_space<vmem>>, vector<1x1x8x64xbf16>
    %8 = vector.shape_cast %7 : vector<1x1x8x64xbf16> to vector<8x64xbf16>
    %cst = arith.constant dense<0.000000e+00> : vector<8x8xf32>
    %9 = tpu.matmul %4, %6, %cst {dimension_numbers = #tpu.dot_dimension_numbers<[1], [1], [0], [0], [0, 0, 1, 0], [], []>} : vector<8x64xbf16>, vector<8x64xbf16>, vector<8x8xf32> -> vector<8x8xf32>
    %c0_12 = arith.constant 0 : index
    %c0_13 = arith.constant 0 : index
    %10 = vector.load %arg8[%c0_12, %c0_13] : memref<8x1xf32, #tpu.memory_space<vmem>>, vector<8x1xf32>
    %cst_14 = arith.constant dense<0xFF800000> : vector<8xf32>
    %11 = vector.multi_reduction <maximumf>, %9, %cst_14 [1] : vector<8x8xf32> to vector<8xf32>
    %12 = vector.shape_cast %11 : vector<8xf32> to vector<8x1xf32>
    %13 = arith.maximumf %10, %12 : vector<8x1xf32>
    %14 = arith.subf %10, %13 : vector<8x1xf32>
    %15 = math.exp %14 : vector<8x1xf32>
    %16 = vector.broadcast %13 : vector<8x1xf32> to vector<8x8xf32>
    %17 = arith.subf %9, %16 : vector<8x8xf32>
    %18 = math.exp %17 : vector<8x8xf32>
    %c0_15 = arith.constant 0 : index
    %c0_16 = arith.constant 0 : index
    %19 = vector.load %arg9[%c0_15, %c0_16] : memref<8x1xf32, #tpu.memory_space<vmem>>, vector<8x1xf32>
    %20 = arith.mulf %15, %19 : vector<8x1xf32>
    %cst_17 = arith.constant dense<0.000000e+00> : vector<8xf32>
    %21 = vector.multi_reduction <add>, %18, %cst_17 [1] : vector<8x8xf32> to vector<8xf32>
    %22 = vector.shape_cast %21 : vector<8xf32> to vector<8x1xf32>
    %23 = arith.addf %20, %22 : vector<8x1xf32>
    %c0_18 = arith.constant 0 : index
    %c0_19 = arith.constant 0 : index
    %24 = vector.load %arg9[%c0_18, %c0_19] : memref<8x1xf32, #tpu.memory_space<vmem>>, vector<8x1xf32>
    tpu.vector_store %arg9[%c0_18, %c0_19], %23 {strides = array<i32>} : memref<8x1xf32, #tpu.memory_space<vmem>>, vector<8x1xf32>,
    %c0_20 = arith.constant 0 : index
    %c0_21 = arith.constant 0 : index
    %25 = vector.load %arg10[%c0_20, %c0_21] : memref<8x64xf32, #tpu.memory_space<vmem>>, vector<8x64xf32>
    %26 = vector.broadcast %15 : vector<8x1xf32> to vector<8x64xf32>
    %27 = arith.mulf %26, %25 : vector<8x64xf32>
    %28 = arith.truncf %18 : vector<8x8xf32> to vector<8x8xbf16>
    %cst_22 = arith.constant dense<0.000000e+00> : vector<8x64xf32>
    %29 = tpu.matmul %28, %8, %cst_22 {dimension_numbers = #tpu.dot_dimension_numbers<[1], [0], [0], [1], [0, 0, 1, 1], [], []>} : vector<8x8xbf16>, vector<8x64xbf16>, vector<8x64xf32> -> vector<8x64xf32>
    %30 = arith.addf %27, %29 : vector<8x64xf32>
    %c0_23 = arith.constant 0 : index
    %c0_24 = arith.constant 0 : index
    %31 = vector.load %arg10[%c0_23, %c0_24] : memref<8x64xf32, #tpu.memory_space<vmem>>, vector<8x64xf32>
    tpu.vector_store %arg10[%c0_23, %c0_24], %30 {strides = array<i32>} : memref<8x64xf32, #tpu.memory_space<vmem>>, vector<8x64xf32>,
    %c0_25 = arith.constant 0 : index
    %c0_26 = arith.constant 0 : index
    %32 = vector.load %arg8[%c0_25, %c0_26] : memref<8x1xf32, #tpu.memory_space<vmem>>, vector<8x1xf32>
    tpu.vector_store %arg8[%c0_25, %c0_26], %13 {strides = array<i32>} : memref<8x1xf32, #tpu.memory_space<vmem>>, vector<8x1xf32>,
    %c0_i32_27 = arith.constant 0 : i32
    %33 = arith.cmpi eq, %arg3, %c0_i32_27 : i32
    %34 = arith.extui %33 : i1 to i32
    %c0_i32_28 = arith.constant 0 : i32
    %35 = arith.cmpi ne, %34, %c0_i32_28 : i32
    scf.if %35 {
      %c0_29 = arith.constant 0 : index
      %c0_30 = arith.constant 0 : index
      %36 = vector.load %arg10[%c0_29, %c0_30] : memref<8x64xf32, #tpu.memory_space<vmem>>, vector<8x64xf32>
      %c0_31 = arith.constant 0 : index
      %c0_32 = arith.constant 0 : index
      %37 = vector.load %arg9[%c0_31, %c0_32] : memref<8x1xf32, #tpu.memory_space<vmem>>, vector<8x1xf32>
      %38 = tpu.reciprocal %37 {approx = true} : vector<8x1xf32> -> vector<8x1xf32>
      %39 = vector.broadcast %38 : vector<8x1xf32> to vector<8x64xf32>
      %40 = arith.mulf %36, %39 : vector<8x64xf32>
      %41 = arith.truncf %40 : vector<8x64xf32> to vector<8x64xbf16>
      %c0_33 = arith.constant 0 : index
      %c0_34 = arith.constant 0 : index
      %c0_35 = arith.constant 0 : index
      %c0_36 = arith.constant 0 : index
      %42 = vector.load %arg7[%c0_33, %c0_34, %c0_35, %c0_36] : memref<1x1x8x64xbf16, #tpu.memory_space<vmem>>, vector<1x1x8x64xbf16>
      %43 = vector.shape_cast %42 : vector<1x1x8x64xbf16> to vector<8x64xbf16>
      %44 = vector.shape_cast %41 : vector<8x64xbf16> to vector<1x1x8x64xbf16>
      tpu.vector_store %arg7[%c0_33, %c0_34, %c0_35, %c0_36], %44 {strides = array<i32>} : memref<1x1x8x64xbf16, #tpu.memory_space<vmem>>, vector<1x1x8x64xbf16>,
    } else {
    }
    return
  }
  func.func @transform_0(%arg0: i32, %arg1: i32, %arg2: i32, %arg3: i32) -> (i32, i32, i32, i32) {
    %c0_i32 = arith.constant 0 : i32
    %0 = arith.addi %c0_i32, %arg1 : i32
    %c0_i32_0 = arith.constant 0 : i32
    %c0_i32_1 = arith.constant 0 : i32
    return %0, %arg0, %arg2, %c0_i32_0 : i32, i32, i32, i32
  }
  func.func @transform_1(%arg0: i32, %arg1: i32, %arg2: i32, %arg3: i32) -> (i32, i32, i32, i32) {
    %c2_i32 = arith.constant 2 : i32
    %0 = arith.addi %c2_i32, %arg1 : i32
    %c0_i32 = arith.constant 0 : i32
    %c0_i32_0 = arith.constant 0 : i32
    return %0, %arg0, %arg3, %c0_i32 : i32, i32, i32, i32
  }
  func.func @transform_2(%arg0: i32, %arg1: i32, %arg2: i32, %arg3: i32) -> (i32, i32, i32, i32) {
    %c4_i32 = arith.constant 4 : i32
    %0 = arith.addi %c4_i32, %arg1 : i32
    %c0_i32 = arith.constant 0 : i32
    %c0_i32_0 = arith.constant 0 : i32
    return %0, %arg0, %arg3, %c0_i32 : i32, i32, i32, i32
  }
  func.func @transform_3(%arg0: i32, %arg1: i32, %arg2: i32, %arg3: i32) -> (i32, i32, i32, i32) {
    %c0_i32 = arith.constant 0 : i32
    %c0_i32_0 = arith.constant 0 : i32
    return %arg1, %arg0, %arg2, %c0_i32 : i32, i32, i32, i32
  }
}

module attributes {stable_mosaic.version = 11 : i64} {
  func.func @_attn_out_kernel(%arg0: i32, %arg1: i32, %arg2: i32, %arg3: memref<1x16x64xbf16, #tpu.memory_space<vmem>>, %arg4: memref<1x64x128xbf16, #tpu.memory_space<vmem>>, %arg5: memref<1x128xf32, #tpu.memory_space<vmem>>, %arg6: memref<16x128xf32, #tpu.memory_space<vmem>>, %arg7: memref<16x128xf32, #tpu.memory_space<vmem>>, %arg8: memref<16x128xf32, #tpu.memory_space<vmem>>) attributes {dimension_semantics = [#tpu.dimension_semantics<parallel>, #tpu.dimension_semantics<parallel>, #tpu.dimension_semantics<arbitrary>], iteration_bounds = array<i64: 1, 1, 2>, scalar_prefetch = 0 : i64, scratch_operands = 1 : i64, tpu.core_type = #tpu.core_type<tc>, window_params = [{transform_indices = @transform_0, window_bounds = array<i64: 1, 16, 64>}, {transform_indices = @transform_1, window_bounds = array<i64: 1, 64, 128>}, {transform_indices = @transform_2, window_bounds = array<i64: 1, 128>}, {transform_indices = @transform_3, window_bounds = array<i64: 16, 128>}, {transform_indices = @transform_4, window_bounds = array<i64: 16, 128>}]} {
    %c0_i32 = arith.constant 0 : i32
    %0 = arith.cmpi eq, %arg2, %c0_i32 : i32
    %1 = arith.extui %0 : i1 to i32
    %c0_i32_0 = arith.constant 0 : i32
    %2 = arith.cmpi ne, %1, %c0_i32_0 : i32
    scf.if %2 {
      %cst_11 = arith.constant 0.000000e+00 : f32
      %14 = vector.broadcast %cst_11 : f32 to vector<16x128xf32>
      %c0_12 = arith.constant 0 : index
      %c0_13 = arith.constant 0 : index
      %15 = vector.load %arg8[%c0_12, %c0_13] : memref<16x128xf32, #tpu.memory_space<vmem>>, vector<16x128xf32>
      tpu.vector_store %arg8[%c0_12, %c0_13], %14 {strides = array<i32>} : memref<16x128xf32, #tpu.memory_space<vmem>>, vector<16x128xf32>,
    } else {
    }
    %c0 = arith.constant 0 : index
    %c0_1 = arith.constant 0 : index
    %3 = vector.load %arg8[%c0, %c0_1] : memref<16x128xf32, #tpu.memory_space<vmem>>, vector<16x128xf32>
    %c0_2 = arith.constant 0 : index
    %c0_3 = arith.constant 0 : index
    %c0_4 = arith.constant 0 : index
    %4 = vector.load %arg3[%c0_2, %c0_3, %c0_4] : memref<1x16x64xbf16, #tpu.memory_space<vmem>>, vector<1x16x64xbf16>
    %5 = vector.shape_cast %4 : vector<1x16x64xbf16> to vector<16x64xbf16>
    %c0_5 = arith.constant 0 : index
    %c0_6 = arith.constant 0 : index
    %c0_7 = arith.constant 0 : index
    %6 = vector.load %arg4[%c0_5, %c0_6, %c0_7] : memref<1x64x128xbf16, #tpu.memory_space<vmem>>, vector<1x64x128xbf16>
    %7 = vector.shape_cast %6 : vector<1x64x128xbf16> to vector<64x128xbf16>
    %cst = arith.constant dense<0.000000e+00> : vector<16x128xf32>
    %8 = tpu.matmul %5, %7, %cst {dimension_numbers = #tpu.dot_dimension_numbers<[1], [0], [0], [1], [0, 0, 1, 1], [], []>} : vector<16x64xbf16>, vector<64x128xbf16>, vector<16x128xf32> -> vector<16x128xf32>
    %9 = arith.addf %3, %8 : vector<16x128xf32>
    %c0_8 = arith.constant 0 : index
    %c0_9 = arith.constant 0 : index
    %10 = vector.load %arg8[%c0_8, %c0_9] : memref<16x128xf32, #tpu.memory_space<vmem>>, vector<16x128xf32>
    tpu.vector_store %arg8[%c0_8, %c0_9], %9 {strides = array<i32>} : memref<16x128xf32, #tpu.memory_space<vmem>>, vector<16x128xf32>,
    %c1_i32 = arith.constant 1 : i32
    %11 = arith.cmpi eq, %arg2, %c1_i32 : i32
    %12 = arith.extui %11 : i1 to i32
    %c0_i32_10 = arith.constant 0 : i32
    %13 = arith.cmpi ne, %12, %c0_i32_10 : i32
    scf.if %13 {
      %c0_11 = arith.constant 0 : index
      %c0_12 = arith.constant 0 : index
      %14 = vector.load %arg8[%c0_11, %c0_12] : memref<16x128xf32, #tpu.memory_space<vmem>>, vector<16x128xf32>
      %c0_13 = arith.constant 0 : index
      %c0_14 = arith.constant 0 : index
      %15 = vector.load %arg5[%c0_13, %c0_14] : memref<1x128xf32, #tpu.memory_space<vmem>>, vector<1x128xf32>
      %16 = vector.broadcast %15 : vector<1x128xf32> to vector<16x128xf32>
      %17 = arith.addf %14, %16 : vector<16x128xf32>
      %c0_15 = arith.constant 0 : index
      %c0_16 = arith.constant 0 : index
      %18 = vector.load %arg6[%c0_15, %c0_16] : memref<16x128xf32, #tpu.memory_space<vmem>>, vector<16x128xf32>
      %19 = arith.addf %17, %18 : vector<16x128xf32>
      %c0_17 = arith.constant 0 : index
      %c0_18 = arith.constant 0 : index
      %20 = vector.load %arg7[%c0_17, %c0_18] : memref<16x128xf32, #tpu.memory_space<vmem>>, vector<16x128xf32>
      tpu.vector_store %arg7[%c0_17, %c0_18], %19 {strides = array<i32>} : memref<16x128xf32, #tpu.memory_space<vmem>>, vector<16x128xf32>,
    } else {
    }
    return
  }
  func.func @transform_0(%arg0: i32, %arg1: i32, %arg2: i32) -> (i32, i32, i32) {
    %c0_i32 = arith.constant 0 : i32
    %c0_i32_0 = arith.constant 0 : i32
    return %arg2, %arg0, %c0_i32 : i32, i32, i32
  }
  func.func @transform_1(%arg0: i32, %arg1: i32, %arg2: i32) -> (i32, i32, i32) {
    %c0_i32 = arith.constant 0 : i32
    %c0_i32_0 = arith.constant 0 : i32
    return %arg2, %c0_i32, %arg1 : i32, i32, i32
  }
  func.func @transform_2(%arg0: i32, %arg1: i32, %arg2: i32) -> (i32, i32) {
    %c0_i32 = arith.constant 0 : i32
    %c0_i32_0 = arith.constant 0 : i32
    return %c0_i32, %arg1 : i32, i32
  }
  func.func @transform_3(%arg0: i32, %arg1: i32, %arg2: i32) -> (i32, i32) {
    %c0_i32 = arith.constant 0 : i32
    return %arg0, %arg1 : i32, i32
  }
  func.func @transform_4(%arg0: i32, %arg1: i32, %arg2: i32) -> (i32, i32) {
    %c0_i32 = arith.constant 0 : i32
    return %arg0, %arg1 : i32, i32
  }
}

module attributes {stable_mosaic.version = 11 : i64} {
  func.func @_proj_heads_kernel(%arg0: i32, %arg1: i32, %arg2: i32, %arg3: memref<16x128xbf16, #tpu.memory_space<vmem>>, %arg4: memref<1x128x64xbf16, #tpu.memory_space<vmem>>, %arg5: memref<1x16x64xbf16, #tpu.memory_space<vmem>>, %arg6: memref<16x64xf32, #tpu.memory_space<vmem>>) attributes {dimension_semantics = [#tpu.dimension_semantics<parallel>, #tpu.dimension_semantics<parallel>, #tpu.dimension_semantics<arbitrary>], iteration_bounds = array<i64: 4, 1, 1>, scalar_prefetch = 0 : i64, scratch_operands = 1 : i64, tpu.core_type = #tpu.core_type<tc>, window_params = [{transform_indices = @transform_0, window_bounds = array<i64: 16, 128>}, {transform_indices = @transform_1, window_bounds = array<i64: 1, 128, 64>}, {transform_indices = @transform_2, window_bounds = array<i64: 1, 16, 64>}]} {
    %c0_i32 = arith.constant 0 : i32
    %0 = arith.cmpi eq, %arg2, %c0_i32 : i32
    %1 = arith.extui %0 : i1 to i32
    %c0_i32_0 = arith.constant 0 : i32
    %2 = arith.cmpi ne, %1, %c0_i32_0 : i32
    scf.if %2 {
      %cst_11 = arith.constant 0.000000e+00 : f32
      %13 = vector.broadcast %cst_11 : f32 to vector<16x64xf32>
      %c0_12 = arith.constant 0 : index
      %c0_13 = arith.constant 0 : index
      %14 = vector.load %arg6[%c0_12, %c0_13] : memref<16x64xf32, #tpu.memory_space<vmem>>, vector<16x64xf32>
      tpu.vector_store %arg6[%c0_12, %c0_13], %13 {strides = array<i32>} : memref<16x64xf32, #tpu.memory_space<vmem>>, vector<16x64xf32>,
    } else {
    }
    %c0 = arith.constant 0 : index
    %c0_1 = arith.constant 0 : index
    %3 = vector.load %arg6[%c0, %c0_1] : memref<16x64xf32, #tpu.memory_space<vmem>>, vector<16x64xf32>
    %c0_2 = arith.constant 0 : index
    %c0_3 = arith.constant 0 : index
    %4 = vector.load %arg3[%c0_2, %c0_3] : memref<16x128xbf16, #tpu.memory_space<vmem>>, vector<16x128xbf16>
    %c0_4 = arith.constant 0 : index
    %c0_5 = arith.constant 0 : index
    %c0_6 = arith.constant 0 : index
    %5 = vector.load %arg4[%c0_4, %c0_5, %c0_6] : memref<1x128x64xbf16, #tpu.memory_space<vmem>>, vector<1x128x64xbf16>
    %6 = vector.shape_cast %5 : vector<1x128x64xbf16> to vector<128x64xbf16>
    %cst = arith.constant dense<0.000000e+00> : vector<16x64xf32>
    %7 = tpu.matmul %4, %6, %cst {dimension_numbers = #tpu.dot_dimension_numbers<[1], [0], [0], [1], [0, 0, 1, 1], [], []>} : vector<16x128xbf16>, vector<128x64xbf16>, vector<16x64xf32> -> vector<16x64xf32>
    %8 = arith.addf %3, %7 : vector<16x64xf32>
    %c0_7 = arith.constant 0 : index
    %c0_8 = arith.constant 0 : index
    %9 = vector.load %arg6[%c0_7, %c0_8] : memref<16x64xf32, #tpu.memory_space<vmem>>, vector<16x64xf32>
    tpu.vector_store %arg6[%c0_7, %c0_8], %8 {strides = array<i32>} : memref<16x64xf32, #tpu.memory_space<vmem>>, vector<16x64xf32>,
    %c0_i32_9 = arith.constant 0 : i32
    %10 = arith.cmpi eq, %arg2, %c0_i32_9 : i32
    %11 = arith.extui %10 : i1 to i32
    %c0_i32_10 = arith.constant 0 : i32
    %12 = arith.cmpi ne, %11, %c0_i32_10 : i32
    scf.if %12 {
      %c0_11 = arith.constant 0 : index
      %c0_12 = arith.constant 0 : index
      %13 = vector.load %arg6[%c0_11, %c0_12] : memref<16x64xf32, #tpu.memory_space<vmem>>, vector<16x64xf32>
      %14 = arith.truncf %13 : vector<16x64xf32> to vector<16x64xbf16>
      %c0_13 = arith.constant 0 : index
      %c0_14 = arith.constant 0 : index
      %c0_15 = arith.constant 0 : index
      %15 = vector.load %arg5[%c0_13, %c0_14, %c0_15] : memref<1x16x64xbf16, #tpu.memory_space<vmem>>, vector<1x16x64xbf16>
      %16 = vector.shape_cast %15 : vector<1x16x64xbf16> to vector<16x64xbf16>
      %17 = vector.shape_cast %14 : vector<16x64xbf16> to vector<1x16x64xbf16>
      tpu.vector_store %arg5[%c0_13, %c0_14, %c0_15], %17 {strides = array<i32>} : memref<1x16x64xbf16, #tpu.memory_space<vmem>>, vector<1x16x64xbf16>,
    } else {
    }
    return
  }
  func.func @transform_0(%arg0: i32, %arg1: i32, %arg2: i32) -> (i32, i32) {
    %c0_i32 = arith.constant 0 : i32
    return %arg1, %arg2 : i32, i32
  }
  func.func @transform_1(%arg0: i32, %arg1: i32, %arg2: i32) -> (i32, i32, i32) {
    %c0_i32 = arith.constant 0 : i32
    %c0_i32_0 = arith.constant 0 : i32
    return %arg0, %arg2, %c0_i32 : i32, i32, i32
  }
  func.func @transform_2(%arg0: i32, %arg1: i32, %arg2: i32) -> (i32, i32, i32) {
    %c0_i32 = arith.constant 0 : i32
    %c0_i32_0 = arith.constant 0 : i32
    return %arg0, %arg1, %c0_i32 : i32, i32, i32
  }
}

module attributes {stable_mosaic.version = 11 : i64} {
  func.func @_proj_heads_kernel(%arg0: i32, %arg1: i32, %arg2: i32, %arg3: memref<16x128xbf16, #tpu.memory_space<vmem>>, %arg4: memref<1x128x64xbf16, #tpu.memory_space<vmem>>, %arg5: memref<1x16x64xbf16, #tpu.memory_space<vmem>>, %arg6: memref<16x64xf32, #tpu.memory_space<vmem>>) attributes {dimension_semantics = [#tpu.dimension_semantics<parallel>, #tpu.dimension_semantics<parallel>, #tpu.dimension_semantics<arbitrary>], iteration_bounds = array<i64: 2, 1, 1>, scalar_prefetch = 0 : i64, scratch_operands = 1 : i64, tpu.core_type = #tpu.core_type<tc>, window_params = [{transform_indices = @transform_0, window_bounds = array<i64: 16, 128>}, {transform_indices = @transform_1, window_bounds = array<i64: 1, 128, 64>}, {transform_indices = @transform_2, window_bounds = array<i64: 1, 16, 64>}]} {
    %c0_i32 = arith.constant 0 : i32
    %0 = arith.cmpi eq, %arg2, %c0_i32 : i32
    %1 = arith.extui %0 : i1 to i32
    %c0_i32_0 = arith.constant 0 : i32
    %2 = arith.cmpi ne, %1, %c0_i32_0 : i32
    scf.if %2 {
      %cst_11 = arith.constant 0.000000e+00 : f32
      %13 = vector.broadcast %cst_11 : f32 to vector<16x64xf32>
      %c0_12 = arith.constant 0 : index
      %c0_13 = arith.constant 0 : index
      %14 = vector.load %arg6[%c0_12, %c0_13] : memref<16x64xf32, #tpu.memory_space<vmem>>, vector<16x64xf32>
      tpu.vector_store %arg6[%c0_12, %c0_13], %13 {strides = array<i32>} : memref<16x64xf32, #tpu.memory_space<vmem>>, vector<16x64xf32>,
    } else {
    }
    %c0 = arith.constant 0 : index
    %c0_1 = arith.constant 0 : index
    %3 = vector.load %arg6[%c0, %c0_1] : memref<16x64xf32, #tpu.memory_space<vmem>>, vector<16x64xf32>
    %c0_2 = arith.constant 0 : index
    %c0_3 = arith.constant 0 : index
    %4 = vector.load %arg3[%c0_2, %c0_3] : memref<16x128xbf16, #tpu.memory_space<vmem>>, vector<16x128xbf16>
    %c0_4 = arith.constant 0 : index
    %c0_5 = arith.constant 0 : index
    %c0_6 = arith.constant 0 : index
    %5 = vector.load %arg4[%c0_4, %c0_5, %c0_6] : memref<1x128x64xbf16, #tpu.memory_space<vmem>>, vector<1x128x64xbf16>
    %6 = vector.shape_cast %5 : vector<1x128x64xbf16> to vector<128x64xbf16>
    %cst = arith.constant dense<0.000000e+00> : vector<16x64xf32>
    %7 = tpu.matmul %4, %6, %cst {dimension_numbers = #tpu.dot_dimension_numbers<[1], [0], [0], [1], [0, 0, 1, 1], [], []>} : vector<16x128xbf16>, vector<128x64xbf16>, vector<16x64xf32> -> vector<16x64xf32>
    %8 = arith.addf %3, %7 : vector<16x64xf32>
    %c0_7 = arith.constant 0 : index
    %c0_8 = arith.constant 0 : index
    %9 = vector.load %arg6[%c0_7, %c0_8] : memref<16x64xf32, #tpu.memory_space<vmem>>, vector<16x64xf32>
    tpu.vector_store %arg6[%c0_7, %c0_8], %8 {strides = array<i32>} : memref<16x64xf32, #tpu.memory_space<vmem>>, vector<16x64xf32>,
    %c0_i32_9 = arith.constant 0 : i32
    %10 = arith.cmpi eq, %arg2, %c0_i32_9 : i32
    %11 = arith.extui %10 : i1 to i32
    %c0_i32_10 = arith.constant 0 : i32
    %12 = arith.cmpi ne, %11, %c0_i32_10 : i32
    scf.if %12 {
      %c0_11 = arith.constant 0 : index
      %c0_12 = arith.constant 0 : index
      %13 = vector.load %arg6[%c0_11, %c0_12] : memref<16x64xf32, #tpu.memory_space<vmem>>, vector<16x64xf32>
      %14 = arith.truncf %13 : vector<16x64xf32> to vector<16x64xbf16>
      %c0_13 = arith.constant 0 : index
      %c0_14 = arith.constant 0 : index
      %c0_15 = arith.constant 0 : index
      %15 = vector.load %arg5[%c0_13, %c0_14, %c0_15] : memref<1x16x64xbf16, #tpu.memory_space<vmem>>, vector<1x16x64xbf16>
      %16 = vector.shape_cast %15 : vector<1x16x64xbf16> to vector<16x64xbf16>
      %17 = vector.shape_cast %14 : vector<16x64xbf16> to vector<1x16x64xbf16>
      tpu.vector_store %arg5[%c0_13, %c0_14, %c0_15], %17 {strides = array<i32>} : memref<1x16x64xbf16, #tpu.memory_space<vmem>>, vector<1x16x64xbf16>,
    } else {
    }
    return
  }
  func.func @transform_0(%arg0: i32, %arg1: i32, %arg2: i32) -> (i32, i32) {
    %c0_i32 = arith.constant 0 : i32
    return %arg1, %arg2 : i32, i32
  }
  func.func @transform_1(%arg0: i32, %arg1: i32, %arg2: i32) -> (i32, i32, i32) {
    %c0_i32 = arith.constant 0 : i32
    %c0_i32_0 = arith.constant 0 : i32
    return %arg0, %arg2, %c0_i32 : i32, i32, i32
  }
  func.func @transform_2(%arg0: i32, %arg1: i32, %arg2: i32) -> (i32, i32, i32) {
    %c0_i32 = arith.constant 0 : i32
    %c0_i32_0 = arith.constant 0 : i32
    return %arg0, %arg1, %c0_i32 : i32, i32, i32
  }
}

module attributes {stable_mosaic.version = 11 : i64} {
  func.func @_flash_attn_kernel(%arg0: i32, %arg1: i32, %arg2: i32, %arg3: i32, %arg4: memref<1x1x8x64xbf16, #tpu.memory_space<vmem>>, %arg5: memref<1x1x8x64xbf16, #tpu.memory_space<vmem>>, %arg6: memref<1x1x8x64xbf16, #tpu.memory_space<vmem>>, %arg7: memref<1x1x8x64xbf16, #tpu.memory_space<vmem>>, %arg8: memref<8x1xf32, #tpu.memory_space<vmem>>, %arg9: memref<8x1xf32, #tpu.memory_space<vmem>>, %arg10: memref<8x64xf32, #tpu.memory_space<vmem>>) attributes {dimension_semantics = [#tpu.dimension_semantics<parallel>, #tpu.dimension_semantics<parallel>, #tpu.dimension_semantics<parallel>, #tpu.dimension_semantics<arbitrary>], iteration_bounds = array<i64: 2, 2, 1, 1>, scalar_prefetch = 0 : i64, scratch_operands = 3 : i64, tpu.core_type = #tpu.core_type<tc>, window_params = [{transform_indices = @transform_0, window_bounds = array<i64: 1, 1, 8, 64>}, {transform_indices = @transform_1, window_bounds = array<i64: 1, 1, 8, 64>}, {transform_indices = @transform_2, window_bounds = array<i64: 1, 1, 8, 64>}, {transform_indices = @transform_3, window_bounds = array<i64: 1, 1, 8, 64>}]} {
    %c0_i32 = arith.constant 0 : i32
    %0 = arith.cmpi eq, %arg3, %c0_i32 : i32
    %1 = arith.extui %0 : i1 to i32
    %c0_i32_0 = arith.constant 0 : i32
    %2 = arith.cmpi ne, %1, %c0_i32_0 : i32
    scf.if %2 {
      %cst_29 = arith.constant 0xFF800000 : f32
      %36 = vector.broadcast %cst_29 : f32 to vector<8x1xf32>
      %c0_30 = arith.constant 0 : index
      %c0_31 = arith.constant 0 : index
      %37 = vector.load %arg8[%c0_30, %c0_31] : memref<8x1xf32, #tpu.memory_space<vmem>>, vector<8x1xf32>
      tpu.vector_store %arg8[%c0_30, %c0_31], %36 {strides = array<i32>} : memref<8x1xf32, #tpu.memory_space<vmem>>, vector<8x1xf32>,
      %cst_32 = arith.constant 0.000000e+00 : f32
      %38 = vector.broadcast %cst_32 : f32 to vector<8x1xf32>
      %c0_33 = arith.constant 0 : index
      %c0_34 = arith.constant 0 : index
      %39 = vector.load %arg9[%c0_33, %c0_34] : memref<8x1xf32, #tpu.memory_space<vmem>>, vector<8x1xf32>
      tpu.vector_store %arg9[%c0_33, %c0_34], %38 {strides = array<i32>} : memref<8x1xf32, #tpu.memory_space<vmem>>, vector<8x1xf32>,
      %cst_35 = arith.constant 0.000000e+00 : f32
      %40 = vector.broadcast %cst_35 : f32 to vector<8x64xf32>
      %c0_36 = arith.constant 0 : index
      %c0_37 = arith.constant 0 : index
      %41 = vector.load %arg10[%c0_36, %c0_37] : memref<8x64xf32, #tpu.memory_space<vmem>>, vector<8x64xf32>
      tpu.vector_store %arg10[%c0_36, %c0_37], %40 {strides = array<i32>} : memref<8x64xf32, #tpu.memory_space<vmem>>, vector<8x64xf32>,
    } else {
    }
    %c0 = arith.constant 0 : index
    %c0_1 = arith.constant 0 : index
    %c0_2 = arith.constant 0 : index
    %c0_3 = arith.constant 0 : index
    %3 = vector.load %arg4[%c0, %c0_1, %c0_2, %c0_3] : memref<1x1x8x64xbf16, #tpu.memory_space<vmem>>, vector<1x1x8x64xbf16>
    %4 = vector.shape_cast %3 : vector<1x1x8x64xbf16> to vector<8x64xbf16>
    %c0_4 = arith.constant 0 : index
    %c0_5 = arith.constant 0 : index
    %c0_6 = arith.constant 0 : index
    %c0_7 = arith.constant 0 : index
    %5 = vector.load %arg5[%c0_4, %c0_5, %c0_6, %c0_7] : memref<1x1x8x64xbf16, #tpu.memory_space<vmem>>, vector<1x1x8x64xbf16>
    %6 = vector.shape_cast %5 : vector<1x1x8x64xbf16> to vector<8x64xbf16>
    %c0_8 = arith.constant 0 : index
    %c0_9 = arith.constant 0 : index
    %c0_10 = arith.constant 0 : index
    %c0_11 = arith.constant 0 : index
    %7 = vector.load %arg6[%c0_8, %c0_9, %c0_10, %c0_11] : memref<1x1x8x64xbf16, #tpu.memory_space<vmem>>, vector<1x1x8x64xbf16>
    %8 = vector.shape_cast %7 : vector<1x1x8x64xbf16> to vector<8x64xbf16>
    %cst = arith.constant dense<0.000000e+00> : vector<8x8xf32>
    %9 = tpu.matmul %4, %6, %cst {dimension_numbers = #tpu.dot_dimension_numbers<[1], [1], [0], [0], [0, 0, 1, 0], [], []>} : vector<8x64xbf16>, vector<8x64xbf16>, vector<8x8xf32> -> vector<8x8xf32>
    %c0_12 = arith.constant 0 : index
    %c0_13 = arith.constant 0 : index
    %10 = vector.load %arg8[%c0_12, %c0_13] : memref<8x1xf32, #tpu.memory_space<vmem>>, vector<8x1xf32>
    %cst_14 = arith.constant dense<0xFF800000> : vector<8xf32>
    %11 = vector.multi_reduction <maximumf>, %9, %cst_14 [1] : vector<8x8xf32> to vector<8xf32>
    %12 = vector.shape_cast %11 : vector<8xf32> to vector<8x1xf32>
    %13 = arith.maximumf %10, %12 : vector<8x1xf32>
    %14 = arith.subf %10, %13 : vector<8x1xf32>
    %15 = math.exp %14 : vector<8x1xf32>
    %16 = vector.broadcast %13 : vector<8x1xf32> to vector<8x8xf32>
    %17 = arith.subf %9, %16 : vector<8x8xf32>
    %18 = math.exp %17 : vector<8x8xf32>
    %c0_15 = arith.constant 0 : index
    %c0_16 = arith.constant 0 : index
    %19 = vector.load %arg9[%c0_15, %c0_16] : memref<8x1xf32, #tpu.memory_space<vmem>>, vector<8x1xf32>
    %20 = arith.mulf %15, %19 : vector<8x1xf32>
    %cst_17 = arith.constant dense<0.000000e+00> : vector<8xf32>
    %21 = vector.multi_reduction <add>, %18, %cst_17 [1] : vector<8x8xf32> to vector<8xf32>
    %22 = vector.shape_cast %21 : vector<8xf32> to vector<8x1xf32>
    %23 = arith.addf %20, %22 : vector<8x1xf32>
    %c0_18 = arith.constant 0 : index
    %c0_19 = arith.constant 0 : index
    %24 = vector.load %arg9[%c0_18, %c0_19] : memref<8x1xf32, #tpu.memory_space<vmem>>, vector<8x1xf32>
    tpu.vector_store %arg9[%c0_18, %c0_19], %23 {strides = array<i32>} : memref<8x1xf32, #tpu.memory_space<vmem>>, vector<8x1xf32>,
    %c0_20 = arith.constant 0 : index
    %c0_21 = arith.constant 0 : index
    %25 = vector.load %arg10[%c0_20, %c0_21] : memref<8x64xf32, #tpu.memory_space<vmem>>, vector<8x64xf32>
    %26 = vector.broadcast %15 : vector<8x1xf32> to vector<8x64xf32>
    %27 = arith.mulf %26, %25 : vector<8x64xf32>
    %28 = arith.truncf %18 : vector<8x8xf32> to vector<8x8xbf16>
    %cst_22 = arith.constant dense<0.000000e+00> : vector<8x64xf32>
    %29 = tpu.matmul %28, %8, %cst_22 {dimension_numbers = #tpu.dot_dimension_numbers<[1], [0], [0], [1], [0, 0, 1, 1], [], []>} : vector<8x8xbf16>, vector<8x64xbf16>, vector<8x64xf32> -> vector<8x64xf32>
    %30 = arith.addf %27, %29 : vector<8x64xf32>
    %c0_23 = arith.constant 0 : index
    %c0_24 = arith.constant 0 : index
    %31 = vector.load %arg10[%c0_23, %c0_24] : memref<8x64xf32, #tpu.memory_space<vmem>>, vector<8x64xf32>
    tpu.vector_store %arg10[%c0_23, %c0_24], %30 {strides = array<i32>} : memref<8x64xf32, #tpu.memory_space<vmem>>, vector<8x64xf32>,
    %c0_25 = arith.constant 0 : index
    %c0_26 = arith.constant 0 : index
    %32 = vector.load %arg8[%c0_25, %c0_26] : memref<8x1xf32, #tpu.memory_space<vmem>>, vector<8x1xf32>
    tpu.vector_store %arg8[%c0_25, %c0_26], %13 {strides = array<i32>} : memref<8x1xf32, #tpu.memory_space<vmem>>, vector<8x1xf32>,
    %c0_i32_27 = arith.constant 0 : i32
    %33 = arith.cmpi eq, %arg3, %c0_i32_27 : i32
    %34 = arith.extui %33 : i1 to i32
    %c0_i32_28 = arith.constant 0 : i32
    %35 = arith.cmpi ne, %34, %c0_i32_28 : i32
    scf.if %35 {
      %c0_29 = arith.constant 0 : index
      %c0_30 = arith.constant 0 : index
      %36 = vector.load %arg10[%c0_29, %c0_30] : memref<8x64xf32, #tpu.memory_space<vmem>>, vector<8x64xf32>
      %c0_31 = arith.constant 0 : index
      %c0_32 = arith.constant 0 : index
      %37 = vector.load %arg9[%c0_31, %c0_32] : memref<8x1xf32, #tpu.memory_space<vmem>>, vector<8x1xf32>
      %38 = tpu.reciprocal %37 {approx = true} : vector<8x1xf32> -> vector<8x1xf32>
      %39 = vector.broadcast %38 : vector<8x1xf32> to vector<8x64xf32>
      %40 = arith.mulf %36, %39 : vector<8x64xf32>
      %41 = arith.truncf %40 : vector<8x64xf32> to vector<8x64xbf16>
      %c0_33 = arith.constant 0 : index
      %c0_34 = arith.constant 0 : index
      %c0_35 = arith.constant 0 : index
      %c0_36 = arith.constant 0 : index
      %42 = vector.load %arg7[%c0_33, %c0_34, %c0_35, %c0_36] : memref<1x1x8x64xbf16, #tpu.memory_space<vmem>>, vector<1x1x8x64xbf16>
      %43 = vector.shape_cast %42 : vector<1x1x8x64xbf16> to vector<8x64xbf16>
      %44 = vector.shape_cast %41 : vector<8x64xbf16> to vector<1x1x8x64xbf16>
      tpu.vector_store %arg7[%c0_33, %c0_34, %c0_35, %c0_36], %44 {strides = array<i32>} : memref<1x1x8x64xbf16, #tpu.memory_space<vmem>>, vector<1x1x8x64xbf16>,
    } else {
    }
    return
  }
  func.func @transform_0(%arg0: i32, %arg1: i32, %arg2: i32, %arg3: i32) -> (i32, i32, i32, i32) {
    %c0_i32 = arith.constant 0 : i32
    %0 = arith.addi %c0_i32, %arg1 : i32
    %c0_i32_0 = arith.constant 0 : i32
    %c0_i32_1 = arith.constant 0 : i32
    return %0, %arg0, %arg2, %c0_i32_0 : i32, i32, i32, i32
  }
  func.func @transform_1(%arg0: i32, %arg1: i32, %arg2: i32, %arg3: i32) -> (i32, i32, i32, i32) {
    %c0_i32 = arith.constant 0 : i32
    %0 = arith.addi %c0_i32, %arg1 : i32
    %c0_i32_0 = arith.constant 0 : i32
    %c0_i32_1 = arith.constant 0 : i32
    return %0, %arg0, %arg3, %c0_i32_0 : i32, i32, i32, i32
  }
  func.func @transform_2(%arg0: i32, %arg1: i32, %arg2: i32, %arg3: i32) -> (i32, i32, i32, i32) {
    %c2_i32 = arith.constant 2 : i32
    %0 = arith.addi %c2_i32, %arg1 : i32
    %c0_i32 = arith.constant 0 : i32
    %c0_i32_0 = arith.constant 0 : i32
    return %0, %arg0, %arg3, %c0_i32 : i32, i32, i32, i32
  }
  func.func @transform_3(%arg0: i32, %arg1: i32, %arg2: i32, %arg3: i32) -> (i32, i32, i32, i32) {
    %c0_i32 = arith.constant 0 : i32
    %c0_i32_0 = arith.constant 0 : i32
    return %arg1, %arg0, %arg2, %c0_i32 : i32, i32, i32, i32
  }
}

module attributes {stable_mosaic.version = 11 : i64} {
  func.func @_geglu_kernel(%arg0: i32, %arg1: i32, %arg2: i32, %arg3: memref<16x128xbf16, #tpu.memory_space<vmem>>, %arg4: memref<128x256xbf16, #tpu.memory_space<vmem>>, %arg5: memref<128x256xbf16, #tpu.memory_space<vmem>>, %arg6: memref<1x256xf32, #tpu.memory_space<vmem>>, %arg7: memref<1x256xf32, #tpu.memory_space<vmem>>, %arg8: memref<16x256xbf16, #tpu.memory_space<vmem>>, %arg9: memref<16x256xf32, #tpu.memory_space<vmem>>, %arg10: memref<16x256xf32, #tpu.memory_space<vmem>>) attributes {dimension_semantics = [#tpu.dimension_semantics<parallel>, #tpu.dimension_semantics<parallel>, #tpu.dimension_semantics<arbitrary>], iteration_bounds = array<i64: 1, 2, 1>, scalar_prefetch = 0 : i64, scratch_operands = 2 : i64, tpu.core_type = #tpu.core_type<tc>, window_params = [{transform_indices = @transform_0, window_bounds = array<i64: 16, 128>}, {transform_indices = @transform_1, window_bounds = array<i64: 128, 256>}, {transform_indices = @transform_2, window_bounds = array<i64: 128, 256>}, {transform_indices = @transform_3, window_bounds = array<i64: 1, 256>}, {transform_indices = @transform_4, window_bounds = array<i64: 1, 256>}, {transform_indices = @transform_5, window_bounds = array<i64: 16, 256>}]} {
    %c0_i32 = arith.constant 0 : i32
    %0 = arith.cmpi eq, %arg2, %c0_i32 : i32
    %1 = arith.extui %0 : i1 to i32
    %c0_i32_0 = arith.constant 0 : i32
    %2 = arith.cmpi ne, %1, %c0_i32_0 : i32
    scf.if %2 {
      %cst_17 = arith.constant 0.000000e+00 : f32
      %17 = vector.broadcast %cst_17 : f32 to vector<16x256xf32>
      %c0_18 = arith.constant 0 : index
      %c0_19 = arith.constant 0 : index
      %18 = vector.load %arg9[%c0_18, %c0_19] : memref<16x256xf32, #tpu.memory_space<vmem>>, vector<16x256xf32>
      tpu.vector_store %arg9[%c0_18, %c0_19], %17 {strides = array<i32>} : memref<16x256xf32, #tpu.memory_space<vmem>>, vector<16x256xf32>,
      %cst_20 = arith.constant 0.000000e+00 : f32
      %19 = vector.broadcast %cst_20 : f32 to vector<16x256xf32>
      %c0_21 = arith.constant 0 : index
      %c0_22 = arith.constant 0 : index
      %20 = vector.load %arg10[%c0_21, %c0_22] : memref<16x256xf32, #tpu.memory_space<vmem>>, vector<16x256xf32>
      tpu.vector_store %arg10[%c0_21, %c0_22], %19 {strides = array<i32>} : memref<16x256xf32, #tpu.memory_space<vmem>>, vector<16x256xf32>,
    } else {
    }
    %c0 = arith.constant 0 : index
    %c0_1 = arith.constant 0 : index
    %3 = vector.load %arg3[%c0, %c0_1] : memref<16x128xbf16, #tpu.memory_space<vmem>>, vector<16x128xbf16>
    %c0_2 = arith.constant 0 : index
    %c0_3 = arith.constant 0 : index
    %4 = vector.load %arg9[%c0_2, %c0_3] : memref<16x256xf32, #tpu.memory_space<vmem>>, vector<16x256xf32>
    %c0_4 = arith.constant 0 : index
    %c0_5 = arith.constant 0 : index
    %5 = vector.load %arg4[%c0_4, %c0_5] : memref<128x256xbf16, #tpu.memory_space<vmem>>, vector<128x256xbf16>
    %cst = arith.constant dense<0.000000e+00> : vector<16x256xf32>
    %6 = tpu.matmul %3, %5, %cst {dimension_numbers = #tpu.dot_dimension_numbers<[1], [0], [0], [1], [0, 0, 1, 1], [], []>} : vector<16x128xbf16>, vector<128x256xbf16>, vector<16x256xf32> -> vector<16x256xf32>
    %7 = arith.addf %4, %6 : vector<16x256xf32>
    %c0_6 = arith.constant 0 : index
    %c0_7 = arith.constant 0 : index
    %8 = vector.load %arg9[%c0_6, %c0_7] : memref<16x256xf32, #tpu.memory_space<vmem>>, vector<16x256xf32>
    tpu.vector_store %arg9[%c0_6, %c0_7], %7 {strides = array<i32>} : memref<16x256xf32, #tpu.memory_space<vmem>>, vector<16x256xf32>,
    %c0_8 = arith.constant 0 : index
    %c0_9 = arith.constant 0 : index
    %9 = vector.load %arg10[%c0_8, %c0_9] : memref<16x256xf32, #tpu.memory_space<vmem>>, vector<16x256xf32>
    %c0_10 = arith.constant 0 : index
    %c0_11 = arith.constant 0 : index
    %10 = vector.load %arg5[%c0_10, %c0_11] : memref<128x256xbf16, #tpu.memory_space<vmem>>, vector<128x256xbf16>
    %cst_12 = arith.constant dense<0.000000e+00> : vector<16x256xf32>
    %11 = tpu.matmul %3, %10, %cst_12 {dimension_numbers = #tpu.dot_dimension_numbers<[1], [0], [0], [1], [0, 0, 1, 1], [], []>} : vector<16x128xbf16>, vector<128x256xbf16>, vector<16x256xf32> -> vector<16x256xf32>
    %12 = arith.addf %9, %11 : vector<16x256xf32>
    %c0_13 = arith.constant 0 : index
    %c0_14 = arith.constant 0 : index
    %13 = vector.load %arg10[%c0_13, %c0_14] : memref<16x256xf32, #tpu.memory_space<vmem>>, vector<16x256xf32>
    tpu.vector_store %arg10[%c0_13, %c0_14], %12 {strides = array<i32>} : memref<16x256xf32, #tpu.memory_space<vmem>>, vector<16x256xf32>,
    %c0_i32_15 = arith.constant 0 : i32
    %14 = arith.cmpi eq, %arg2, %c0_i32_15 : i32
    %15 = arith.extui %14 : i1 to i32
    %c0_i32_16 = arith.constant 0 : i32
    %16 = arith.cmpi ne, %15, %c0_i32_16 : i32
    scf.if %16 {
      %c0_17 = arith.constant 0 : index
      %c0_18 = arith.constant 0 : index
      %17 = vector.load %arg9[%c0_17, %c0_18] : memref<16x256xf32, #tpu.memory_space<vmem>>, vector<16x256xf32>
      %c0_19 = arith.constant 0 : index
      %c0_20 = arith.constant 0 : index
      %18 = vector.load %arg6[%c0_19, %c0_20] : memref<1x256xf32, #tpu.memory_space<vmem>>, vector<1x256xf32>
      %19 = vector.broadcast %18 : vector<1x256xf32> to vector<16x256xf32>
      %20 = arith.addf %17, %19 : vector<16x256xf32>
      %c0_21 = arith.constant 0 : index
      %c0_22 = arith.constant 0 : index
      %21 = vector.load %arg10[%c0_21, %c0_22] : memref<16x256xf32, #tpu.memory_space<vmem>>, vector<16x256xf32>
      %c0_23 = arith.constant 0 : index
      %c0_24 = arith.constant 0 : index
      %22 = vector.load %arg7[%c0_23, %c0_24] : memref<1x256xf32, #tpu.memory_space<vmem>>, vector<1x256xf32>
      %23 = vector.broadcast %22 : vector<1x256xf32> to vector<16x256xf32>
      %24 = arith.addf %21, %23 : vector<16x256xf32>
      %cst_25 = arith.constant 5.000000e-01 : f32
      %25 = vector.broadcast %cst_25 : f32 to vector<16x256xf32>
      %26 = arith.mulf %25, %24 : vector<16x256xf32>
      %cst_26 = arith.constant 4.471500e-02 : f32
      %27 = vector.broadcast %cst_26 : f32 to vector<16x256xf32>
      %28 = arith.mulf %27, %24 : vector<16x256xf32>
      %29 = arith.mulf %28, %24 : vector<16x256xf32>
      %30 = arith.mulf %29, %24 : vector<16x256xf32>
      %31 = arith.addf %24, %30 : vector<16x256xf32>
      %cst_27 = arith.constant 0.797884583 : f32
      %32 = vector.broadcast %cst_27 : f32 to vector<16x256xf32>
      %33 = arith.mulf %32, %31 : vector<16x256xf32>
      %34 = math.tanh %33 : vector<16x256xf32>
      %cst_28 = arith.constant 1.000000e+00 : f32
      %35 = vector.broadcast %cst_28 : f32 to vector<16x256xf32>
      %36 = arith.addf %35, %34 : vector<16x256xf32>
      %37 = arith.mulf %26, %36 : vector<16x256xf32>
      %38 = arith.mulf %20, %37 : vector<16x256xf32>
      %39 = arith.truncf %38 : vector<16x256xf32> to vector<16x256xbf16>
      %c0_29 = arith.constant 0 : index
      %c0_30 = arith.constant 0 : index
      %40 = vector.load %arg8[%c0_29, %c0_30] : memref<16x256xbf16, #tpu.memory_space<vmem>>, vector<16x256xbf16>
      tpu.vector_store %arg8[%c0_29, %c0_30], %39 {strides = array<i32>} : memref<16x256xbf16, #tpu.memory_space<vmem>>, vector<16x256xbf16>,
    } else {
    }
    return
  }
  func.func @transform_0(%arg0: i32, %arg1: i32, %arg2: i32) -> (i32, i32) {
    %c0_i32 = arith.constant 0 : i32
    return %arg0, %arg2 : i32, i32
  }
  func.func @transform_1(%arg0: i32, %arg1: i32, %arg2: i32) -> (i32, i32) {
    %c0_i32 = arith.constant 0 : i32
    return %arg2, %arg1 : i32, i32
  }
  func.func @transform_2(%arg0: i32, %arg1: i32, %arg2: i32) -> (i32, i32) {
    %c0_i32 = arith.constant 0 : i32
    return %arg2, %arg1 : i32, i32
  }
  func.func @transform_3(%arg0: i32, %arg1: i32, %arg2: i32) -> (i32, i32) {
    %c0_i32 = arith.constant 0 : i32
    %c0_i32_0 = arith.constant 0 : i32
    return %c0_i32, %arg1 : i32, i32
  }
  func.func @transform_4(%arg0: i32, %arg1: i32, %arg2: i32) -> (i32, i32) {
    %c0_i32 = arith.constant 0 : i32
    %c0_i32_0 = arith.constant 0 : i32
    return %c0_i32, %arg1 : i32, i32
  }
  func.func @transform_5(%arg0: i32, %arg1: i32, %arg2: i32) -> (i32, i32) {
    %c0_i32 = arith.constant 0 : i32
    return %arg0, %arg1 : i32, i32
  }
}

module attributes {stable_mosaic.version = 11 : i64} {
  func.func @_mm_bias_res_kernel(%arg0: i32, %arg1: i32, %arg2: i32, %arg3: memref<16x512xbf16, #tpu.memory_space<vmem>>, %arg4: memref<512x128xbf16, #tpu.memory_space<vmem>>, %arg5: memref<1x128xf32, #tpu.memory_space<vmem>>, %arg6: memref<16x128xf32, #tpu.memory_space<vmem>>, %arg7: memref<16x128xf32, #tpu.memory_space<vmem>>, %arg8: memref<16x128xf32, #tpu.memory_space<vmem>>) attributes {dimension_semantics = [#tpu.dimension_semantics<parallel>, #tpu.dimension_semantics<parallel>, #tpu.dimension_semantics<arbitrary>], iteration_bounds = array<i64: 1, 1, 1>, scalar_prefetch = 0 : i64, scratch_operands = 1 : i64, tpu.core_type = #tpu.core_type<tc>, window_params = [{transform_indices = @transform_0, window_bounds = array<i64: 16, 512>}, {transform_indices = @transform_1, window_bounds = array<i64: 512, 128>}, {transform_indices = @transform_2, window_bounds = array<i64: 1, 128>}, {transform_indices = @transform_3, window_bounds = array<i64: 16, 128>}, {transform_indices = @transform_4, window_bounds = array<i64: 16, 128>}]} {
    %c0_i32 = arith.constant 0 : i32
    %0 = arith.cmpi eq, %arg2, %c0_i32 : i32
    %1 = arith.extui %0 : i1 to i32
    %c0_i32_0 = arith.constant 0 : i32
    %2 = arith.cmpi ne, %1, %c0_i32_0 : i32
    scf.if %2 {
      %cst_10 = arith.constant 0.000000e+00 : f32
      %12 = vector.broadcast %cst_10 : f32 to vector<16x128xf32>
      %c0_11 = arith.constant 0 : index
      %c0_12 = arith.constant 0 : index
      %13 = vector.load %arg8[%c0_11, %c0_12] : memref<16x128xf32, #tpu.memory_space<vmem>>, vector<16x128xf32>
      tpu.vector_store %arg8[%c0_11, %c0_12], %12 {strides = array<i32>} : memref<16x128xf32, #tpu.memory_space<vmem>>, vector<16x128xf32>,
    } else {
    }
    %c0 = arith.constant 0 : index
    %c0_1 = arith.constant 0 : index
    %3 = vector.load %arg8[%c0, %c0_1] : memref<16x128xf32, #tpu.memory_space<vmem>>, vector<16x128xf32>
    %c0_2 = arith.constant 0 : index
    %c0_3 = arith.constant 0 : index
    %4 = vector.load %arg3[%c0_2, %c0_3] : memref<16x512xbf16, #tpu.memory_space<vmem>>, vector<16x512xbf16>
    %c0_4 = arith.constant 0 : index
    %c0_5 = arith.constant 0 : index
    %5 = vector.load %arg4[%c0_4, %c0_5] : memref<512x128xbf16, #tpu.memory_space<vmem>>, vector<512x128xbf16>
    %cst = arith.constant dense<0.000000e+00> : vector<16x128xf32>
    %6 = tpu.matmul %4, %5, %cst {dimension_numbers = #tpu.dot_dimension_numbers<[1], [0], [0], [1], [0, 0, 1, 1], [], []>} : vector<16x512xbf16>, vector<512x128xbf16>, vector<16x128xf32> -> vector<16x128xf32>
    %7 = arith.addf %3, %6 : vector<16x128xf32>
    %c0_6 = arith.constant 0 : index
    %c0_7 = arith.constant 0 : index
    %8 = vector.load %arg8[%c0_6, %c0_7] : memref<16x128xf32, #tpu.memory_space<vmem>>, vector<16x128xf32>
    tpu.vector_store %arg8[%c0_6, %c0_7], %7 {strides = array<i32>} : memref<16x128xf32, #tpu.memory_space<vmem>>, vector<16x128xf32>,
    %c0_i32_8 = arith.constant 0 : i32
    %9 = arith.cmpi eq, %arg2, %c0_i32_8 : i32
    %10 = arith.extui %9 : i1 to i32
    %c0_i32_9 = arith.constant 0 : i32
    %11 = arith.cmpi ne, %10, %c0_i32_9 : i32
    scf.if %11 {
      %c0_10 = arith.constant 0 : index
      %c0_11 = arith.constant 0 : index
      %12 = vector.load %arg8[%c0_10, %c0_11] : memref<16x128xf32, #tpu.memory_space<vmem>>, vector<16x128xf32>
      %c0_12 = arith.constant 0 : index
      %c0_13 = arith.constant 0 : index
      %13 = vector.load %arg5[%c0_12, %c0_13] : memref<1x128xf32, #tpu.memory_space<vmem>>, vector<1x128xf32>
      %14 = vector.broadcast %13 : vector<1x128xf32> to vector<16x128xf32>
      %15 = arith.addf %12, %14 : vector<16x128xf32>
      %c0_14 = arith.constant 0 : index
      %c0_15 = arith.constant 0 : index
      %16 = vector.load %arg6[%c0_14, %c0_15] : memref<16x128xf32, #tpu.memory_space<vmem>>, vector<16x128xf32>
      %17 = arith.addf %15, %16 : vector<16x128xf32>
      %c0_16 = arith.constant 0 : index
      %c0_17 = arith.constant 0 : index
      %18 = vector.load %arg7[%c0_16, %c0_17] : memref<16x128xf32, #tpu.memory_space<vmem>>, vector<16x128xf32>
      tpu.vector_store %arg7[%c0_16, %c0_17], %17 {strides = array<i32>} : memref<16x128xf32, #tpu.memory_space<vmem>>, vector<16x128xf32>,
    } else {
    }
    return
  }
  func.func @transform_0(%arg0: i32, %arg1: i32, %arg2: i32) -> (i32, i32) {
    %c0_i32 = arith.constant 0 : i32
    return %arg0, %arg2 : i32, i32
  }
  func.func @transform_1(%arg0: i32, %arg1: i32, %arg2: i32) -> (i32, i32) {
    %c0_i32 = arith.constant 0 : i32
    return %arg2, %arg1 : i32, i32
  }
  func.func @transform_2(%arg0: i32, %arg1: i32, %arg2: i32) -> (i32, i32) {
    %c0_i32 = arith.constant 0 : i32
    %c0_i32_0 = arith.constant 0 : i32
    return %c0_i32, %arg1 : i32, i32
  }
  func.func @transform_3(%arg0: i32, %arg1: i32, %arg2: i32) -> (i32, i32) {
    %c0_i32 = arith.constant 0 : i32
    return %arg0, %arg1 : i32, i32
  }
  func.func @transform_4(%arg0: i32, %arg1: i32, %arg2: i32) -> (i32, i32) {
    %c0_i32 = arith.constant 0 : i32
    return %arg0, %arg1 : i32, i32
  }
}

module attributes {stable_mosaic.version = 11 : i64} {
  func.func @_mm_kernel(%arg0: i32, %arg1: i32, %arg2: i32, %arg3: memref<16x128xf32, #tpu.memory_space<vmem>>, %arg4: memref<128x8xbf16, #tpu.memory_space<vmem>>, %arg5: memref<16x8xf32, #tpu.memory_space<vmem>>, %arg6: memref<16x8xf32, #tpu.memory_space<vmem>>) attributes {dimension_semantics = [#tpu.dimension_semantics<parallel>, #tpu.dimension_semantics<parallel>, #tpu.dimension_semantics<arbitrary>], iteration_bounds = array<i64: 1, 1, 1>, scalar_prefetch = 0 : i64, scratch_operands = 1 : i64, tpu.core_type = #tpu.core_type<tc>, window_params = [{transform_indices = @transform_0, window_bounds = array<i64: 16, 128>}, {transform_indices = @transform_1, window_bounds = array<i64: 128, 8>}, {transform_indices = @transform_2, window_bounds = array<i64: 16, 8>}]} {
    %c0_i32 = arith.constant 0 : i32
    %0 = arith.cmpi eq, %arg2, %c0_i32 : i32
    %1 = arith.extui %0 : i1 to i32
    %c0_i32_0 = arith.constant 0 : i32
    %2 = arith.cmpi ne, %1, %c0_i32_0 : i32
    scf.if %2 {
      %cst_10 = arith.constant 0.000000e+00 : f32
      %13 = vector.broadcast %cst_10 : f32 to vector<16x8xf32>
      %c0_11 = arith.constant 0 : index
      %c0_12 = arith.constant 0 : index
      %14 = vector.load %arg6[%c0_11, %c0_12] : memref<16x8xf32, #tpu.memory_space<vmem>>, vector<16x8xf32>
      tpu.vector_store %arg6[%c0_11, %c0_12], %13 {strides = array<i32>} : memref<16x8xf32, #tpu.memory_space<vmem>>, vector<16x8xf32>,
    } else {
    }
    %c0 = arith.constant 0 : index
    %c0_1 = arith.constant 0 : index
    %3 = vector.load %arg6[%c0, %c0_1] : memref<16x8xf32, #tpu.memory_space<vmem>>, vector<16x8xf32>
    %c0_2 = arith.constant 0 : index
    %c0_3 = arith.constant 0 : index
    %4 = vector.load %arg3[%c0_2, %c0_3] : memref<16x128xf32, #tpu.memory_space<vmem>>, vector<16x128xf32>
    %5 = arith.truncf %4 : vector<16x128xf32> to vector<16x128xbf16>
    %c0_4 = arith.constant 0 : index
    %c0_5 = arith.constant 0 : index
    %6 = vector.load %arg4[%c0_4, %c0_5] : memref<128x8xbf16, #tpu.memory_space<vmem>>, vector<128x8xbf16>
    %cst = arith.constant dense<0.000000e+00> : vector<16x8xf32>
    %7 = tpu.matmul %5, %6, %cst {dimension_numbers = #tpu.dot_dimension_numbers<[1], [0], [0], [1], [0, 0, 1, 1], [], []>} : vector<16x128xbf16>, vector<128x8xbf16>, vector<16x8xf32> -> vector<16x8xf32>
    %8 = arith.addf %3, %7 : vector<16x8xf32>
    %c0_6 = arith.constant 0 : index
    %c0_7 = arith.constant 0 : index
    %9 = vector.load %arg6[%c0_6, %c0_7] : memref<16x8xf32, #tpu.memory_space<vmem>>, vector<16x8xf32>
    tpu.vector_store %arg6[%c0_6, %c0_7], %8 {strides = array<i32>} : memref<16x8xf32, #tpu.memory_space<vmem>>, vector<16x8xf32>,
    %c0_i32_8 = arith.constant 0 : i32
    %10 = arith.cmpi eq, %arg2, %c0_i32_8 : i32
    %11 = arith.extui %10 : i1 to i32
    %c0_i32_9 = arith.constant 0 : i32
    %12 = arith.cmpi ne, %11, %c0_i32_9 : i32
    scf.if %12 {
      %c0_10 = arith.constant 0 : index
      %c0_11 = arith.constant 0 : index
      %13 = vector.load %arg6[%c0_10, %c0_11] : memref<16x8xf32, #tpu.memory_space<vmem>>, vector<16x8xf32>
      %c0_12 = arith.constant 0 : index
      %c0_13 = arith.constant 0 : index
      %14 = vector.load %arg5[%c0_12, %c0_13] : memref<16x8xf32, #tpu.memory_space<vmem>>, vector<16x8xf32>
      tpu.vector_store %arg5[%c0_12, %c0_13], %13 {strides = array<i32>} : memref<16x8xf32, #tpu.memory_space<vmem>>, vector<16x8xf32>,
    } else {
    }
    return
  }
  func.func @transform_0(%arg0: i32, %arg1: i32, %arg2: i32) -> (i32, i32) {
    %c0_i32 = arith.constant 0 : i32
    return %arg0, %arg2 : i32, i32
  }
  func.func @transform_1(%arg0: i32, %arg1: i32, %arg2: i32) -> (i32, i32) {
    %c0_i32 = arith.constant 0 : i32
    return %arg2, %arg1 : i32, i32
  }
  func.func @transform_2(%arg0: i32, %arg1: i32, %arg2: i32) -> (i32, i32) {
    %c0_i32 = arith.constant 0 : i32
    return %arg0, %arg1 : i32, i32
  }
}

</mosaic_0001>

<bundles_post_ra>
// kernel: transformer_forward.16
= control target key start
LH: loop header
LB: loop body
LE: loop exit
PB: predicated region body
PF: predicated region fallthrough
CT: control target
= control target key end

     0   :  { %vm28_vm0 = vcmask 1043456   ;;  %v99_v0 = vmov 0.0   ;;  %vm100_vm1 = vmmov 0   ;;  %vm24_vm2 = vcmask 64512   ;;  %s131_s1 = inlined_call_operand.vmem [shape: bf16[8,128], index: 1, kind: input, shape index: {}]   ;;  %s132_s0 = inlined_call_operand.vmem [shape: f32[16,8], index: 0, kind: input, shape index: {}]   ;;  %s133_s2 = inlined_call_operand.vmem [shape: f32[16,128], index: 2, kind: output, shape index: {}]  }
   0x1   :  { %91 = vmatprep.subr.bf16.mxu0 %v99_v0  ;;  %v23_v1 = vld [vmem:[%s131_s1] sm:$0xf]  ;;  %93 = vmatprep.mubr.msk.bf16.mxu0 %vm100_vm1, %v99_v0  ;;  %v21_v3 = vld [vmem:[%s132_s0 + $0x8] sm:$0xff] }
   0x2   :  { %v20_v2 = vld [vmem:[%s132_s0] sm:$0xff]  ;;  %v30_v4 = vsel %vm28_vm0, %v23_v1, 0 }
   0x3   :  { %v22_v5 = vpack.c.bf16 %v21_v3, %v20_v2  ;;  %92 = vmatpush3.bf16.msra.mxu0 %v30_v4 }
   0x6   :  { %94 = vmatmul.mubr.msk.bf16.vlgmr.msra.gmra.mrb[0].mxu0 %vm24_vm2, %v22_v5 }
  0xd9   :  { %v66_v6 = vpop.f32.mrb[0].mxu0 }
  0xda   :  { %82 = vst [vmem:[%s133_s2] sm:$0xff] %v66_v6  ;;  %v95_v7 = vpop.f32.mrb[1].mxu0 }
  0xdb   :  { %v69_v8 = vpop.f32.mrb[2].mxu0 }
  0xdc   :  { %83 = vst [vmem:[%s133_s2 + $0x8] sm:$0xff] %v69_v8  ;;  %v96_v9 = vpop.f32.mrb[3].mxu0 }

// kernel: transformer_forward.17
= control target key start
LH: loop header
LB: loop body
LE: loop exit
PB: predicated region body
PF: predicated region fallthrough
CT: control target
= control target key end

     0   :  { %8 = vsyncpa [#allocation4], 0  ;;  %s976_s0 = inlined_call_operand.vmem [shape: f32[2,1280], index: 0, kind: input, shape index: {}]   ;;  %s977_s1 = inlined_call_operand.hbm [shape: bf16[1280,128], index: 1, kind: input, shape index: {}]   ;;  %s978_s2 = inlined_call_operand.vmem [shape: f32[1,128], index: 2, kind: input, shape index: {}]   ;;  %s979_s3 = inlined_call_operand.vmem [shape: f32[2,128], index: 3, kind: output, shape index: {}]  }
   0x1   :  { %10 = vsyncpa [#allocation4 + $0x1], 0  ;;  %s827_s12 = smov 0   ;;  %s829_s13 = smov 0  }
   0x2   :  { %s831_s14 = smov 0   ;;  %s833_s15 = smov 0  }
   0x3   :  { %s835_s16 = smov 0   ;;  %s837_s17 = smov 0  }
   0x4 LB: > { %s590_s18 = sadd.s32 4294967295, %s801_s17   ;;  %s28_s19 = sadd.s32 1, %s797_s16  ;;  %s801_s17 = sphi %s837_s17, %s16_s17   ;;  %s797_s16 = sphi %s835_s16, %s987_s16   ;;  %s793_s15 = sphi %s833_s15, %s986_s15   ;;  %s789_s14 = sphi %s831_s14, %s985_s14   ;;  %s785_s13 = sphi %s829_s13, %s984_s13   ;;  %s781_s12 = sphi %s827_s12, %s983_s12  }
   0x5   : > { %p29_p0 = scmp.ge.s32.totalorder %s28_s19, 5  ;;  %s72_s20 = sadd.s32 1, %s789_s14 }
   0x6   : > { %p79_p1 = scmp.ne.s32.totalorder %s789_s14, %s785_s13  ;;  %p80_p2 = scmp.eq.s32.totalorder %s801_s17, 0 }
   0x7   : > { %s989_s19 = smov (%p29_p0, %s28_s19), 0  ;;  %p85_p4 = scmp.ne.s32.totalorder %s785_s13, %s781_s12 }
   0x8   : > { %p863_p3 = por %p80_p2, %p79_p1  ;;  %s67_s22 = ssub.s32 %s797_s16, %s989_s19 }
   0x9   : > { %p86_p5 = scmp.eq.s32.totalorder %s590_s18, 0  ;;  %p70_p6 = scmp.eq.s32.totalorder %s67_s22, 0 }
   0xa   : > { %p653_p8 = scmp.lt.s32.totalorder %s801_s17, 5  ;;  %s182_s25 = sand.u32 1, %s789_s14  }
   0xb   : > { %p870_p7 = por %p86_p5, %p85_p4  ;;  %s624_s26 = sshll.u32 %s797_s16, 11 }
   0xc   : > { %s876_s24 = scalar_select %p70_p6, %s789_s14, %s72_s20  }
   0xd   : > { %s594_s27 = sshll.u32 %s182_s25, 7  ;;  %s883_s30 = scalar_lea.hbm %s977_s1, %s624_s26 }
   0xe   : > { %s186_s4 = scalar_lea.vmem [#allocation3], %s594_s27  ;;  %p887_p9 = pnand %p653_p8, %p863_p3 }
   0xf   : > { %s194_s5 = sshll.u32 %s186_s4, 4  ;;  %s893_s7 = scalar_lea.sflag [#allocation4], %s182_s25  ;;  %s891_s5 = int_to_ptr.vmem [resolvable:$true] %s194_s5 }
  0x10   : > { %s721_s8 = scalar_lea.hbm %s883_s30, 2048  ;;  %p723_p11 = pneg %p887_p9 }
  0x11   : > { %p722_p10 = scmp.ne.s32.totalorder %s883_s30, %s721_s8  ;;  %s726_s11 = scalar_lea.hbm %s977_s1, 10240 }
  0x12   : > { %p727_p0 = scmp.lt.u32.totalorder %s883_s30, %s977_s1  ;;  %p728_p1 = scmp.lt.u32.totalorder %s726_s11, %s721_s8 }
  0x13   : > { %p724_p12 = pnand %p723_p11, %p722_p10  ;;  %p730_p3 = scmp.lt.u32.totalorder %s721_s8, %s883_s30 }
  0x14   : > { %p729_p2 = por %p728_p1, %p727_p0 }
  0x15   : > { %p725_p13 = pneg %p724_p12 }
  0x16   : > { %p731_p4 = por %p730_p3, %p729_p2 }
  0x18   : > { %p732_p5 = pnand %p731_p4, %p725_p13 }
  0x1a   : > { %735 = shalt.err (!%p732_p5)
}
  0x1b   : > { %s736_s20 = scalar_lea.vmem %s891_s5, 2048  ;;  %s803_s21 = smov [#allocation3]  }
  0x1c   : > { %p737_p6 = scmp.ne.s32.totalorder %s891_s5, %s736_s20  ;;  %s741_s22 = sshll.u32 %s803_s21, 4  ;;  %s742_s22 = int_to_ptr.vmem [resolvable:$false] %s741_s22 }
  0x1d   : > { %s743_s25 = scalar_lea.vmem %s742_s22, 4096  ;;  %p744_p12 = scmp.lt.s32.totalorder %s891_s5, %s742_s22 }
  0x1e   : > { %p739_p8 = pnand %p737_p6, %p723_p11  ;;  %p745_p0 = scmp.lt.s32.totalorder %s743_s25, %s736_s20 }
  0x20   : > { %p740_p10 = pneg %p739_p8  ;;  %p746_p1 = por %p745_p0, %p744_p12 }
  0x22   : > { %p747_p2 = pnand %p746_p1, %p740_p10 }
  0x24   : > { %750 = shalt.err (!%p747_p2)
}
  0x25   : > { %s804_s26 = smov 64   ;;  %s805_s27 = smov 4  }
  0x26   : > { %652 = dma.hbm_to_vmem [thread:$0]  (!%p887_p9), %s883_s30, 2048, %s891_s5, %s893_s7, %s804_s26, %s804_s26, %s805_s27  }
  0x27   : > { %p597_p11 = scmp.ge.s32.totalorder %s801_s17, 1  ;;  %p202_p13 = scmp.lt.s32.totalorder %s801_s17, 6 }
  0x29   : > { %p203_p3 = pnand %p597_p11, %p202_p13 }
  0x2a   : > { %s208_s28 = sand.u32 (!%p203_p3), 1, %s785_s13  }
  0x2b   : > { %206 = sbr.rel (%p203_p3) target bundleno = 321 (0x141), region = 32  ;;  %s598_s29 = sshll.u32 (!%p203_p3), %s208_s28, 7 }
  0x2c   : > { %s209_s4 = scalar_lea.sflag (!%p203_p3), [#allocation4], %s208_s28  ;;  %s924_s8 = scalar_lea.vmem (!%p203_p3), [#allocation3], %s598_s29 }
  0x32   : > { %776 = dma.done.wait (%p870_p7), %s209_s4, 2048  }
  0x33   : > { %778 = vsyncadd (%p870_p7), %s209_s4, 4294965248  ;;  %s599_s9 = sshll.u32 %s793_s15, 1  ;;  %p601_p9 = scmp.ne.s32.totalorder %s793_s15, 0 }
  0x34   : > { %p252_p4 = scmp.lt.s32.totalorder %s599_s9, 9  ;;  %v806_v0 = vmov (!%p601_p9), 0.0  }
  0x35   : > { %274 = sbr.rel (%p601_p9) target bundleno = 60 (0x3c), region = 40  ;;  %275 = vst [vmem:[#allocation2] sm:$0x3] (!%p601_p9), %v806_v0 }
  0x36   : > { %s991_s9 = smov (!%p252_p4, %s599_s9), 9 }
  0x37   : > { %s600_s30 = sshll.u32 %s991_s9, 1 }
  0x38   : > { %s257_s7 = scalar_lea.vmem %s976_s0, %s600_s30 }
  0x3c PF: > { %v705_v1 = vld [vmem:[%s924_s8 + $0x40] sm:$0xff]   ;;  %v707_v3 = vld [vmem:[%s924_s8 + $0x48] sm:$0xff]   ;;  %v709_v5 = vld [vmem:[%s924_s8 + $0x50] sm:$0xff]   ;;  %p619_p7 = scmp.ne.s32.totalorder %s793_s15, 4 }
  0x3d   : > { %v706_v2 = vld [vmem:[%s924_s8] sm:$0xff]   ;;  %625 = vmatprep.subr.bf16.mxu0 %v705_v1  ;;  %v708_v4 = vld [vmem:[%s924_s8 + $0x8] sm:$0xff]   ;;  %v710_v6 = vld [vmem:[%s924_s8 + $0x10] sm:$0xff]  }
  0x3e   : > { %626 = vmatpush3.bf16.msra.mxu0 %v706_v2  ;;  %v711_v7 = vld [vmem:[%s924_s8 + $0x58] sm:$0xff]   ;;  %v713_v9 = vld [vmem:[%s924_s8 + $0x60] sm:$0xff]   ;;  %v715_v11 = vld [vmem:[%s924_s8 + $0x68] sm:$0xff]  }
  0x3f   : > { %627 = vmatprep.subr.bf16.mxu0 %v707_v3  ;;  %v712_v8 = vld [vmem:[%s924_s8 + $0x18] sm:$0xff]   ;;  %v714_v10 = vld [vmem:[%s924_s8 + $0x20] sm:$0xff]   ;;  %v716_v14 = vld [vmem:[%s924_s8 + $0x28] sm:$0xff]  }
  0x40   : > { %v602_v12 = vld.sshfl [vmem:[%s257_s7] sm:$0x33 pattern:$0x76325410]  ;;  %v717_v16 = vld [vmem:[%s924_s8 + $0x70] sm:$0xff]  }
  0x41   : > { %v286_v13 = vcombine.high %v602_v12, %v602_v12  ;;  %v718_v17 = vld [vmem:[%s924_s8 + $0x30] sm:$0xff]   ;;  %v719_v18 = vld [vmem:[%s924_s8 + $0x78] sm:$0xff]   ;;  %v289_v20 = vpack.c.bf16 %v602_v12, %v602_v12 }
  0x42   : > { %628 = vmatpush3.bf16.msra.mxu0 %v708_v4  ;;  %v720_v19 = vld [vmem:[%s924_s8 + $0x38] sm:$0xff]  }
  0x43   : > { %629 = vmatprep.subr.bf16.mxu0 %v709_v5  ;;  %v290_v15 = vpack.c.bf16 %v286_v13, %v286_v13  ;;  %v276_v22 = vld [vmem:[#allocation2] sm:$0x3] }
  0x44   : > { %v620_v29 = vld [vmem:[%s978_s2] ss:$0 sm:$0xff] (!%p619_p7) }
  0x45   : > { %451 = vmatprep.mubr.bf16.mxu0 %v290_v15 }
  0x46   : > { %630 = vmatpush3.bf16.msra.mxu0 %v710_v6 }
  0x47   : > { %631 = vmatprep.subr.bf16.mxu0 %v711_v7 }
  0x4a   : > { %632 = vmatpush3.bf16.msra.mxu0 %v712_v8 }
  0x4b   : > { %633 = vmatprep.subr.bf16.mxu0 %v713_v9 }
  0x4e   : > { %634 = vmatpush3.bf16.msra.mxu0 %v714_v10 }
  0x4f   : > { %635 = vmatprep.subr.bf16.mxu0 %v715_v11 }
  0x52   : > { %636 = vmatpush3.bf16.msra.mxu0 %v716_v14 }
  0x53   : > { %637 = vmatprep.subr.bf16.mxu0 %v717_v16 }
  0x56   : > { %638 = vmatpush3.bf16.msra.mxu0 %v718_v17 }
  0x57   : > { %639 = vmatprep.subr.bf16.mxu0 %v719_v18 }
  0x5a   : > { %640 = vmatpush3.bf16.msra.mxu0 %v720_v19 }
  0x5d   : > { %452 = vmatmul.mubr.bf16.vlgmr.msra.gmra.mrb[0].mxu0 %v289_v20 }
 0x130   : > { %v641_v21 = vpop.f32.mrb[0].mxu0  ;;  %464 = sbr.rel (%p619_p7) target bundleno = 321 (0x141), region = 44 }
 0x131   : > { %v642_v23 = vpop.f32.mrb[1].mxu0 }
 0x132   : > { %v643_v24 = vadd.f32 %v642_v23, %v641_v21  ;;  %v644_v25 = vpop.f32.mrb[2].mxu0 }
 0x133   : > { %v645_v26 = vpop.f32.mrb[3].mxu0 }
 0x134   : > { %v459_v27 = vadd.f32 %v643_v24, %v276_v22 }
 0x136   : > { %460 = vst [vmem:[#allocation2] sm:$0x3] %v459_v27 }
 0x13d   : > { %v465_v28 = vld [vmem:[#allocation2] sm:$0x3] }
 0x13e   : > { %v473_v30 = vadd.f32 %v620_v29, %v465_v28 }
 0x140   : > { %474 = vst [vmem:[%s979_s3] sm:$0x3] %v473_v30 }
 0x141 PF: > { %s16_s17 = sadd.s32 1, %s801_s17   ;;  %s983_s12 = smov %s785_s13 }
 0x142   : > { %p13_p5 = scmp.ge.s32.totalorder %s16_s17, 7   ;;  %s984_s13 = smov %s789_s14 }
 0x143   : > { %s985_s14 = smov %s876_s24  ;;  %s986_s15 = smov %s797_s16 }
 0x144   : > { %s987_s16 = smov %s989_s19  ;;  %15 = sbr.rel (!%p13_p5) target bundleno = 4 (0x4), region = 86 }
 0x14b   :  { %500 = vsyncpa [#allocation4], 1 }
 0x14c   :  { %502 = vsyncpa [#allocation4 + $0x1], 1 }

// kernel: transformer_forward.18
= control target key start
LH: loop header
LB: loop body
LE: loop exit
PB: predicated region body
PF: predicated region fallthrough
CT: control target
= control target key end

     0   :  { %s816_s12 = smov 0   ;;  %s818_s13 = smov 0   ;;  %s905_s0 = inlined_call_operand.vmem [shape: f32[2,128], index: 0, kind: input, shape index: {}]   ;;  %s906_s1 = inlined_call_operand.vmem [shape: bf16[128,768], index: 1, kind: input, shape index: {}]   ;;  %s907_s2 = inlined_call_operand.vmem [shape: f32[1,768], index: 2, kind: input, shape index: {}]   ;;  %s908_s3 = inlined_call_operand.vmem [shape: f32[2,768], index: 3, kind: output, shape index: {}]  }
   0x1   :  { %s820_s14 = smov 0   ;;  %s822_s15 = smov 0  }
   0x2   :  { %s824_s16 = smov 0  }
   0x3 LB: > { %s28_s17 = sadd.s32 1, %s787_s15  ;;  %p76_p1 = scmp.ne.s32.totalorder %s779_s13, %s775_s12  ;;  %s791_s16 = sphi %s824_s16, %s13_s16   ;;  %s787_s15 = sphi %s822_s15, %s912_s15   ;;  %s783_s14 = sphi %s820_s14, %s911_s14   ;;  %s779_s13 = sphi %s818_s13, %s910_s13   ;;  %s775_s12 = sphi %s816_s12, %s909_s12  }
   0x4   : > { %p30_p0 = scmp.ge.s32.totalorder %s28_s17, 3  ;;  %p77_p2 = scmp.eq.s32.totalorder %s791_s16, 0 }
   0x5   : > { %s69_s19 = sadd.s32 1, %s779_s13  ;;  %p658_p5 = scmp.ge.s32.totalorder %s791_s16, 3 }
   0x6   : > { %s914_s17 = smov (%p30_p0, %s28_s17), 0  ;;  %p78_p3 = por %p77_p2, %p76_p1 }
   0x7   : > { %s65_s18 = ssub.s32 %s787_s15, %s914_s17  ;;  %166 = sbr.rel (%p658_p5) target bundleno = 26 (0x1a), region = 20 }
   0x8   : > { %p67_p4 = scmp.eq.s32.totalorder %s65_s18, 0 }
   0xa   : > { %s851_s20 = scalar_select %p67_p4, %s779_s13, %s69_s19  }
   0xe   : > { %169 = sbr.rel (!%p78_p3) target bundleno = 26 (0x1a), region = 24  ;;  %s171_s21 = sand.u32 (%p78_p3), 1, %s779_s13  }
   0xf   : > { %s685_s22 = sshll.u32 (%p78_p3), %s787_s15, 3  ;;  %s659_s23 = sshll.u32 (%p78_p3), %s171_s21, 7 }
  0x10   : > { %s859_s26 = scalar_lea.vmem (%p78_p3), %s906_s1, %s685_s22  ;;  %s173_s27 = scalar_lea.vmem (%p78_p3), [#allocation3], %s659_s23 }
  0x11   : > { %v237_v0 = vld [vmem:[%s859_s26] sm:$0xff] (%p78_p3)  ;;  %v239_v1 = vld [vmem:[%s859_s26 + $0x18] sm:$0xff] (%p78_p3)  ;;  %v241_v2 = vld [vmem:[%s859_s26 + $0x30] sm:$0xff] (%p78_p3) }
  0x12   : > { %238 = vst [vmem:[%s173_s27] sm:$0xff] (%p78_p3), %v237_v0  ;;  %240 = vst [vmem:[%s173_s27 + $0x8] sm:$0xff] (%p78_p3), %v239_v1  ;;  %v243_v3 = vld [vmem:[%s859_s26 + $0x48] sm:$0xff] (%p78_p3)  ;;  %v245_v4 = vld [vmem:[%s859_s26 + $0x60] sm:$0xff] (%p78_p3) }
  0x13   : > { %242 = vst [vmem:[%s173_s27 + $0x10] sm:$0xff] (%p78_p3), %v241_v2  ;;  %v247_v5 = vld [vmem:[%s859_s26 + $0x78] sm:$0xff] (%p78_p3)  ;;  %244 = vst [vmem:[%s173_s27 + $0x18] sm:$0xff] (%p78_p3), %v243_v3  ;;  %v249_v6 = vld [vmem:[%s859_s26 + $0x90] sm:$0xff] (%p78_p3) }
  0x14   : > { %246 = vst [vmem:[%s173_s27 + $0x20] sm:$0xff] (%p78_p3), %v245_v4  ;;  %248 = vst [vmem:[%s173_s27 + $0x28] sm:$0xff] (%p78_p3), %v247_v5  ;;  %v251_v7 = vld [vmem:[%s859_s26 + $0xa8] sm:$0xff] (%p78_p3)  ;;  %v253_v8 = vld [vmem:[%s859_s26 + $0xc0] sm:$0xff] (%p78_p3) }
  0x15   : > { %250 = vst [vmem:[%s173_s27 + $0x30] sm:$0xff] %v249_v6  ;;  %252 = vst [vmem:[%s173_s27 + $0x38] sm:$0xff] %v251_v7  ;;  %v255_v9 = vld [vmem:[%s859_s26 + $0xd8] sm:$0xff]  ;;  %v257_v10 = vld [vmem:[%s859_s26 + $0xf0] sm:$0xff] }
  0x16   : > { %254 = vst [vmem:[%s173_s27 + $0x40] sm:$0xff] %v253_v8  ;;  %v259_v11 = vld [vmem:[%s859_s26 + $0x108] sm:$0xff]  ;;  %256 = vst [vmem:[%s173_s27 + $0x48] sm:$0xff] %v255_v9  ;;  %v261_v12 = vld [vmem:[%s859_s26 + $0x120] sm:$0xff] }
  0x17   : > { %258 = vst [vmem:[%s173_s27 + $0x50] sm:$0xff] %v257_v10  ;;  %260 = vst [vmem:[%s173_s27 + $0x58] sm:$0xff] %v259_v11  ;;  %v263_v13 = vld [vmem:[%s859_s26 + $0x138] sm:$0xff]  ;;  %v265_v14 = vld [vmem:[%s859_s26 + $0x150] sm:$0xff] }
  0x18   : > { %262 = vst [vmem:[%s173_s27 + $0x60] sm:$0xff] %v261_v12  ;;  %264 = vst [vmem:[%s173_s27 + $0x68] sm:$0xff] %v263_v13  ;;  %v267_v15 = vld [vmem:[%s859_s26 + $0x168] sm:$0xff] }
  0x19   : > { %266 = vst [vmem:[%s173_s27 + $0x70] sm:$0xff] %v265_v14  ;;  %268 = vst [vmem:[%s173_s27 + $0x78] sm:$0xff] %v267_v15 }
  0x1a PF: > { %p662_p6 = scmp.ge.s32.totalorder %s791_s16, 1  ;;  %p281_p7 = scmp.lt.s32.totalorder %s791_s16, 4 }
  0x1c   : > { %p282_p8 = pnand %p662_p6, %p281_p7 }
  0x1d   : > { %s288_s28 = sand.u32 (!%p282_p8), 1, %s775_s12   ;;  %v793_v16 = vmov (!%p282_p8), 0   ;;  %v357_v33 = vld [vmem:[%s905_s0] sm:$0x3] (!%p282_p8)  ;;  %v794_v35 = vmov (!%p282_p8), 0.0   ;;  %s664_s6 = sshll.u32 (!%p282_p8), %s783_s14, 1  ;;  %v502_v38 = vlaneseq (!%p282_p8) }
  0x1e   : > { %285 = sbr.rel (%p282_p8) target bundleno = 295 (0x127), region = 66  ;;  %s663_s29 = sshll.u32 (!%p282_p8), %s288_s28, 7  ;;  %487 = vmatprep.mubr.bf16.mxu0 (!%p282_p8), %v793_v16  ;;  %v358_v34 = vpack.c.bf16 (!%p282_p8), %v357_v33, %v357_v33  ;;  %355 = vst [vmem:[#allocation2] sm:$0xf] (!%p282_p8), %v794_v35  ;;  %v795_v36 = vmov (!%p282_p8), 1983009808  }
  0x1f   : > { %s290_s30 = scalar_lea.vmem (!%p282_p8), [#allocation3], %s663_s29  ;;  %p336_p9 = scmp.lt.s32.totalorder (!%p282_p8), %s664_s6, 5  ;;  %v500_v37 = vunpack.c.l.s4 (!%p282_p8), %v795_v36  ;;  %v503_v40 = vshrl.u32 (!%p282_p8), %v502_v38, 7 }
  0x20   : > { %v729_v17 = vld [vmem:[%s290_s30 + $0x4] ss:$8 sps:$4 sm:$0xff] (!%p282_p8)   ;;  %v731_v18 = vld [vmem:[%s290_s30] ss:$8 sps:$4 sm:$0xff] (!%p282_p8)   ;;  %v732_v19 = vld [vmem:[%s290_s30 + $0x14] ss:$8 sps:$4 sm:$0xff] (!%p282_p8)  }
  0x21   : > { %455 = vmatprep.subr.bf16.mxu0 (!%p282_p8), %v729_v17  ;;  %v734_v20 = vld [vmem:[%s290_s30 + $0x10] ss:$8 sps:$4 sm:$0xff] (!%p282_p8)   ;;  %v735_v21 = vld [vmem:[%s290_s30 + $0x24] ss:$8 sps:$4 sm:$0xff] (!%p282_p8)   ;;  %v737_v22 = vld [vmem:[%s290_s30 + $0x20] ss:$8 sps:$4 sm:$0xff] (!%p282_p8)   ;;  %v501_v39 = vunpack.c.0.s8 (!%p282_p8), %v500_v37 }
  0x22   : > { %456 = vmatpush1.bf16.msra.mxu0 (!%p282_p8), %v731_v18  ;;  %v738_v23 = vld [vmem:[%s290_s30 + $0x34] ss:$8 sps:$4 sm:$0xff] (!%p282_p8)   ;;  %v740_v24 = vld [vmem:[%s290_s30 + $0x30] ss:$8 sps:$4 sm:$0xff] (!%p282_p8)   ;;  %v741_v25 = vld [vmem:[%s290_s30 + $0x44] ss:$8 sps:$4 sm:$0xff] (!%p282_p8)  }
  0x23   : > { %457 = vmatprep.subr.bf16.mxu0 (!%p282_p8), %v732_v19  ;;  %v743_v26 = vld [vmem:[%s290_s30 + $0x40] ss:$8 sps:$4 sm:$0xff] (!%p282_p8)   ;;  %v744_v27 = vld [vmem:[%s290_s30 + $0x54] ss:$8 sps:$4 sm:$0xff] (!%p282_p8)   ;;  %v746_v28 = vld [vmem:[%s290_s30 + $0x50] ss:$8 sps:$4 sm:$0xff] (!%p282_p8)   ;;  %v504_v42 = vsub.s32 (!%p282_p8), %v501_v39, %v503_v40 }
  0x24   : > { %v747_v29 = vld [vmem:[%s290_s30 + $0x64] ss:$8 sps:$4 sm:$0xff] (!%p282_p8)   ;;  %v749_v30 = vld [vmem:[%s290_s30 + $0x60] ss:$8 sps:$4 sm:$0xff] (!%p282_p8)   ;;  %v750_v31 = vld [vmem:[%s290_s30 + $0x74] ss:$8 sps:$4 sm:$0xff] (!%p282_p8)  }
  0x25   : > { %v752_v32 = vld [vmem:[%s290_s30 + $0x70] ss:$8 sps:$4 sm:$0xff]   ;;  %s916_s6 = smov (!%p336_p9, %s664_s6), 5  ;;  %v517_v43 = vsub.s32 0, %v503_v40  ;;  %v521_v44 = vsub.s32 1, %v503_v40 }
  0x26   : > { %458 = vmatpush1.bf16.msra.mxu0 %v734_v20  ;;  %s338_s9 = scalar_lea.vmem %s907_s2, %s916_s6  ;;  %v356_v49 = vld [vmem:[#allocation2] sm:$0xf]  ;;  %s666_s10 = sshll.u32 %s916_s6, 1 }
  0x27   : > { %459 = vmatprep.subr.bf16.mxu0 %v735_v21  ;;  %v513_v46 = vld [vmem:[%s338_s9] sm:$0x3]  ;;  %s348_s14 = scalar_lea.vmem %s908_s3, %s666_s10 }
  0x28   : > { %v518_v52 = vrot.slane %v513_v46, %v517_v43  ;;  %v522_v53 = vrot.slane %v513_v46, %v521_v44 }
  0x2a   : > { %460 = vmatpush1.bf16.msra.mxu0 %v737_v22  ;;  %v523_v55 = vcombine.low %v518_v52, %v522_v53 }
  0x2b   : > { %461 = vmatprep.subr.bf16.mxu0 %v738_v23 }
  0x2c   : > { %v530_v56 = vrot.slane %v523_v55, %v504_v42 }
  0x2e   : > { %462 = vmatpush1.bf16.msra.mxu0 %v740_v24 }
  0x2f   : > { %463 = vmatprep.subr.bf16.mxu0 %v741_v25 }
  0x32   : > { %464 = vmatpush1.bf16.msra.mxu0 %v743_v26 }
  0x33   : > { %465 = vmatprep.subr.bf16.mxu0 %v744_v27 }
  0x36   : > { %466 = vmatpush1.bf16.msra.mxu0 %v746_v28 }
  0x37   : > { %467 = vmatprep.subr.bf16.mxu0 %v747_v29 }
  0x3a   : > { %468 = vmatpush1.bf16.msra.mxu0 %v749_v30 }
  0x3b   : > { %469 = vmatprep.subr.bf16.mxu0 %v750_v31 }
  0x3e   : > { %470 = vmatpush1.bf16.msra.mxu0 %v752_v32 }
  0x41   : > { %488 = vmatmul.mubr.bf16.vlgmr.msra.gmra.mrb[0].mxu0 %v358_v34 }
 0x114   : > { %v489_v41 = vpop.f32.mrb[0].mxu0 }
 0x115   : > { %v491_v45 = vpop.f32.mrb[1].mxu0 }
 0x116   : > { %v498_v47 = vcombine.low %v489_v41, %v491_v45  ;;  %v493_v48 = vpop.f32.mrb[2].mxu0 }
 0x117   : > { %v494_v50 = vpop.f32.mrb[3].mxu0 }
 0x118   : > { %v505_v51 = vrot.slane %v498_v47, %v504_v42 }
 0x11a   : > { %v507_v54 = vadd.f32 %v505_v51, %v356_v49 }
 0x11c   : > { %508 = vst [vmem:[#allocation2] sm:$0xf] %v507_v54 }
 0x123   : > { %v512_v57 = vld [vmem:[#allocation2] sm:$0xf] }
 0x124   : > { %v532_v58 = vadd.f32 %v530_v56, %v512_v57 }
 0x126   : > { %533 = vst [vmem:[%s348_s14] sm:$0xf] %v532_v58 }
 0x127 PF: > { %s13_s16 = sadd.s32 1, %s791_s16   ;;  %s909_s12 = smov %s779_s13 }
 0x128   : > { %p10_p10 = scmp.ge.s32.totalorder %s13_s16, 5   ;;  %s910_s13 = smov %s851_s20 }
 0x129   : > { %s911_s14 = smov %s787_s15  ;;  %s912_s15 = smov %s914_s17 }
 0x12a   :  { %12 = sbr.rel (!%p10_p10) target bundleno = 3 (0x3), region = 119 }

// kernel: transformer_forward.19
= control target key start
LH: loop header
LB: loop body
LE: loop exit
PB: predicated region body
PF: predicated region fallthrough
CT: control target
= control target key end

     0   :  { %s429_s12 = smov 0   ;;  %s431_s13 = smov 0   ;;  %s474_s0 = inlined_call_operand.vmem [shape: f32[2,8,128], index: 0, kind: input, shape index: {}]   ;;  %s475_s1 = inlined_call_operand.vmem [shape: f32[2,1,128], index: 1, kind: input, shape index: {}]   ;;  %s476_s2 = inlined_call_operand.vmem [shape: f32[2,1,128], index: 2, kind: input, shape index: {}]   ;;  %s477_s3 = inlined_call_operand.vmem [shape: bf16[2,8,128], index: 3, kind: output, shape index: {}]  }
   0x1   :  { %s433_s14 = smov 0  }
   0x2 LB: > { %s25_s15 = sadd.s32 1, %s403_s13  ;;  %p353_p0 = scmp.ge.s32.totalorder %s407_s14, 1  ;;  %s407_s14 = sphi %s433_s14, %s13_s14   ;;  %s403_s13 = sphi %s431_s13, %s479_s13   ;;  %s399_s12 = sphi %s429_s12, %s478_s12  }
   0x3   : > { %p27_p1 = scmp.ge.s32.totalorder %s25_s15, 2  ;;  %p171_p2 = scmp.lt.s32.totalorder %s407_s14, 3 }
   0x5   : > { %s481_s15 = smov (%p27_p1, %s25_s15), 0  ;;  %p172_p3 = pnand %p353_p0, %p171_p2 }
   0x6   : > { %p205_p4 = scmp.lt.s32.totalorder (!%p172_p3), %s399_s12, 1  ;;  %v241_v7 = vlaneseq (!%p172_p3) }
   0x7   : > { %175 = sbr.rel (%p172_p3) target bundleno = 332 (0x14c), region = 32 }
   0x8   : > { %v242_v9 = vshrl.u32 (!%p172_p3), %v241_v7, 7 }
   0xa   : > { %v243_v12 = vsub.s32 (!%p172_p3), 0, %v242_v9 }
   0xe   : > { %s483_s12 = smov (!%p205_p4, %s399_s12), 1 }
   0xf   : > { %s354_s16 = sshll.u32 %s483_s12, 3  ;;  %s214_s22 = scalar_lea.vmem %s475_s1, %s483_s12 }
  0x10   : > { %s211_s19 = scalar_lea.vmem %s474_s0, %s354_s16  ;;  %v238_v10 = vld [vmem:[%s214_s22] sm:$0x1]  ;;  %s217_s25 = scalar_lea.vmem %s476_s2, %s483_s12 }
  0x11   : > { %v225_v0 = vld [vmem:[%s211_s19] sm:$0xff]  ;;  %v239_v11 = vadd.f32 1.0, %v238_v10  ;;  %s355_s26 = sshll.u32 %s483_s12, 2 }
  0x12   : > { %226 = vadd.xlane.f32.xlu0 %v225_v0  ;;  %v356_v16 = vld [vmem:[%s217_s25] ss:$0 sm:$0xff]  ;;  %s224_s29 = scalar_lea.vmem %s477_s3, %s355_s26 }
  0x13   : > { %v244_v13 = vrot.slane %v239_v11, %v243_v12 }
  0x9f   : > { %v227_v1 = vpop.xlane.xlu0 %226 }
  0xa0   : > { %v229_v2 = vmul.f32 0.0078125, %v227_v1 }
  0xa2   : > { %v230_v3 = vsub.f32 %v225_v0, %v229_v2 }
  0xa4   : > { %v231_v4 = vmul.f32 %v230_v3, %v230_v3 }
  0xa6   : > { %232 = vadd.xlane.f32.xlu0 %v231_v4 }
 0x133   : > { %v233_v5 = vpop.xlane.xlu0 %232 }
 0x134   : > { %v234_v6 = vmul.f32 0.0078125, %v233_v5 }
 0x136   : > { %v235_v8 = vadd.f32 1e-05, %v234_v6 }
 0x138   : > { %383 = vrsqrt.f32 %v235_v8 }
 0x142   : > { %v384_v14 = vpop.eup %383 }
 0x143   : > { %v237_v15 = vmul.f32 %v384_v14, %v230_v3 }
 0x145   : > { %v246_v17 = vmul.f32 %v244_v13, %v237_v15 }
 0x147   : > { %v254_v18 = vadd.f32 %v356_v16, %v246_v17 }
 0x149   : > { %v255_v19 = vpack.c.bf16 %v254_v18, %v254_v18 }
 0x14b   : > { %256 = vst [vmem:[%s224_s29] sm:$0xf] %v255_v19 }
 0x14c PF: > { %s13_s14 = sadd.s32 1, %s407_s14   ;;  %s478_s12 = smov %s403_s13 }
 0x14d   : > { %p10_p5 = scmp.ge.s32.totalorder %s13_s14, 4   ;;  %s479_s13 = smov %s481_s15 }
 0x14f   :  { %12 = sbr.rel (!%p10_p5) target bundleno = 2 (0x2), region = 68 }

// kernel: transformer_forward.20
= control target key start
LH: loop header
LB: loop body
LE: loop exit
PB: predicated region body
PF: predicated region fallthrough
CT: control target
= control target key end

     0   :  { %s607_s9 = smov 0   ;;  %s609_s10 = smov 0   ;;  %s651_s0 = inlined_call_operand.vmem [shape: bf16[16,128], index: 0, kind: input, shape index: {}]   ;;  %s652_s1 = inlined_call_operand.vmem [shape: bf16[6,128,64], index: 1, kind: input, shape index: {}]   ;;  %s653_s2 = inlined_call_operand.vmem [shape: bf16[6,16,64], index: 2, kind: output, shape index: {}]  }
   0x1   :  { %s611_s11 = smov 0  }
   0x2 LB: > { %s31_s12 = sadd.s32 1, %s584_s10  ;;  %p480_p0 = scmp.ge.s32.totalorder %s588_s11, 1  ;;  %s588_s11 = sphi %s611_s11, %s12_s11   ;;  %s584_s10 = sphi %s609_s10, %s655_s10   ;;  %s580_s9 = sphi %s607_s9, %s654_s9  }
   0x3   : > { %p33_p1 = scmp.ge.s32.totalorder %s31_s12, 6  ;;  %p156_p2 = scmp.lt.s32.totalorder %s588_s11, 7 }
   0x5   : > { %s657_s12 = smov (%p33_p1, %s31_s12), 0  ;;  %p157_p3 = pnand %p480_p0, %p156_p2 }
   0x6   : > { %p204_p4 = scmp.lt.s32.totalorder (!%p157_p3), %s580_s9, 5  ;;  %v590_v0 = vmov (!%p157_p3), 0.0   ;;  %vm591_vm0 = vmmov (!%p157_p3), 0   ;;  %vm228_vm1 = vcmask (!%p157_p3), 523264   ;;  %v565_v9 = vld [vmem:[%s651_s0] sm:$0xff] (!%p157_p3)   ;;  %vm364_vm2 = vcmask (!%p157_p3), 519168  }
   0x7   : > { %160 = sbr.rel (%p157_p3) target bundleno = 276 (0x114), region = 28  ;;  %511 = vmatprep.subr.bf16.mxu0 (!%p157_p3), %v590_v0  ;;  %527 = vmatprep.mubr.msk.bf16.mxu0 (!%p157_p3), %vm591_vm0, %v590_v0  ;;  %229 = vst.msk [vmem:[#allocation2] sm:$0xff] (!%p157_p3), %vm228_vm1, %v590_v0  ;;  %230 = vst.msk [vmem:[#allocation2 + $0x8] sm:$0xff] (!%p157_p3), %vm228_vm1, %v590_v0 }
   0xe   : > { %s659_s9 = smov (!%p204_p4, %s580_s9), 5  ;;  %v231_v10 = vld [vmem:[#allocation2] sm:$0xff]  ;;  %v232_v12 = vld [vmem:[#allocation2 + $0x8] sm:$0xff] }
   0xf   : > { %s498_s13 = sshll.u32 %s659_s9, 6  ;;  %s499_s19 = sshll.u32 %s659_s9, 3 }
  0x10   : > { %s211_s16 = scalar_lea.vmem %s652_s1, %s498_s13  ;;  %s221_s22 = scalar_lea.vmem %s653_s2, %s499_s19 }
  0x11   : > { %v557_v1 = vld [vmem:[%s211_s16] sm:$0xff]   ;;  %v558_v2 = vld [vmem:[%s211_s16 + $0x8] sm:$0xff]   ;;  %v559_v3 = vld [vmem:[%s211_s16 + $0x10] sm:$0xff]  }
  0x12   : > { %512 = vmatpush3.bf16.msra.mxu0 %v557_v1  ;;  %v560_v4 = vld [vmem:[%s211_s16 + $0x18] sm:$0xff]   ;;  %v561_v5 = vld [vmem:[%s211_s16 + $0x20] sm:$0xff]   ;;  %v562_v6 = vld [vmem:[%s211_s16 + $0x28] sm:$0xff]  }
  0x13   : > { %513 = vmatprep.subr.bf16.mxu0 %v590_v0  ;;  %v563_v7 = vld [vmem:[%s211_s16 + $0x30] sm:$0xff]   ;;  %v564_v8 = vld [vmem:[%s211_s16 + $0x38] sm:$0xff]  }
  0x16   : > { %514 = vmatpush3.bf16.msra.mxu0 %v558_v2 }
  0x17   : > { %515 = vmatprep.subr.bf16.mxu0 %v590_v0 }
  0x1a   : > { %516 = vmatpush3.bf16.msra.mxu0 %v559_v3 }
  0x1b   : > { %517 = vmatprep.subr.bf16.mxu0 %v590_v0 }
  0x1e   : > { %518 = vmatpush3.bf16.msra.mxu0 %v560_v4 }
  0x1f   : > { %519 = vmatprep.subr.bf16.mxu0 %v590_v0 }
  0x22   : > { %520 = vmatpush3.bf16.msra.mxu0 %v561_v5 }
  0x23   : > { %521 = vmatprep.subr.bf16.mxu0 %v590_v0 }
  0x26   : > { %522 = vmatpush3.bf16.msra.mxu0 %v562_v6 }
  0x27   : > { %523 = vmatprep.subr.bf16.mxu0 %v590_v0 }
  0x2a   : > { %524 = vmatpush3.bf16.msra.mxu0 %v563_v7 }
  0x2b   : > { %525 = vmatprep.subr.bf16.mxu0 %v590_v0 }
  0x2e   : > { %526 = vmatpush3.bf16.msra.mxu0 %v564_v8 }
  0x31   : > { %528 = vmatmul.mubr.bf16.vlgmr.msra.gmra.mrb[0].mxu0 %v565_v9 }
 0x104   : > { %v339_v11 = vpop.f32.mrb[0].mxu0 }
 0x105   : > { %v346_v13 = vadd.f32 %v339_v11, %v231_v10  ;;  %v529_v14 = vpop.f32.mrb[1].mxu0 }
 0x106   : > { %v342_v15 = vpop.f32.mrb[2].mxu0 }
 0x107   : > { %349 = vst.msk [vmem:[#allocation2] sm:$0xff] %vm228_vm1, %v346_v13  ;;  %v347_v16 = vadd.f32 %v342_v15, %v232_v12  ;;  %v530_v17 = vpop.f32.mrb[3].mxu0 }
 0x109   : > { %350 = vst.msk [vmem:[#allocation2 + $0x8] sm:$0xff] %vm228_vm1, %v347_v16 }
 0x10e   : > { %v354_v18 = vld [vmem:[#allocation2] sm:$0xff] }
 0x10f   : > { %v500_v19 = vpack.c.bf16 %v354_v18, %v354_v18 }
 0x110   : > { %v355_v20 = vld [vmem:[#allocation2 + $0x8] sm:$0xff] }
 0x111   : > { %365 = vst.msk [vmem:[%s221_s22] sm:$0xf] %vm364_vm2, %v500_v19  ;;  %v501_v21 = vpack.c.bf16 %v355_v20, %v355_v20 }
 0x113   : > { %366 = vst.msk [vmem:[%s221_s22 + $0x4] sm:$0xf] %vm364_vm2, %v501_v21 }
 0x114 PF: > { %s12_s11 = sadd.s32 1, %s588_s11   ;;  %s654_s9 = smov %s584_s10 }
 0x115   : > { %p9_p5 = scmp.ge.s32.totalorder %s12_s11, 8   ;;  %s655_s10 = smov %s657_s12 }
 0x117   :  { %11 = sbr.rel (!%p9_p5) target bundleno = 2 (0x2), region = 69 }

// kernel: transformer_forward.22
= control target key start
LH: loop header
LB: loop body
LE: loop exit
PB: predicated region body
PF: predicated region fallthrough
CT: control target
= control target key end

     0   :  { %s693_s15 = smov 0   ;;  %s695_s16 = smov 0   ;;  %s747_s0 = inlined_call_operand.vmem [shape: bf16[2,16,64], index: 0, kind: input, shape index: {}]   ;;  %s748_s1 = inlined_call_operand.vmem [shape: bf16[2,64,128], index: 1, kind: input, shape index: {}]   ;;  %s749_s2 = inlined_call_operand.vmem [shape: f32[1,128], index: 2, kind: input, shape index: {}]   ;;  %s750_s3 = inlined_call_operand.vmem [shape: f32[16,128], index: 3, kind: input, shape index: {}]   ;;  %s751_s4 = inlined_call_operand.vmem [shape: f32[16,128], index: 4, kind: output, shape index: {}]  }
   0x1   :  { %s697_s17 = smov 0  }
   0x2 LB: > { %s26_s18 = sadd.s32 1, %s659_s16  ;;  %p572_p0 = scmp.ge.s32.totalorder %s663_s17, 1  ;;  %s663_s17 = sphi %s697_s17, %s14_s17   ;;  %s659_s16 = sphi %s695_s16, %s753_s16   ;;  %s655_s15 = sphi %s693_s15, %s752_s15  }
   0x3   : > { %p27_p1 = scmp.ge.s32.totalorder %s26_s18, 2  ;;  %p229_p2 = scmp.lt.s32.totalorder %s663_s17, 3 }
   0x5   : > { %s755_s18 = smov (%p27_p1, %s26_s18), 0  ;;  %p230_p3 = pnand %p572_p0, %p229_p2 }
   0x6   : > { %p282_p4 = scmp.lt.s32.totalorder (!%p230_p3), %s655_s15, 1  ;;  %p577_p5 = scmp.ne.s32.totalorder (!%p230_p3), %s655_s15, 0 }
   0x7   : > { %233 = sbr.rel (%p230_p3) target bundleno = 268 (0x10c), region = 36 }
   0xe   : > { %s283_s19 = scalar_select %p282_p4, %s655_s15, 1 }
   0xf   : > { %324 = sbr.rel (%p577_p5) target bundleno = 22 (0x16), region = 40  ;;  %v665_v0 = vmov (!%p577_p5), 0.0  }
  0x10   : > { %s590_s20 = sshll.u32 %s283_s19, 3  ;;  %s591_s21 = sshll.u32 %s283_s19, 5  ;;  %325 = vst [vmem:[#allocation2] sm:$0xff] (!%p577_p5), %v665_v0  ;;  %326 = vst [vmem:[#allocation2 + $0x8] sm:$0xff] (!%p577_p5), %v665_v0 }
  0x11   : > { %s289_s24 = scalar_lea.vmem %s747_s0, %s590_s20  ;;  %s298_s27 = scalar_lea.vmem %s748_s1, %s591_s21 }
  0x16 PF: > { %v636_v1 = vld [vmem:[%s298_s27] sm:$0xff]   ;;  %v666_v2 = vmov 0.0   ;;  %v637_v3 = vld [vmem:[%s298_s27 + $0x8] sm:$0xff]   ;;  %vm667_vm0 = vmmov 0   ;;  %v638_v4 = vld [vmem:[%s298_s27 + $0x10] sm:$0xff]   ;;  %vm368_vm1 = vcmask 523264  }
  0x17   : > { %597 = vmatprep.subr.bf16.mxu0 %v666_v2  ;;  %605 = vmatprep.mubr.msk.bf16.mxu0 %vm667_vm0, %v666_v2  ;;  %v639_v5 = vld [vmem:[%s298_s27 + $0x18] sm:$0xff]   ;;  %v640_v6 = vld [vmem:[%s289_s24] sm:$0xff]   ;;  %v328_v9 = vld [vmem:[#allocation2 + $0x8] sm:$0xff]  ;;  %p584_p6 = scmp.ne.s32.totalorder %s655_s15, 1 }
  0x18   : > { %598 = vmatpush3.bf16.msra.mxu0 %v636_v1  ;;  %v327_v7 = vld [vmem:[#allocation2] sm:$0xff]  ;;  %v433_v20 = vld [vmem:[%s750_s3 + $0x8] sm:$0xff] (!%p584_p6) }
  0x19   : > { %599 = vmatprep.subr.bf16.mxu0 %v666_v2  ;;  %v585_v16 = vld [vmem:[%s749_s2] ss:$0 sm:$0xff] (!%p584_p6) }
  0x1a   : > { %v432_v17 = vld [vmem:[%s750_s3] sm:$0xff] (!%p584_p6) }
  0x1c   : > { %600 = vmatpush3.bf16.msra.mxu0 %v637_v3 }
  0x1d   : > { %601 = vmatprep.subr.bf16.mxu0 %v666_v2 }
  0x20   : > { %602 = vmatpush3.bf16.msra.mxu0 %v638_v4 }
  0x21   : > { %603 = vmatprep.subr.bf16.mxu0 %v666_v2 }
  0x24   : > { %604 = vmatpush3.bf16.msra.mxu0 %v639_v5 }
  0x27   : > { %606 = vmatmul.mubr.msk.bf16.vlgmr.msra.gmra.mrb[0].mxu0 %vm368_vm1, %v640_v6 }
  0xf9   : > { %420 = sbr.rel (%p584_p6) target bundleno = 268 (0x10c), region = 44 }
  0xfa   : > { %v406_v8 = vpop.f32.mrb[0].mxu0 }
  0xfb   : > { %v413_v10 = vadd.f32 %v406_v8, %v327_v7  ;;  %v607_v11 = vpop.f32.mrb[1].mxu0 }
  0xfc   : > { %v409_v12 = vpop.f32.mrb[2].mxu0 }
  0xfd   : > { %415 = vst [vmem:[#allocation2] sm:$0xff] %v413_v10  ;;  %v414_v13 = vadd.f32 %v409_v12, %v328_v9  ;;  %v608_v14 = vpop.f32.mrb[3].mxu0 }
  0xff   : > { %416 = vst [vmem:[#allocation2 + $0x8] sm:$0xff] %v414_v13 }
 0x104   : > { %v421_v15 = vld [vmem:[#allocation2] sm:$0xff] }
 0x105   : > { %v430_v18 = vadd.f32 %v585_v16, %v421_v15 }
 0x106   : > { %v422_v19 = vld [vmem:[#allocation2 + $0x8] sm:$0xff] }
 0x107   : > { %v431_v21 = vadd.f32 %v585_v16, %v422_v19  ;;  %v434_v22 = vadd.f32 %v432_v17, %v430_v18 }
 0x109   : > { %v435_v23 = vadd.f32 %v433_v20, %v431_v21  ;;  %436 = vst [vmem:[%s751_s4] sm:$0xff] %v434_v22 }
 0x10b   : > { %437 = vst [vmem:[%s751_s4 + $0x8] sm:$0xff] %v435_v23 }
 0x10c PF: > { %s14_s17 = sadd.s32 1, %s663_s17   ;;  %s752_s15 = smov %s659_s16 }
 0x10d   : > { %p11_p7 = scmp.ge.s32.totalorder %s14_s17, 4   ;;  %s753_s16 = smov %s755_s18 }
 0x10f   :  { %13 = sbr.rel (!%p11_p7) target bundleno = 2 (0x2), region = 83 }

// kernel: transformer_forward.21
= control target key start
LH: loop header
LB: loop body
LE: loop exit
PB: predicated region body
PF: predicated region fallthrough
CT: control target
= control target key end

     0   :  { %s787_s12 = smov 0   ;;  %s789_s13 = smov 0   ;;  %s869_s0 = inlined_call_operand.vmem [shape: bf16[6,2,8,64], index: 0, kind: input, shape index: {}, may-alias: {0,1,2}]   ;;  %s870_s1 = inlined_call_operand.vmem [shape: bf16[6,2,8,64], index: 1, kind: input, shape index: {}, may-alias: {0,1,2}]   ;;  %s871_s2 = inlined_call_operand.vmem [shape: bf16[6,2,8,64], index: 2, kind: input, shape index: {}, may-alias: {0,1,2}]   ;;  %s872_s3 = inlined_call_operand.vmem [shape: bf16[2,2,8,64], index: 3, kind: output, shape index: {}]  }
   0x1   :  { %s791_s14 = smov 0   ;;  %s793_s15 = smov 0  }
   0x2   :  { %s795_s16 = smov 0  }
   0x3 LB: > { %s35_s17 = sadd.s32 1, %s753_s14  ;;  %s39_s18 = sadd.s32 1, %s757_s15  ;;  %s761_s16 = sphi %s795_s16, %s13_s16   ;;  %s757_s15 = sphi %s793_s15, %s876_s15   ;;  %s753_s14 = sphi %s791_s14, %s875_s14   ;;  %s749_s13 = sphi %s789_s13, %s874_s13   ;;  %s745_s12 = sphi %s787_s12, %s873_s12  }
   0x4   : > { %p37_p0 = scmp.ge.s32.totalorder %s35_s17, 2  ;;  %p642_p1 = scmp.ge.s32.totalorder %s761_s16, 1 }
   0x5   : > { %p225_p2 = scmp.lt.s32.totalorder %s761_s16, 5 }
   0x6   : > { %s878_s17 = smov (%p37_p0, %s35_s17), 0  ;;  %s880_s18 = smov (!%p37_p0, %s39_s18), %s757_s15 }
   0x7   : > { %p226_p3 = pnand %p642_p1, %p225_p2  ;;  %p41_p4 = scmp.ge.s32.totalorder %s880_s18, 2 }
   0x8   : > { %p287_p5 = scmp.lt.s32.totalorder (!%p226_p3), %s749_s13, 1  ;;  %s296_s19 = sadd.s32 (!%p226_p3), 2, %s745_s12  ;;  %vm341_vm0 = vcmask (!%p226_p3), 523264   ;;  %v763_v0 = vmov (!%p226_p3), 0.0   ;;  %vm764_vm1 = vmmov (!%p226_p3), 0   ;;  %vm338_vm2 = vcmask (!%p226_p3), 7168  }
   0x9   : > { %s882_s18 = smov (%p41_p4, %s880_s18), 0  ;;  %229 = sbr.rel (%p226_p3) target bundleno = 828 (0x33c), region = 32 }
   0xa   : > { %659 = vmatprep.subr.bf16.mxu0 (!%p226_p3), %v763_v0  ;;  %p297_p6 = scmp.lt.s32.totalorder (!%p226_p3), %s296_s19, 5  ;;  %342 = vst.msk [vmem:[#allocation4] sm:$0xff] (!%p226_p3), %vm341_vm0, %v763_v0  ;;  %661 = vmatprep.mubr.msk.bf16.mxu0 (!%p226_p3), %vm764_vm1, %v763_v0  ;;  %p285_p7 = scmp.lt.s32.totalorder (!%p226_p3), %s745_s12, 5  ;;  %v765_v4 = vmov (!%p226_p3), -inf   ;;  %vm394_vm3 = vcmask (!%p226_p3), 64512   ;;  %v766_v10 = vmov (!%p226_p3), 0  }
   0xb   : > { %665 = vmatprep.subr.bf16.mxu1 (!%p226_p3), %v763_v0  ;;  %667 = vmatprep.mubr.msk.bf16.mxu1 (!%p226_p3), %vm764_vm1, %v763_v0  ;;  %339 = vst.msk [vmem:[#allocation2] sm:$0xff] (!%p226_p3), %vm338_vm2, %v765_v4  ;;  %340 = vst.msk [vmem:[#allocation3] sm:$0xff] (!%p226_p3), %vm338_vm2, %v763_v0  ;;  %s309_s6 = sadd.s32 (!%p226_p3), 4, %s745_s12  ;;  %vm429_vm4 = vcmask (!%p226_p3), 1043456   ;;  %p322_p9 = scmp.lt.s32.totalorder (!%p226_p3), %s745_s12, 1  ;;  %vm489_vm5 = vcmask (!%p226_p3), 519168  }
   0xc   : > { %715 = vset.pattern.permute.xlu0 (!%p226_p3), %v766_v10  ;;  %716 = vset.pattern.permute.xlu1 (!%p226_p3), %v766_v10  ;;  %p310_p8 = scmp.lt.s32.totalorder (!%p226_p3), %s309_s6, 5 }
  0x10   : > { %s884_s13 = smov (!%p287_p5, %s749_s13), 1  ;;  %s886_s19 = smov (!%p297_p6, %s296_s19), 5 }
  0x11   : > { %s286_s20 = scalar_select %p285_p7, %s745_s12, 5  ;;  %v418_v31 = vld [vmem:[#allocation4] sm:$0xff] }
  0x12   : > { %s645_s21 = sshll.u32 %s886_s19, 1  ;;  %v393_v11 = vld [vmem:[#allocation2] sm:$0xff]  ;;  %s888_s6 = smov (!%p310_p8, %s309_s6), 5  ;;  %v410_v25 = vld [vmem:[#allocation3] sm:$0xff] }
  0x13   : > { %s305_s22 = sadd.s32 %s645_s21, %s884_s13  ;;  %s643_s23 = sshll.u32 %s286_s20, 1 }
  0x14   : > { %s646_s24 = sshll.u32 %s305_s22, 2  ;;  %s293_s25 = sadd.s32 %s643_s23, %s884_s13 }
  0x15   : > { %s307_s28 = scalar_lea.vmem %s870_s1, %s646_s24  ;;  %s644_s29 = sshll.u32 %s293_s25, 2 }
  0x16   : > { %v344_v1 = vld [vmem:[%s307_s28] sm:$0xf]  ;;  %s295_s5 = scalar_lea.vmem %s869_s0, %s644_s29  ;;  %s647_s7 = sshll.u32 %s888_s6, 1 }
  0x17   : > { %v351_v2 = vsel %vm341_vm0, %v344_v1, 0  ;;  %v343_v3 = vld [vmem:[%s295_s5] sm:$0xf]  ;;  %s318_s8 = sadd.s32 %s647_s7, %s884_s13  ;;  %s890_s12 = smov (!%p322_p9, %s745_s12), 1 }
  0x18   : > { %660 = vmatpush3.bf16.xpose.msra.mxu0 %v351_v2  ;;  %s648_s9 = sshll.u32 %s318_s8, 2  ;;  %s649_s20 = sshll.u32 %s890_s12, 1 }
  0x19   : > { %s320_s19 = scalar_lea.vmem %s871_s2, %s648_s9  ;;  %s330_s21 = sadd.s32 %s649_s20, %s884_s13 }
  0x1a   : > { %v345_v15 = vld [vmem:[%s320_s19] sm:$0xf]  ;;  %s650_s22 = sshll.u32 %s330_s21, 2 }
  0x1b   : > { %v431_v16 = vsel %vm429_vm4, %v345_v15, 0  ;;  %s332_s25 = scalar_lea.vmem %s872_s3, %s650_s22 }
  0x1c   : > { %666 = vmatpush3.bf16.msra.mxu1 %v431_v16 }
  0x1f   : > { %662 = vmatmul.mubr.msk.bf16.vlgmr.msra.gmra.mrb[0].mxu0 %vm341_vm0, %v343_v3 }
  0xf2   : > { %v387_v5 = vpop.f32.mrb[0].mxu0 }
  0xf3   : > { %v663_v6 = vpop.f32.mrb[1].mxu0  ;;  %v395_v7 = vsel %vm394_vm3, %v387_v5, -inf }
  0xf4   : > { %396 = vmax.xlane.f32.xlu0 %v395_v7  ;;  %v390_v8 = vpop.f32.mrb[2].mxu0 }
  0xf5   : > { %v664_v9 = vpop.f32.mrb[3].mxu0 }
 0x181   : > { %v397_v12 = vpop.xlane.xlu0 %396 }
 0x182   : > { %v398_v13 = vmax.f32 %v393_v11, %v397_v12 }
 0x184   : > { %v399_v14 = vsub.f32 %v393_v11, %v398_v13  ;;  %475 = vst.msk [vmem:[#allocation2] sm:$0xff] %vm338_vm2, %v398_v13  ;;  %404 = vperm.xlu0 %715, %v398_v13  }
 0x186   : > { %v400_v23 = vmul.f32 1.442695, %v399_v14 }
 0x203   : > { %v405_v17 = vpop.permute.xlu0 %404 }
 0x204   : > { %v407_v18 = vsub.f32 %v387_v5, %v405_v17 }
 0x206   : > { %v408_v19 = vmul.f32 1.442695, %v407_v18 }
 0x208   : > { %717 = vpow2.f32 %v408_v19 }
 0x209   : > { %719 = vpow2.f32 %v400_v23 }
 0x212   : > { %v718_v20 = vpop.eup %717 }
 0x213   : > { %v412_v21 = vsel %vm394_vm3, %v718_v20, 0.0  ;;  %v425_v22 = vpack.c.bf16 %v718_v20, %v718_v20  ;;  %v720_v24 = vpop.eup %719 }
 0x214   : > { %413 = vadd.xlane.f32.xlu1 %v412_v21  ;;  %v411_v26 = vmul.f32 %v720_v24, %v410_v25 }
 0x215   : > { %668 = vmatmul.mubr.msk.bf16.vlgmr.msra.gmra.mrb[0].mxu1 %vm394_vm3, %v425_v22 }
 0x225   : > { %421 = vperm.xlu1 %716, %v720_v24  }
 0x2a1   : > { %v414_v27 = vpop.xlane.xlu1 %413 }
 0x2a2   : > { %v415_v28 = vadd.f32 %v414_v27, %v411_v26 }
 0x2a4   : > { %417 = vst.msk [vmem:[#allocation3] sm:$0xff] %vm338_vm2, %v415_v28 }
 0x2a5   : > { %v422_v32 = vpop.permute.xlu1 %421 }
 0x2a6   : > { %v424_v33 = vmul.f32 %v422_v32, %v418_v31 }
 0x2ab   : > { %v480_v29 = vld [vmem:[#allocation3] sm:$0xff] }
 0x2ac   : > { %721 = vrcp.f32 %v480_v29 }
 0x2b6   : > { %v722_v30 = vpop.eup %721 }
 0x2b7   : > { %484 = vperm.xlu1 %716, %v722_v30  }
 0x2e8   : > { %v467_v34 = vpop.f32.mrb[0].mxu1 }
 0x2e9   : > { %v473_v35 = vadd.f32 %v467_v34, %v424_v33  ;;  %v669_v36 = vpop.f32.mrb[1].mxu1 }
 0x2ea   : > { %v470_v37 = vpop.f32.mrb[2].mxu1 }
 0x2eb   : > { %474 = vst.msk [vmem:[#allocation4] sm:$0xff] %vm341_vm0, %v473_v35  ;;  %v670_v38 = vpop.f32.mrb[3].mxu1 }
 0x2f2   : > { %v479_v39 = vld [vmem:[#allocation4] sm:$0xff] }
 0x336   : > { %v485_v40 = vpop.permute.xlu1 %484 }
 0x337   : > { %v487_v41 = vmul.f32 %v485_v40, %v479_v39 }
 0x339   : > { %v488_v42 = vpack.c.bf16 %v487_v41, %v487_v41 }
 0x33b   : > { %490 = vst.msk [vmem:[%s332_s25] sm:$0xf] %vm489_vm5, %v488_v42 }
 0x33c PF: > { %s13_s16 = sadd.s32 1, %s761_s16   ;;  %s873_s12 = smov %s753_s14 }
 0x33d   : > { %p10_p10 = scmp.ge.s32.totalorder %s13_s16, 6   ;;  %s874_s13 = smov %s757_s15 }
 0x33e   : > { %s875_s14 = smov %s878_s17  ;;  %s876_s15 = smov %s882_s18 }
 0x33f   :  { %12 = sbr.rel (!%p10_p10) target bundleno = 3 (0x3), region = 76 }

// kernel: transformer_forward.25
= control target key start
LH: loop header
LB: loop body
LE: loop exit
PB: predicated region body
PF: predicated region fallthrough
CT: control target
= control target key end

     0   :  { %s607_s9 = smov 0   ;;  %s609_s10 = smov 0   ;;  %s651_s0 = inlined_call_operand.vmem [shape: bf16[16,128], index: 0, kind: input, shape index: {}]   ;;  %s652_s1 = inlined_call_operand.vmem [shape: bf16[4,128,64], index: 1, kind: input, shape index: {}]   ;;  %s653_s2 = inlined_call_operand.vmem [shape: bf16[4,16,64], index: 2, kind: output, shape index: {}]  }
   0x1   :  { %s611_s11 = smov 0  }
   0x2 LB: > { %s31_s12 = sadd.s32 1, %s584_s10  ;;  %p480_p0 = scmp.ge.s32.totalorder %s588_s11, 1  ;;  %s588_s11 = sphi %s611_s11, %s12_s11   ;;  %s584_s10 = sphi %s609_s10, %s655_s10   ;;  %s580_s9 = sphi %s607_s9, %s654_s9  }
   0x3   : > { %p33_p1 = scmp.ge.s32.totalorder %s31_s12, 4  ;;  %p156_p2 = scmp.lt.s32.totalorder %s588_s11, 5 }
   0x5   : > { %s657_s12 = smov (%p33_p1, %s31_s12), 0  ;;  %p157_p3 = pnand %p480_p0, %p156_p2 }
   0x6   : > { %p204_p4 = scmp.lt.s32.totalorder (!%p157_p3), %s580_s9, 3  ;;  %v590_v0 = vmov (!%p157_p3), 0.0   ;;  %vm591_vm0 = vmmov (!%p157_p3), 0   ;;  %vm228_vm1 = vcmask (!%p157_p3), 523264   ;;  %v565_v9 = vld [vmem:[%s651_s0] sm:$0xff] (!%p157_p3)   ;;  %vm364_vm2 = vcmask (!%p157_p3), 519168  }
   0x7   : > { %160 = sbr.rel (%p157_p3) target bundleno = 276 (0x114), region = 28  ;;  %511 = vmatprep.subr.bf16.mxu0 (!%p157_p3), %v590_v0  ;;  %527 = vmatprep.mubr.msk.bf16.mxu0 (!%p157_p3), %vm591_vm0, %v590_v0  ;;  %229 = vst.msk [vmem:[#allocation2] sm:$0xff] (!%p157_p3), %vm228_vm1, %v590_v0  ;;  %230 = vst.msk [vmem:[#allocation2 + $0x8] sm:$0xff] (!%p157_p3), %vm228_vm1, %v590_v0 }
   0xe   : > { %s659_s9 = smov (!%p204_p4, %s580_s9), 3  ;;  %v231_v10 = vld [vmem:[#allocation2] sm:$0xff]  ;;  %v232_v12 = vld [vmem:[#allocation2 + $0x8] sm:$0xff] }
   0xf   : > { %s498_s13 = sshll.u32 %s659_s9, 6  ;;  %s499_s19 = sshll.u32 %s659_s9, 3 }
  0x10   : > { %s211_s16 = scalar_lea.vmem %s652_s1, %s498_s13  ;;  %s221_s22 = scalar_lea.vmem %s653_s2, %s499_s19 }
  0x11   : > { %v557_v1 = vld [vmem:[%s211_s16] sm:$0xff]   ;;  %v558_v2 = vld [vmem:[%s211_s16 + $0x8] sm:$0xff]   ;;  %v559_v3 = vld [vmem:[%s211_s16 + $0x10] sm:$0xff]  }
  0x12   : > { %512 = vmatpush3.bf16.msra.mxu0 %v557_v1  ;;  %v560_v4 = vld [vmem:[%s211_s16 + $0x18] sm:$0xff]   ;;  %v561_v5 = vld [vmem:[%s211_s16 + $0x20] sm:$0xff]   ;;  %v562_v6 = vld [vmem:[%s211_s16 + $0x28] sm:$0xff]  }
  0x13   : > { %513 = vmatprep.subr.bf16.mxu0 %v590_v0  ;;  %v563_v7 = vld [vmem:[%s211_s16 + $0x30] sm:$0xff]   ;;  %v564_v8 = vld [vmem:[%s211_s16 + $0x38] sm:$0xff]  }
  0x16   : > { %514 = vmatpush3.bf16.msra.mxu0 %v558_v2 }
  0x17   : > { %515 = vmatprep.subr.bf16.mxu0 %v590_v0 }
  0x1a   : > { %516 = vmatpush3.bf16.msra.mxu0 %v559_v3 }
  0x1b   : > { %517 = vmatprep.subr.bf16.mxu0 %v590_v0 }
  0x1e   : > { %518 = vmatpush3.bf16.msra.mxu0 %v560_v4 }
  0x1f   : > { %519 = vmatprep.subr.bf16.mxu0 %v590_v0 }
  0x22   : > { %520 = vmatpush3.bf16.msra.mxu0 %v561_v5 }
  0x23   : > { %521 = vmatprep.subr.bf16.mxu0 %v590_v0 }
  0x26   : > { %522 = vmatpush3.bf16.msra.mxu0 %v562_v6 }
  0x27   : > { %523 = vmatprep.subr.bf16.mxu0 %v590_v0 }
  0x2a   : > { %524 = vmatpush3.bf16.msra.mxu0 %v563_v7 }
  0x2b   : > { %525 = vmatprep.subr.bf16.mxu0 %v590_v0 }
  0x2e   : > { %526 = vmatpush3.bf16.msra.mxu0 %v564_v8 }
  0x31   : > { %528 = vmatmul.mubr.bf16.vlgmr.msra.gmra.mrb[0].mxu0 %v565_v9 }
 0x104   : > { %v339_v11 = vpop.f32.mrb[0].mxu0 }
 0x105   : > { %v346_v13 = vadd.f32 %v339_v11, %v231_v10  ;;  %v529_v14 = vpop.f32.mrb[1].mxu0 }
 0x106   : > { %v342_v15 = vpop.f32.mrb[2].mxu0 }
 0x107   : > { %349 = vst.msk [vmem:[#allocation2] sm:$0xff] %vm228_vm1, %v346_v13  ;;  %v347_v16 = vadd.f32 %v342_v15, %v232_v12  ;;  %v530_v17 = vpop.f32.mrb[3].mxu0 }
 0x109   : > { %350 = vst.msk [vmem:[#allocation2 + $0x8] sm:$0xff] %vm228_vm1, %v347_v16 }
 0x10e   : > { %v354_v18 = vld [vmem:[#allocation2] sm:$0xff] }
 0x10f   : > { %v500_v19 = vpack.c.bf16 %v354_v18, %v354_v18 }
 0x110   : > { %v355_v20 = vld [vmem:[#allocation2 + $0x8] sm:$0xff] }
 0x111   : > { %365 = vst.msk [vmem:[%s221_s22] sm:$0xf] %vm364_vm2, %v500_v19  ;;  %v501_v21 = vpack.c.bf16 %v355_v20, %v355_v20 }
 0x113   : > { %366 = vst.msk [vmem:[%s221_s22 + $0x4] sm:$0xf] %vm364_vm2, %v501_v21 }
 0x114 PF: > { %s12_s11 = sadd.s32 1, %s588_s11   ;;  %s654_s9 = smov %s584_s10 }
 0x115   : > { %p9_p5 = scmp.ge.s32.totalorder %s12_s11, 6   ;;  %s655_s10 = smov %s657_s12 }
 0x117   :  { %11 = sbr.rel (!%p9_p5) target bundleno = 2 (0x2), region = 69 }

// kernel: transformer_forward.24
= control target key start
LH: loop header
LB: loop body
LE: loop exit
PB: predicated region body
PF: predicated region fallthrough
CT: control target
= control target key end

     0   :  { %s607_s9 = smov 0   ;;  %s609_s10 = smov 0   ;;  %s651_s0 = inlined_call_operand.vmem [shape: bf16[16,128], index: 0, kind: input, shape index: {}]   ;;  %s652_s1 = inlined_call_operand.vmem [shape: bf16[2,128,64], index: 1, kind: input, shape index: {}]   ;;  %s653_s2 = inlined_call_operand.vmem [shape: bf16[2,16,64], index: 2, kind: output, shape index: {}]  }
   0x1   :  { %s611_s11 = smov 0  }
   0x2 LB: > { %s31_s12 = sadd.s32 1, %s584_s10  ;;  %p480_p0 = scmp.ge.s32.totalorder %s588_s11, 1  ;;  %s588_s11 = sphi %s611_s11, %s12_s11   ;;  %s584_s10 = sphi %s609_s10, %s655_s10   ;;  %s580_s9 = sphi %s607_s9, %s654_s9  }
   0x3   : > { %p33_p1 = scmp.ge.s32.totalorder %s31_s12, 2  ;;  %p156_p2 = scmp.lt.s32.totalorder %s588_s11, 3 }
   0x5   : > { %s657_s12 = smov (%p33_p1, %s31_s12), 0  ;;  %p157_p3 = pnand %p480_p0, %p156_p2 }
   0x6   : > { %p204_p4 = scmp.lt.s32.totalorder (!%p157_p3), %s580_s9, 1  ;;  %v590_v0 = vmov (!%p157_p3), 0.0   ;;  %vm591_vm0 = vmmov (!%p157_p3), 0   ;;  %vm228_vm1 = vcmask (!%p157_p3), 523264   ;;  %v565_v9 = vld [vmem:[%s651_s0] sm:$0xff] (!%p157_p3)   ;;  %vm364_vm2 = vcmask (!%p157_p3), 519168  }
   0x7   : > { %160 = sbr.rel (%p157_p3) target bundleno = 276 (0x114), region = 28  ;;  %511 = vmatprep.subr.bf16.mxu0 (!%p157_p3), %v590_v0  ;;  %527 = vmatprep.mubr.msk.bf16.mxu0 (!%p157_p3), %vm591_vm0, %v590_v0  ;;  %229 = vst.msk [vmem:[#allocation2] sm:$0xff] (!%p157_p3), %vm228_vm1, %v590_v0  ;;  %230 = vst.msk [vmem:[#allocation2 + $0x8] sm:$0xff] (!%p157_p3), %vm228_vm1, %v590_v0 }
   0xe   : > { %s659_s9 = smov (!%p204_p4, %s580_s9), 1  ;;  %v231_v10 = vld [vmem:[#allocation2] sm:$0xff]  ;;  %v232_v12 = vld [vmem:[#allocation2 + $0x8] sm:$0xff] }
   0xf   : > { %s498_s13 = sshll.u32 %s659_s9, 6  ;;  %s499_s19 = sshll.u32 %s659_s9, 3 }
  0x10   : > { %s211_s16 = scalar_lea.vmem %s652_s1, %s498_s13  ;;  %s221_s22 = scalar_lea.vmem %s653_s2, %s499_s19 }
  0x11   : > { %v557_v1 = vld [vmem:[%s211_s16] sm:$0xff]   ;;  %v558_v2 = vld [vmem:[%s211_s16 + $0x8] sm:$0xff]   ;;  %v559_v3 = vld [vmem:[%s211_s16 + $0x10] sm:$0xff]  }
  0x12   : > { %512 = vmatpush3.bf16.msra.mxu0 %v557_v1  ;;  %v560_v4 = vld [vmem:[%s211_s16 + $0x18] sm:$0xff]   ;;  %v561_v5 = vld [vmem:[%s211_s16 + $0x20] sm:$0xff]   ;;  %v562_v6 = vld [vmem:[%s211_s16 + $0x28] sm:$0xff]  }
  0x13   : > { %513 = vmatprep.subr.bf16.mxu0 %v590_v0  ;;  %v563_v7 = vld [vmem:[%s211_s16 + $0x30] sm:$0xff]   ;;  %v564_v8 = vld [vmem:[%s211_s16 + $0x38] sm:$0xff]  }
  0x16   : > { %514 = vmatpush3.bf16.msra.mxu0 %v558_v2 }
  0x17   : > { %515 = vmatprep.subr.bf16.mxu0 %v590_v0 }
  0x1a   : > { %516 = vmatpush3.bf16.msra.mxu0 %v559_v3 }
  0x1b   : > { %517 = vmatprep.subr.bf16.mxu0 %v590_v0 }
  0x1e   : > { %518 = vmatpush3.bf16.msra.mxu0 %v560_v4 }
  0x1f   : > { %519 = vmatprep.subr.bf16.mxu0 %v590_v0 }
  0x22   : > { %520 = vmatpush3.bf16.msra.mxu0 %v561_v5 }
  0x23   : > { %521 = vmatprep.subr.bf16.mxu0 %v590_v0 }
  0x26   : > { %522 = vmatpush3.bf16.msra.mxu0 %v562_v6 }
  0x27   : > { %523 = vmatprep.subr.bf16.mxu0 %v590_v0 }
  0x2a   : > { %524 = vmatpush3.bf16.msra.mxu0 %v563_v7 }
  0x2b   : > { %525 = vmatprep.subr.bf16.mxu0 %v590_v0 }
  0x2e   : > { %526 = vmatpush3.bf16.msra.mxu0 %v564_v8 }
  0x31   : > { %528 = vmatmul.mubr.bf16.vlgmr.msra.gmra.mrb[0].mxu0 %v565_v9 }
 0x104   : > { %v339_v11 = vpop.f32.mrb[0].mxu0 }
 0x105   : > { %v346_v13 = vadd.f32 %v339_v11, %v231_v10  ;;  %v529_v14 = vpop.f32.mrb[1].mxu0 }
 0x106   : > { %v342_v15 = vpop.f32.mrb[2].mxu0 }
 0x107   : > { %349 = vst.msk [vmem:[#allocation2] sm:$0xff] %vm228_vm1, %v346_v13  ;;  %v347_v16 = vadd.f32 %v342_v15, %v232_v12  ;;  %v530_v17 = vpop.f32.mrb[3].mxu0 }
 0x109   : > { %350 = vst.msk [vmem:[#allocation2 + $0x8] sm:$0xff] %vm228_vm1, %v347_v16 }
 0x10e   : > { %v354_v18 = vld [vmem:[#allocation2] sm:$0xff] }
 0x10f   : > { %v500_v19 = vpack.c.bf16 %v354_v18, %v354_v18 }
 0x110   : > { %v355_v20 = vld [vmem:[#allocation2 + $0x8] sm:$0xff] }
 0x111   : > { %365 = vst.msk [vmem:[%s221_s22] sm:$0xf] %vm364_vm2, %v500_v19  ;;  %v501_v21 = vpack.c.bf16 %v355_v20, %v355_v20 }
 0x113   : > { %366 = vst.msk [vmem:[%s221_s22 + $0x4] sm:$0xf] %vm364_vm2, %v501_v21 }
 0x114 PF: > { %s12_s11 = sadd.s32 1, %s588_s11   ;;  %s654_s9 = smov %s584_s10 }
 0x115   : > { %p9_p5 = scmp.ge.s32.totalorder %s12_s11, 4   ;;  %s655_s10 = smov %s657_s12 }
 0x117   :  { %11 = sbr.rel (!%p9_p5) target bundleno = 2 (0x2), region = 69 }

// kernel: transformer_forward.26
= control target key start
LH: loop header
LB: loop body
LE: loop exit
PB: predicated region body
PF: predicated region fallthrough
CT: control target
= control target key end

     0   :  { %s780_s12 = smov 0   ;;  %s782_s13 = smov 0   ;;  %s867_s0 = inlined_call_operand.vmem [shape: bf16[2,2,8,64], index: 0, kind: input, shape index: {}]   ;;  %s868_s1 = inlined_call_operand.vmem [shape: bf16[4,2,8,64], index: 1, kind: input, shape index: {}, may-alias: {1,2}]   ;;  %s869_s2 = inlined_call_operand.vmem [shape: bf16[4,2,8,64], index: 2, kind: input, shape index: {}, may-alias: {1,2}]   ;;  %s870_s3 = inlined_call_operand.vmem [shape: bf16[2,2,8,64], index: 3, kind: output, shape index: {}]  }
   0x1   :  { %s784_s14 = smov 0   ;;  %s786_s15 = smov 0  }
   0x2   :  { %s788_s16 = smov 0  }
   0x3 LB: > { %s35_s17 = sadd.s32 1, %s746_s14  ;;  %s39_s18 = sadd.s32 1, %s750_s15  ;;  %s754_s16 = sphi %s788_s16, %s13_s16   ;;  %s750_s15 = sphi %s786_s15, %s874_s15   ;;  %s746_s14 = sphi %s784_s14, %s873_s14   ;;  %s742_s13 = sphi %s782_s13, %s872_s13   ;;  %s738_s12 = sphi %s780_s12, %s871_s12  }
   0x4   : > { %p37_p0 = scmp.ge.s32.totalorder %s35_s17, 2  ;;  %p635_p1 = scmp.ge.s32.totalorder %s754_s16, 1 }
   0x5   : > { %p221_p2 = scmp.lt.s32.totalorder %s754_s16, 5 }
   0x6   : > { %s876_s17 = smov (%p37_p0, %s35_s17), 0  ;;  %s878_s18 = smov (!%p37_p0, %s39_s18), %s750_s15 }
   0x7   : > { %p222_p3 = pnand %p635_p1, %p221_p2  ;;  %p41_p4 = scmp.ge.s32.totalorder %s878_s18, 2 }
   0x8   : > { %p282_p5 = scmp.lt.s32.totalorder (!%p222_p3), %s742_s13, 1  ;;  %p291_p6 = scmp.lt.s32.totalorder (!%p222_p3), %s738_s12, 3  ;;  %vm334_vm0 = vcmask (!%p222_p3), 523264   ;;  %v756_v0 = vmov (!%p222_p3), 0.0   ;;  %vm757_vm1 = vmmov (!%p222_p3), 0   ;;  %vm331_vm2 = vcmask (!%p222_p3), 7168  }
   0x9   : > { %s880_s18 = smov (%p41_p4, %s878_s18), 0  ;;  %225 = sbr.rel (%p222_p3) target bundleno = 829 (0x33d), region = 32 }
   0xa   : > { %652 = vmatprep.subr.bf16.mxu0 (!%p222_p3), %v756_v0  ;;  %335 = vst.msk [vmem:[#allocation4] sm:$0xff] (!%p222_p3), %vm334_vm0, %v756_v0  ;;  %654 = vmatprep.mubr.msk.bf16.mxu0 (!%p222_p3), %vm757_vm1, %v756_v0  ;;  %p280_p7 = scmp.lt.s32.totalorder (!%p222_p3), %s738_s12, 1  ;;  %v758_v4 = vmov (!%p222_p3), -inf   ;;  %vm387_vm3 = vcmask (!%p222_p3), 64512   ;;  %v759_v10 = vmov (!%p222_p3), 0   ;;  %s302_s6 = sadd.s32 (!%p222_p3), 2, %s738_s12 }
   0xb   : > { %658 = vmatprep.subr.bf16.mxu1 (!%p222_p3), %v756_v0  ;;  %660 = vmatprep.mubr.msk.bf16.mxu1 (!%p222_p3), %vm757_vm1, %v756_v0  ;;  %332 = vst.msk [vmem:[#allocation2] sm:$0xff] (!%p222_p3), %vm331_vm2, %v758_v4  ;;  %333 = vst.msk [vmem:[#allocation3] sm:$0xff] (!%p222_p3), %vm331_vm2, %v756_v0  ;;  %p303_p8 = scmp.lt.s32.totalorder (!%p222_p3), %s302_s6, 3  ;;  %vm422_vm4 = vcmask (!%p222_p3), 1043456   ;;  %vm482_vm5 = vcmask (!%p222_p3), 519168  }
   0xc   : > { %708 = vset.pattern.permute.xlu0 (!%p222_p3), %v759_v10  ;;  %709 = vset.pattern.permute.xlu1 (!%p222_p3), %v759_v10 }
  0x10   : > { %s882_s13 = smov (!%p282_p5, %s742_s13), 1  ;;  %s884_s6 = smov (!%p303_p8, %s302_s6), 3 }
  0x11   : > { %s292_s19 = scalar_select %p291_p6, %s738_s12, 3  ;;  %v411_v31 = vld [vmem:[#allocation4] sm:$0xff] }
  0x12   : > { %s281_s20 = scalar_select %p280_p7, %s738_s12, 1  ;;  %v386_v11 = vld [vmem:[#allocation2] sm:$0xff]  ;;  %v403_v25 = vld [vmem:[#allocation3] sm:$0xff] }
  0x13   : > { %s638_s21 = sshll.u32 %s292_s19, 1  ;;  %s640_s7 = sshll.u32 %s884_s6, 1 }
  0x14   : > { %s299_s22 = sadd.s32 %s638_s21, %s882_s13  ;;  %s636_s23 = sshll.u32 %s281_s20, 1 }
  0x15   : > { %s639_s24 = sshll.u32 %s299_s22, 2  ;;  %s821_s25 = sadd.s32 %s636_s23, %s882_s13 }
  0x16   : > { %s301_s28 = scalar_lea.vmem %s868_s1, %s639_s24  ;;  %s637_s29 = sshll.u32 %s821_s25, 2 }
  0x17   : > { %v337_v1 = vld [vmem:[%s301_s28] sm:$0xf]  ;;  %s290_s5 = scalar_lea.vmem %s867_s0, %s637_s29  ;;  %s311_s8 = sadd.s32 %s640_s7, %s882_s13 }
  0x18   : > { %v344_v2 = vsel %vm334_vm0, %v337_v1, 0  ;;  %v336_v3 = vld [vmem:[%s290_s5] sm:$0xf]  ;;  %s641_s9 = sshll.u32 %s311_s8, 2  ;;  %s325_s20 = scalar_lea.vmem %s870_s3, %s637_s29 }
  0x19   : > { %653 = vmatpush3.bf16.xpose.msra.mxu0 %v344_v2  ;;  %s313_s19 = scalar_lea.vmem %s869_s2, %s641_s9 }
  0x1a   : > { %v338_v15 = vld [vmem:[%s313_s19] sm:$0xf] }
  0x1b   : > { %v424_v16 = vsel %vm422_vm4, %v338_v15, 0 }
  0x1c   : > { %659 = vmatpush3.bf16.msra.mxu1 %v424_v16 }
  0x20   : > { %655 = vmatmul.mubr.msk.bf16.vlgmr.msra.gmra.mrb[0].mxu0 %vm334_vm0, %v336_v3 }
  0xf3   : > { %v380_v5 = vpop.f32.mrb[0].mxu0 }
  0xf4   : > { %v656_v6 = vpop.f32.mrb[1].mxu0  ;;  %v388_v7 = vsel %vm387_vm3, %v380_v5, -inf }
  0xf5   : > { %389 = vmax.xlane.f32.xlu0 %v388_v7  ;;  %v383_v8 = vpop.f32.mrb[2].mxu0 }
  0xf6   : > { %v657_v9 = vpop.f32.mrb[3].mxu0 }
 0x182   : > { %v390_v12 = vpop.xlane.xlu0 %389 }
 0x183   : > { %v391_v13 = vmax.f32 %v386_v11, %v390_v12 }
 0x185   : > { %v392_v14 = vsub.f32 %v386_v11, %v391_v13  ;;  %468 = vst.msk [vmem:[#allocation2] sm:$0xff] %vm331_vm2, %v391_v13  ;;  %397 = vperm.xlu0 %708, %v391_v13  }
 0x187   : > { %v393_v23 = vmul.f32 1.442695, %v392_v14 }
 0x204   : > { %v398_v17 = vpop.permute.xlu0 %397 }
 0x205   : > { %v400_v18 = vsub.f32 %v380_v5, %v398_v17 }
 0x207   : > { %v401_v19 = vmul.f32 1.442695, %v400_v18 }
 0x209   : > { %710 = vpow2.f32 %v401_v19 }
 0x20a   : > { %712 = vpow2.f32 %v393_v23 }
 0x213   : > { %v711_v20 = vpop.eup %710 }
 0x214   : > { %v405_v21 = vsel %vm387_vm3, %v711_v20, 0.0  ;;  %v418_v22 = vpack.c.bf16 %v711_v20, %v711_v20  ;;  %v713_v24 = vpop.eup %712 }
 0x215   : > { %406 = vadd.xlane.f32.xlu1 %v405_v21  ;;  %v404_v26 = vmul.f32 %v713_v24, %v403_v25 }
 0x216   : > { %661 = vmatmul.mubr.msk.bf16.vlgmr.msra.gmra.mrb[0].mxu1 %vm387_vm3, %v418_v22 }
 0x226   : > { %414 = vperm.xlu1 %709, %v713_v24  }
 0x2a2   : > { %v407_v27 = vpop.xlane.xlu1 %406 }
 0x2a3   : > { %v408_v28 = vadd.f32 %v407_v27, %v404_v26 }
 0x2a5   : > { %410 = vst.msk [vmem:[#allocation3] sm:$0xff] %vm331_vm2, %v408_v28 }
 0x2a6   : > { %v415_v32 = vpop.permute.xlu1 %414 }
 0x2a7   : > { %v417_v33 = vmul.f32 %v415_v32, %v411_v31 }
 0x2ac   : > { %v473_v29 = vld [vmem:[#allocation3] sm:$0xff] }
 0x2ad   : > { %714 = vrcp.f32 %v473_v29 }
 0x2b7   : > { %v715_v30 = vpop.eup %714 }
 0x2b8   : > { %477 = vperm.xlu1 %709, %v715_v30  }
 0x2e9   : > { %v460_v34 = vpop.f32.mrb[0].mxu1 }
 0x2ea   : > { %v466_v35 = vadd.f32 %v460_v34, %v417_v33  ;;  %v662_v36 = vpop.f32.mrb[1].mxu1 }
 0x2eb   : > { %v463_v37 = vpop.f32.mrb[2].mxu1 }
 0x2ec   : > { %467 = vst.msk [vmem:[#allocation4] sm:$0xff] %vm334_vm0, %v466_v35  ;;  %v663_v38 = vpop.f32.mrb[3].mxu1 }
 0x2f3   : > { %v472_v39 = vld [vmem:[#allocation4] sm:$0xff] }
 0x337   : > { %v478_v40 = vpop.permute.xlu1 %477 }
 0x338   : > { %v480_v41 = vmul.f32 %v478_v40, %v472_v39 }
 0x33a   : > { %v481_v42 = vpack.c.bf16 %v480_v41, %v480_v41 }
 0x33c   : > { %483 = vst.msk [vmem:[%s325_s20] sm:$0xf] %vm482_vm5, %v481_v42 }
 0x33d PF: > { %s13_s16 = sadd.s32 1, %s754_s16   ;;  %s871_s12 = smov %s746_s14 }
 0x33e   : > { %p10_p9 = scmp.ge.s32.totalorder %s13_s16, 6   ;;  %s872_s13 = smov %s750_s15 }
 0x33f   : > { %s873_s14 = smov %s876_s17  ;;  %s874_s15 = smov %s880_s18 }
 0x340   :  { %12 = sbr.rel (!%p10_p9) target bundleno = 3 (0x3), region = 76 }

// kernel: transformer_forward.29
= control target key start
LH: loop header
LB: loop body
LE: loop exit
PB: predicated region body
PF: predicated region fallthrough
CT: control target
= control target key end

     0   :  { %s1368_s18 = smov 0   ;;  %s1370_s19 = smov 0   ;;  %s1543_s0 = inlined_call_operand.vmem [shape: bf16[16,128], index: 0, kind: input, shape index: {}]   ;;  %s1544_s1 = inlined_call_operand.vmem [shape: bf16[128,512], index: 1, kind: input, shape index: {}]   ;;  %s1545_s2 = inlined_call_operand.vmem [shape: bf16[128,512], index: 2, kind: input, shape index: {}]   ;;  %s1546_s3 = inlined_call_operand.vmem [shape: f32[1,512], index: 3, kind: input, shape index: {}]   ;;  %s1547_s4 = inlined_call_operand.vmem [shape: f32[1,512], index: 4, kind: input, shape index: {}]   ;;  %s1548_s5 = inlined_call_operand.vmem [shape: bf16[16,512], index: 5, kind: output, shape index: {}]  }
   0x1   :  { %s1372_s20 = smov 0   ;;  %s1374_s21 = smov 0  }
   0x2   :  { %s1376_s22 = smov 0  }
   0x3 LB: > { %s30_s23 = sadd.s32 1, %s1331_s21  ;;  %s1137_s24 = sadd.s32 4294967295, %s1335_s22   ;;  %s1335_s22 = sphi %s1376_s22, %s15_s22   ;;  %s1331_s21 = sphi %s1374_s21, %s1554_s21   ;;  %s1327_s20 = sphi %s1372_s20, %s1553_s20   ;;  %s1323_s19 = sphi %s1370_s19, %s1552_s19   ;;  %s1319_s18 = sphi %s1368_s18, %s1551_s18  }
   0x4   : > { %p32_p0 = scmp.ge.s32.totalorder %s30_s23, 2  ;;  %p78_p1 = scmp.ne.s32.totalorder %s1323_s19, %s1319_s18 }
   0x5   : > { %p79_p2 = scmp.eq.s32.totalorder %s1335_s22, 0  ;;  %p190_p4 = scmp.eq.s32.totalorder %s1137_s24, 1 }
   0x6   : > { %s1556_s23 = smov (%p32_p0, %s30_s23), 0  ;;  %s71_s27 = sadd.s32 1, %s1323_s19 }
   0x7   : > { %p1400_p3 = por %p79_p2, %p78_p1  ;;  %s67_s26 = ssub.s32 %s1331_s21, %s1556_s23 }
   0x8   : > { %p69_p5 = scmp.eq.s32.totalorder %s67_s26, 0  ;;  %p1407_p6 = por %p190_p4, %p78_p1 }
   0x9   : > { %p1141_p7 = scmp.ge.s32.totalorder %s1335_s22, 2 }
   0xa   : > { %s1412_s29 = scalar_select %p69_p5, %s1323_s19, %s71_s27  }
   0xb   : > { %224 = sbr.rel (%p1141_p7) target bundleno = 42 (0x2a), region = 20 }
  0x12   : > { %227 = sbr.rel (!%p1400_p3) target bundleno = 30 (0x1e), region = 24  ;;  %s229_s30 = sand.u32 (%p1400_p3), 1, %s1323_s19  }
  0x13   : > { %s1194_s6 = sshll.u32 (%p1400_p3), %s1331_s21, 3  ;;  %s1142_s7 = sshll.u32 (%p1400_p3), %s229_s30, 7 }
  0x14   : > { %s1422_s10 = scalar_lea.vmem (%p1400_p3), %s1544_s1, %s1194_s6  ;;  %s231_s11 = scalar_lea.vmem (%p1400_p3), [#allocation4], %s1142_s7 }
  0x15   : > { %v295_v0 = vld [vmem:[%s1422_s10] sm:$0xff] (%p1400_p3)  ;;  %v297_v1 = vld [vmem:[%s1422_s10 + $0x10] sm:$0xff] (%p1400_p3) }
  0x16   : > { %v299_v2 = vld [vmem:[%s1422_s10 + $0x20] sm:$0xff] (%p1400_p3)  ;;  %296 = vst [vmem:[%s231_s11] sm:$0xff] (%p1400_p3), %v295_v0  ;;  %298 = vst [vmem:[%s231_s11 + $0x8] sm:$0xff] (%p1400_p3), %v297_v1  ;;  %v301_v3 = vld [vmem:[%s1422_s10 + $0x30] sm:$0xff] (%p1400_p3) }
  0x17   : > { %300 = vst [vmem:[%s231_s11 + $0x10] sm:$0xff] (%p1400_p3), %v299_v2  ;;  %v303_v4 = vld [vmem:[%s1422_s10 + $0x40] sm:$0xff] (%p1400_p3)  ;;  %v305_v5 = vld [vmem:[%s1422_s10 + $0x50] sm:$0xff] (%p1400_p3)  ;;  %302 = vst [vmem:[%s231_s11 + $0x18] sm:$0xff] (%p1400_p3), %v301_v3 }
  0x18   : > { %304 = vst [vmem:[%s231_s11 + $0x20] sm:$0xff] (%p1400_p3), %v303_v4  ;;  %306 = vst [vmem:[%s231_s11 + $0x28] sm:$0xff] (%p1400_p3), %v305_v5  ;;  %v307_v6 = vld [vmem:[%s1422_s10 + $0x60] sm:$0xff] (%p1400_p3)  ;;  %v309_v7 = vld [vmem:[%s1422_s10 + $0x70] sm:$0xff] (%p1400_p3) }
  0x19   : > { %v311_v8 = vld [vmem:[%s1422_s10 + $0x80] sm:$0xff]  ;;  %308 = vst [vmem:[%s231_s11 + $0x30] sm:$0xff] %v307_v6  ;;  %310 = vst [vmem:[%s231_s11 + $0x38] sm:$0xff] %v309_v7  ;;  %v313_v9 = vld [vmem:[%s1422_s10 + $0x90] sm:$0xff] }
  0x1a   : > { %312 = vst [vmem:[%s231_s11 + $0x40] sm:$0xff] %v311_v8  ;;  %v315_v10 = vld [vmem:[%s1422_s10 + $0xa0] sm:$0xff]  ;;  %v317_v11 = vld [vmem:[%s1422_s10 + $0xb0] sm:$0xff]  ;;  %314 = vst [vmem:[%s231_s11 + $0x48] sm:$0xff] %v313_v9 }
  0x1b   : > { %316 = vst [vmem:[%s231_s11 + $0x50] sm:$0xff] %v315_v10  ;;  %318 = vst [vmem:[%s231_s11 + $0x58] sm:$0xff] %v317_v11  ;;  %v319_v12 = vld [vmem:[%s1422_s10 + $0xc0] sm:$0xff]  ;;  %v321_v13 = vld [vmem:[%s1422_s10 + $0xd0] sm:$0xff] }
  0x1c   : > { %v323_v14 = vld [vmem:[%s1422_s10 + $0xe0] sm:$0xff]  ;;  %320 = vst [vmem:[%s231_s11 + $0x60] sm:$0xff] %v319_v12  ;;  %322 = vst [vmem:[%s231_s11 + $0x68] sm:$0xff] %v321_v13  ;;  %v325_v15 = vld [vmem:[%s1422_s10 + $0xf0] sm:$0xff] }
  0x1d   : > { %324 = vst [vmem:[%s231_s11 + $0x70] sm:$0xff] %v323_v14  ;;  %326 = vst [vmem:[%s231_s11 + $0x78] sm:$0xff] %v325_v15 }
  0x1e PF: > { %332 = sbr.rel (!%p1400_p3) target bundleno = 42 (0x2a), region = 62  ;;  %s334_s12 = sand.u32 (%p1400_p3), 1, %s1323_s19  }
  0x1f   : > { %s1195_s13 = sshll.u32 (%p1400_p3), %s1331_s21, 3  ;;  %s1145_s14 = sshll.u32 (%p1400_p3), %s334_s12, 7 }
  0x20   : > { %s1447_s17 = scalar_lea.vmem (%p1400_p3), %s1545_s2, %s1195_s13  ;;  %s336_s24 = scalar_lea.vmem (%p1400_p3), [#allocation5], %s1145_s14 }
  0x21   : > { %v400_v16 = vld [vmem:[%s1447_s17] sm:$0xff] (%p1400_p3)  ;;  %v402_v17 = vld [vmem:[%s1447_s17 + $0x10] sm:$0xff] (%p1400_p3) }
  0x22   : > { %v404_v18 = vld [vmem:[%s1447_s17 + $0x20] sm:$0xff] (%p1400_p3)  ;;  %401 = vst [vmem:[%s336_s24] sm:$0xff] (%p1400_p3), %v400_v16  ;;  %403 = vst [vmem:[%s336_s24 + $0x8] sm:$0xff] (%p1400_p3), %v402_v17  ;;  %v406_v19 = vld [vmem:[%s1447_s17 + $0x30] sm:$0xff] (%p1400_p3) }
  0x23   : > { %405 = vst [vmem:[%s336_s24 + $0x10] sm:$0xff] (%p1400_p3), %v404_v18  ;;  %v408_v20 = vld [vmem:[%s1447_s17 + $0x40] sm:$0xff] (%p1400_p3)  ;;  %v410_v21 = vld [vmem:[%s1447_s17 + $0x50] sm:$0xff] (%p1400_p3)  ;;  %407 = vst [vmem:[%s336_s24 + $0x18] sm:$0xff] (%p1400_p3), %v406_v19 }
  0x24   : > { %409 = vst [vmem:[%s336_s24 + $0x20] sm:$0xff] (%p1400_p3), %v408_v20  ;;  %411 = vst [vmem:[%s336_s24 + $0x28] sm:$0xff] (%p1400_p3), %v410_v21  ;;  %v412_v22 = vld [vmem:[%s1447_s17 + $0x60] sm:$0xff] (%p1400_p3)  ;;  %v414_v23 = vld [vmem:[%s1447_s17 + $0x70] sm:$0xff] (%p1400_p3) }
  0x25   : > { %v416_v24 = vld [vmem:[%s1447_s17 + $0x80] sm:$0xff]  ;;  %413 = vst [vmem:[%s336_s24 + $0x30] sm:$0xff] %v412_v22  ;;  %415 = vst [vmem:[%s336_s24 + $0x38] sm:$0xff] %v414_v23  ;;  %v418_v25 = vld [vmem:[%s1447_s17 + $0x90] sm:$0xff] }
  0x26   : > { %417 = vst [vmem:[%s336_s24 + $0x40] sm:$0xff] %v416_v24  ;;  %v420_v26 = vld [vmem:[%s1447_s17 + $0xa0] sm:$0xff]  ;;  %v422_v27 = vld [vmem:[%s1447_s17 + $0xb0] sm:$0xff]  ;;  %419 = vst [vmem:[%s336_s24 + $0x48] sm:$0xff] %v418_v25 }
  0x27   : > { %421 = vst [vmem:[%s336_s24 + $0x50] sm:$0xff] %v420_v26  ;;  %423 = vst [vmem:[%s336_s24 + $0x58] sm:$0xff] %v422_v27  ;;  %v424_v28 = vld [vmem:[%s1447_s17 + $0xc0] sm:$0xff]  ;;  %v426_v29 = vld [vmem:[%s1447_s17 + $0xd0] sm:$0xff] }
  0x28   : > { %v428_v30 = vld [vmem:[%s1447_s17 + $0xe0] sm:$0xff]  ;;  %425 = vst [vmem:[%s336_s24 + $0x60] sm:$0xff] %v424_v28  ;;  %427 = vst [vmem:[%s336_s24 + $0x68] sm:$0xff] %v426_v29  ;;  %v430_v31 = vld [vmem:[%s1447_s17 + $0xf0] sm:$0xff] }
  0x29   : > { %429 = vst [vmem:[%s336_s24 + $0x70] sm:$0xff] %v428_v30  ;;  %431 = vst [vmem:[%s336_s24 + $0x78] sm:$0xff] %v430_v31 }
  0x2a PF: > { %p1148_p8 = scmp.ge.s32.totalorder %s1335_s22, 1  ;;  %p452_p9 = scmp.lt.s32.totalorder %s1335_s22, 3 }
  0x2c   : > { %p453_p10 = pnand %p1148_p8, %p452_p9 }
  0x2d   : > { %s459_s25 = sand.u32 (!%p453_p10), 1, %s1319_s18   ;;  %v1337_v32 = vmov (!%p453_p10), 0   ;;  %v1273_v62 = vld [vmem:[%s1543_s0] sm:$0xff] (!%p453_p10)   ;;  %s1152_s8 = sshll.u32 (!%p453_p10), %s1327_s20, 1  ;;  %v869_v2 = vlaneseq (!%p453_p10) }
  0x2e   : > { %456 = sbr.rel (%p453_p10) target bundleno = 336 (0x150), region = 108  ;;  %s1149_s26 = sshll.u32 (!%p453_p10), %s459_s25, 7  ;;  %841 = vmatprep.mubr.bf16.mxu1 (!%p453_p10), %v1337_v32  ;;  %690 = vmatprep.mubr.bf16.mxu0 (!%p453_p10), %v1337_v32 }
  0x2f   : > { %s1470_s27 = scalar_lea.vmem (!%p453_p10), [#allocation5], %s1149_s26  ;;  %s1479_s30 = scalar_lea.vmem (!%p453_p10), [#allocation4], %s1149_s26  ;;  %v870_v3 = vshrl.u32 (!%p453_p10), %v869_v2, 7 }
  0x30   : > { %v1240_v33 = vld [vmem:[%s1470_s27 + $0x4] ss:$8 sps:$4 sm:$0xff] (!%p453_p10)   ;;  %v1242_v34 = vld [vmem:[%s1470_s27] ss:$8 sps:$4 sm:$0xff] (!%p453_p10)   ;;  %v1243_v35 = vld [vmem:[%s1470_s27 + $0x14] ss:$8 sps:$4 sm:$0xff] (!%p453_p10)  }
  0x31   : > { %809 = vmatprep.subr.bf16.mxu1 (!%p453_p10), %v1240_v33  ;;  %v1245_v36 = vld [vmem:[%s1470_s27 + $0x10] ss:$8 sps:$4 sm:$0xff] (!%p453_p10)   ;;  %v1246_v37 = vld [vmem:[%s1470_s27 + $0x24] ss:$8 sps:$4 sm:$0xff] (!%p453_p10)   ;;  %v1248_v38 = vld [vmem:[%s1470_s27 + $0x20] ss:$8 sps:$4 sm:$0xff] (!%p453_p10)  }
  0x32   : > { %810 = vmatpush1.bf16.msra.mxu1 (!%p453_p10), %v1242_v34  ;;  %v1249_v39 = vld [vmem:[%s1470_s27 + $0x34] ss:$8 sps:$4 sm:$0xff] (!%p453_p10)   ;;  %v1258_v40 = vld [vmem:[%s1479_s30 + $0x4] ss:$8 sps:$4 sm:$0xff] (!%p453_p10)   ;;  %v1260_v41 = vld [vmem:[%s1479_s30] ss:$8 sps:$4 sm:$0xff] (!%p453_p10)  }
  0x33   : > { %811 = vmatprep.subr.bf16.mxu1 (!%p453_p10), %v1243_v35  ;;  %v1251_v42 = vld [vmem:[%s1470_s27 + $0x30] ss:$8 sps:$4 sm:$0xff] (!%p453_p10)   ;;  %658 = vmatprep.subr.bf16.mxu0 (!%p453_p10), %v1258_v40  ;;  %v1264_v43 = vld [vmem:[%s1479_s30 + $0x14] ss:$8 sps:$4 sm:$0xff] (!%p453_p10)   ;;  %v1252_v45 = vld [vmem:[%s1470_s27 + $0x44] ss:$8 sps:$4 sm:$0xff] (!%p453_p10)  }
  0x34   : > { %659 = vmatpush1.bf16.msra.mxu0 (!%p453_p10), %v1260_v41  ;;  %v1266_v44 = vld [vmem:[%s1479_s30 + $0x10] ss:$8 sps:$4 sm:$0xff] (!%p453_p10)   ;;  %v1254_v46 = vld [vmem:[%s1470_s27 + $0x40] ss:$8 sps:$4 sm:$0xff] (!%p453_p10)   ;;  %v1270_v47 = vld [vmem:[%s1479_s30 + $0x24] ss:$8 sps:$4 sm:$0xff] (!%p453_p10)  }
  0x35   : > { %660 = vmatprep.subr.bf16.mxu0 %v1264_v43  ;;  %v1255_v48 = vld [vmem:[%s1470_s27 + $0x54] ss:$8 sps:$4 sm:$0xff]   ;;  %v1272_v49 = vld [vmem:[%s1479_s30 + $0x20] ss:$8 sps:$4 sm:$0xff]   ;;  %v1257_v51 = vld [vmem:[%s1470_s27 + $0x50] ss:$8 sps:$4 sm:$0xff]  }
  0x36   : > { %812 = vmatpush1.bf16.msra.mxu1 %v1245_v36  ;;  %v1274_v50 = vld [vmem:[%s1479_s30 + $0x34] ss:$8 sps:$4 sm:$0xff]   ;;  %v1261_v52 = vld [vmem:[%s1470_s27 + $0x64] ss:$8 sps:$4 sm:$0xff]   ;;  %v1276_v53 = vld [vmem:[%s1479_s30 + $0x30] ss:$8 sps:$4 sm:$0xff]  }
  0x37   : > { %813 = vmatprep.subr.bf16.mxu1 %v1246_v37  ;;  %v1277_v54 = vld [vmem:[%s1479_s30 + $0x44] ss:$8 sps:$4 sm:$0xff]   ;;  %v1263_v55 = vld [vmem:[%s1470_s27 + $0x60] ss:$8 sps:$4 sm:$0xff]   ;;  %v1267_v57 = vld [vmem:[%s1470_s27 + $0x74] ss:$8 sps:$4 sm:$0xff]  }
  0x38   : > { %661 = vmatpush1.bf16.msra.mxu0 %v1266_v44  ;;  %v1279_v56 = vld [vmem:[%s1479_s30 + $0x40] ss:$8 sps:$4 sm:$0xff]   ;;  %v1280_v58 = vld [vmem:[%s1479_s30 + $0x54] ss:$8 sps:$4 sm:$0xff]   ;;  %v1269_v59 = vld [vmem:[%s1470_s27 + $0x70] ss:$8 sps:$4 sm:$0xff]  }
  0x39   : > { %662 = vmatprep.subr.bf16.mxu0 %v1270_v47  ;;  %v1282_v60 = vld [vmem:[%s1479_s30 + $0x50] ss:$8 sps:$4 sm:$0xff]   ;;  %v1283_v61 = vld [vmem:[%s1479_s30 + $0x64] ss:$8 sps:$4 sm:$0xff]   ;;  %v1285_v63 = vld [vmem:[%s1479_s30 + $0x60] ss:$8 sps:$4 sm:$0xff]  }
  0x3a   : > { %814 = vmatpush1.bf16.msra.mxu1 %v1248_v38  ;;  %v1286_v0 = vld [vmem:[%s1479_s30 + $0x74] ss:$8 sps:$4 sm:$0xff]   ;;  %v1288_v1 = vld [vmem:[%s1479_s30 + $0x70] ss:$8 sps:$4 sm:$0xff]   ;;  %p526_p11 = scmp.lt.s32.totalorder %s1152_s8, 3  ;;  %v871_v4 = vsub.s32 0, %v870_v3 }
  0x3b   : > { %815 = vmatprep.subr.bf16.mxu1 %v1249_v39  ;;  %v875_v6 = vsub.s32 1, %v870_v3  ;;  %s1151_s15 = sshll.u32 %s459_s25, 4  ;;  %s1198_s18 = sshll.u32 (%p1407_p6), %s1327_s20, 3 }
  0x3c   : > { %663 = vmatpush1.bf16.msra.mxu0 %v1272_v49  ;;  %s1558_s8 = smov (!%p526_p11, %s1152_s8), 3  ;;  %s511_s16 = scalar_lea.vmem [#allocation6], %s1151_s15 }
  0x3d   : > { %664 = vmatprep.subr.bf16.mxu0 %v1274_v50  ;;  %s533_s11 = scalar_lea.vmem %s1547_s4, %s1558_s8  ;;  %s528_s14 = scalar_lea.vmem %s1546_s3, %s1558_s8 }
  0x3e   : > { %816 = vmatpush1.bf16.msra.mxu1 %v1251_v42  ;;  %v887_v5 = vld [vmem:[%s533_s11] sm:$0x3]  ;;  %s969_s25 = scalar_lea.vmem (%p1407_p6), %s1548_s5, %s1198_s18 }
  0x3f   : > { %817 = vmatprep.subr.bf16.mxu1 %v1252_v45  ;;  %v892_v7 = vrot.slane %v887_v5, %v871_v4  ;;  %v896_v8 = vrot.slane %v887_v5, %v875_v6  ;;  %v867_v41 = vld [vmem:[%s528_s14] sm:$0x3] }
  0x40   : > { %665 = vmatpush1.bf16.msra.mxu0 %v1276_v53  ;;  %v872_v42 = vrot.slane %v867_v41, %v871_v4  ;;  %v876_v43 = vrot.slane %v867_v41, %v875_v6 }
  0x41   : > { %666 = vmatprep.subr.bf16.mxu0 %v1277_v54 }
  0x42   : > { %818 = vmatpush1.bf16.msra.mxu1 %v1254_v46 }
  0x43   : > { %819 = vmatprep.subr.bf16.mxu1 %v1255_v48 }
  0x44   : > { %667 = vmatpush1.bf16.msra.mxu0 %v1279_v56 }
  0x45   : > { %668 = vmatprep.subr.bf16.mxu0 %v1280_v58 }
  0x46   : > { %820 = vmatpush1.bf16.msra.mxu1 %v1257_v51 }
  0x47   : > { %821 = vmatprep.subr.bf16.mxu1 %v1261_v52 }
  0x48   : > { %669 = vmatpush1.bf16.msra.mxu0 %v1282_v60 }
  0x49   : > { %670 = vmatprep.subr.bf16.mxu0 %v1283_v61 }
  0x4a   : > { %822 = vmatpush1.bf16.msra.mxu1 %v1263_v55 }
  0x4b   : > { %823 = vmatprep.subr.bf16.mxu1 %v1267_v57 }
  0x4c   : > { %671 = vmatpush1.bf16.msra.mxu0 %v1285_v63 }
  0x4d   : > { %672 = vmatprep.subr.bf16.mxu0 %v1286_v0 }
  0x4e   : > { %824 = vmatpush1.bf16.msra.mxu1 %v1269_v59 }
  0x50   : > { %673 = vmatpush1.bf16.msra.mxu0 %v1288_v1 }
  0x51   : > { %842 = vmatmul.mubr.bf16.vlgmr.msra.gmra.mrb[0].mxu1 %v1273_v62 }
  0x53   : > { %691 = vmatmul.mubr.bf16.vlgmr.msra.gmra.mrb[0].mxu0 %v1273_v62 }
 0x124   : > { %v843_v9 = vpop.f32.mrb[0].mxu1 }
 0x125   : > { %v899_v10 = vadd.f32 %v892_v7, %v843_v9  ;;  %v845_v11 = vpop.f32.mrb[1].mxu1 }
 0x126   : > { %v900_v12 = vadd.f32 %v896_v8, %v845_v11  ;;  %v847_v13 = vpop.f32.mrb[2].mxu1  ;;  %v692_v26 = vpop.f32.mrb[0].mxu0 }
 0x127   : > { %v907_v14 = vmul.f32 0.044715, %v899_v10  ;;  %v901_v15 = vadd.f32 %v892_v7, %v847_v13  ;;  %v849_v16 = vpop.f32.mrb[3].mxu1  ;;  %v694_v29 = vpop.f32.mrb[1].mxu0  ;;  %v879_v46 = vadd.f32 %v872_v42, %v692_v26  ;;  %v903_v47 = vmul.f32 0.5, %v899_v10 }
 0x128   : > { %v908_v17 = vmul.f32 0.044715, %v900_v12  ;;  %v902_v18 = vadd.f32 %v896_v8, %v849_v16  ;;  %v696_v32 = vpop.f32.mrb[2].mxu0  ;;  %v880_v50 = vadd.f32 %v876_v43, %v694_v29  ;;  %v904_v51 = vmul.f32 0.5, %v900_v12 }
 0x129   : > { %v911_v19 = vmul.f32 %v907_v14, %v899_v10  ;;  %v909_v20 = vmul.f32 0.044715, %v901_v15  ;;  %v698_v36 = vpop.f32.mrb[3].mxu0  ;;  %v905_v55 = vmul.f32 0.5, %v901_v15  ;;  %v881_v61 = vadd.f32 %v872_v42, %v696_v32 }
 0x12a   : > { %v912_v21 = vmul.f32 %v908_v17, %v900_v12  ;;  %v910_v22 = vmul.f32 0.044715, %v902_v18  ;;  %v906_v58 = vmul.f32 0.5, %v902_v18  ;;  %v882_v0 = vadd.f32 %v876_v43, %v698_v36 }
 0x12b   : > { %v913_v23 = vmul.f32 %v909_v20, %v901_v15  ;;  %v915_v24 = vmul.f32 %v911_v19, %v899_v10 }
 0x12c   : > { %v914_v25 = vmul.f32 %v910_v22, %v902_v18  ;;  %v916_v27 = vmul.f32 %v912_v21, %v900_v12 }
 0x12d   : > { %v919_v28 = vadd.f32 %v915_v24, %v899_v10  ;;  %v917_v30 = vmul.f32 %v913_v23, %v901_v15 }
 0x12e   : > { %v920_v31 = vadd.f32 %v916_v27, %v900_v12  ;;  %v918_v33 = vmul.f32 %v914_v25, %v902_v18 }
 0x12f   : > { %v923_v34 = vmul.f32 0.7978846, %v919_v28  ;;  %v921_v35 = vadd.f32 %v917_v30, %v901_v15 }
 0x130   : > { %v924_v37 = vmul.f32 0.7978846, %v920_v31  ;;  %v922_v38 = vadd.f32 %v918_v33, %v902_v18 }
 0x131   : > { %1289 = vtanh.f32 %v923_v34  ;;  %v925_v39 = vmul.f32 0.7978846, %v921_v35 }
 0x132   : > { %1291 = vtanh.f32 %v924_v37  ;;  %v926_v40 = vmul.f32 0.7978846, %v922_v38 }
 0x133   : > { %1293 = vtanh.f32 %v925_v39 }
 0x134   : > { %1295 = vtanh.f32 %v926_v40 }
 0x13b   : > { %v1290_v44 = vpop.eup %1289 }
 0x13c   : > { %v1292_v45 = vpop.eup %1291  ;;  %v931_v48 = vadd.f32 1.0, %v1290_v44 }
 0x13d   : > { %v1294_v49 = vpop.eup %1293  ;;  %v932_v52 = vadd.f32 1.0, %v1292_v45 }
 0x13e   : > { %v1296_v53 = vpop.eup %1295  ;;  %v935_v54 = vmul.f32 %v931_v48, %v903_v47  ;;  %v933_v56 = vadd.f32 1.0, %v1294_v49 }
 0x13f   : > { %v936_v57 = vmul.f32 %v932_v52, %v904_v51  ;;  %v934_v59 = vadd.f32 1.0, %v1296_v53 }
 0x140   : > { %v939_v60 = vmul.f32 %v935_v54, %v879_v46  ;;  %v937_v62 = vmul.f32 %v933_v56, %v905_v55 }
 0x141   : > { %v940_v63 = vmul.f32 %v936_v57, %v880_v50  ;;  %v938_v1 = vmul.f32 %v934_v59, %v906_v58  ;;  %963 = sbr.rel (!%p1407_p6) target bundleno = 336 (0x150), region = 128 }
 0x142   : > { %v941_v2 = vmul.f32 %v937_v62, %v881_v61 }
 0x143   : > { %v1196_v3 = vpack.c.bf16 %v940_v63, %v939_v60  ;;  %v942_v4 = vmul.f32 %v938_v1, %v882_v0 }
 0x145   : > { %955 = vst [vmem:[%s511_s16] sm:$0xff] %v1196_v3  ;;  %v1197_v5 = vpack.c.bf16 %v942_v4, %v941_v2 }
 0x147   : > { %956 = vst [vmem:[%s511_s16 + $0x8] sm:$0xff] %v1197_v5 }
 0x14c   : > { %v999_v6 = vld [vmem:[%s511_s16] sm:$0xff] }
 0x14d   : > { %1000 = vst [vmem:[%s969_s25] sm:$0xff] %v999_v6 }
 0x14e   : > { %v1001_v7 = vld [vmem:[%s511_s16 + $0x8] sm:$0xff] }
 0x14f   : > { %1002 = vst [vmem:[%s969_s25 + $0x10] sm:$0xff] %v1001_v7 }
 0x150 PF: > { %s15_s22 = sadd.s32 1, %s1335_s22   ;;  %s1551_s18 = smov %s1323_s19 }
 0x151   : > { %p12_p12 = scmp.ge.s32.totalorder %s15_s22, 4   ;;  %s1552_s19 = smov %s1412_s29 }
 0x152   : > { %s1553_s20 = smov %s1331_s21  ;;  %s1554_s21 = smov %s1556_s23 }
 0x153   :  { %14 = sbr.rel (!%p12_p12) target bundleno = 3 (0x3), region = 214 }

// kernel: transformer_forward.30
= control target key start
LH: loop header
LB: loop body
LE: loop exit
PB: predicated region body
PF: predicated region fallthrough
CT: control target
= control target key end

     0   :  { %s683_s1 = inlined_call_operand.vmem [shape: bf16[512,128], index: 1, kind: input, shape index: {}]   ;;  %s684_s0 = inlined_call_operand.vmem [shape: bf16[16,512], index: 0, kind: input, shape index: {}]   ;;  %s685_s2 = inlined_call_operand.vmem [shape: f32[1,128], index: 2, kind: input, shape index: {}]   ;;  %s686_s3 = inlined_call_operand.vmem [shape: f32[16,128], index: 3, kind: input, shape index: {}]   ;;  %s687_s4 = inlined_call_operand.vmem [shape: f32[16,128], index: 4, kind: output, shape index: {}]  }
   0x1   :  { %v497_v0 = vld [vmem:[%s683_s1 + $0x40] sm:$0xff]   ;;  %v501_v4 = vld [vmem:[%s683_s1 + $0x48] sm:$0xff]   ;;  %v505_v8 = vld [vmem:[%s683_s1 + $0x50] sm:$0xff]  }
   0x2   :  { %v498_v1 = vld [vmem:[%s683_s1 + $0xc0] sm:$0xff]   ;;  %453 = vmatprep.subr.bf16.mxu0 %v497_v0  ;;  %v502_v5 = vld [vmem:[%s683_s1 + $0xc8] sm:$0xff]   ;;  %v506_v9 = vld [vmem:[%s683_s1 + $0xd0] sm:$0xff]  }
   0x3   :  { %v499_v2 = vld [vmem:[%s683_s1] sm:$0xff]   ;;  %475 = vmatprep.subr.bf16.mxu1 %v498_v1  ;;  %v503_v6 = vld [vmem:[%s683_s1 + $0x8] sm:$0xff]   ;;  %v507_v10 = vld [vmem:[%s683_s1 + $0x10] sm:$0xff]  }
   0x4   :  { %v500_v3 = vld [vmem:[%s683_s1 + $0x80] sm:$0xff]   ;;  %454 = vmatpush3.bf16.msra.mxu0 %v499_v2  ;;  %v504_v7 = vld [vmem:[%s683_s1 + $0x88] sm:$0xff]   ;;  %v508_v11 = vld [vmem:[%s683_s1 + $0x90] sm:$0xff]  }
   0x5   :  { %476 = vmatpush3.bf16.msra.mxu1 %v500_v3  ;;  %455 = vmatprep.subr.bf16.mxu0 %v501_v4  ;;  %v509_v12 = vld [vmem:[%s683_s1 + $0x58] sm:$0xff]   ;;  %v513_v16 = vld [vmem:[%s683_s1 + $0x60] sm:$0xff]   ;;  %v517_v20 = vld [vmem:[%s683_s1 + $0x68] sm:$0xff]  }
   0x6   :  { %477 = vmatprep.subr.bf16.mxu1 %v502_v5  ;;  %v510_v13 = vld [vmem:[%s683_s1 + $0xd8] sm:$0xff]   ;;  %v514_v17 = vld [vmem:[%s683_s1 + $0xe0] sm:$0xff]   ;;  %v518_v21 = vld [vmem:[%s683_s1 + $0xe8] sm:$0xff]  }
   0x7   :  { %v511_v14 = vld [vmem:[%s683_s1 + $0x18] sm:$0xff]   ;;  %v515_v18 = vld [vmem:[%s683_s1 + $0x20] sm:$0xff]   ;;  %v519_v22 = vld [vmem:[%s683_s1 + $0x28] sm:$0xff]  }
   0x8   :  { %456 = vmatpush3.bf16.msra.mxu0 %v503_v6  ;;  %v512_v15 = vld [vmem:[%s683_s1 + $0x98] sm:$0xff]   ;;  %v516_v19 = vld [vmem:[%s683_s1 + $0xa0] sm:$0xff]   ;;  %v520_v23 = vld [vmem:[%s683_s1 + $0xa8] sm:$0xff]  }
   0x9   :  { %478 = vmatpush3.bf16.msra.mxu1 %v504_v7  ;;  %457 = vmatprep.subr.bf16.mxu0 %v505_v8  ;;  %v521_v24 = vld [vmem:[%s683_s1 + $0x70] sm:$0xff]   ;;  %v525_v28 = vld [vmem:[%s683_s1 + $0x78] sm:$0xff]   ;;  %v452_v45 = vld [vmem:[%s685_s2] ss:$0 sm:$0xff] }
   0xa   :  { %479 = vmatprep.subr.bf16.mxu1 %v506_v9  ;;  %v522_v25 = vld [vmem:[%s683_s1 + $0xf0] sm:$0xff]   ;;  %v526_v29 = vld [vmem:[%s683_s1 + $0xf8] sm:$0xff]   ;;  %v406_v50 = vld [vmem:[%s686_s3] sm:$0xff] }
   0xb   :  { %v523_v26 = vld [vmem:[%s683_s1 + $0x30] sm:$0xff]   ;;  %v527_v30 = vld [vmem:[%s683_s1 + $0x38] sm:$0xff]   ;;  %v407_v53 = vld [vmem:[%s686_s3 + $0x8] sm:$0xff] }
   0xc   :  { %458 = vmatpush3.bf16.msra.mxu0 %v507_v10  ;;  %v524_v27 = vld [vmem:[%s683_s1 + $0xb0] sm:$0xff]   ;;  %v528_v31 = vld [vmem:[%s683_s1 + $0xb8] sm:$0xff]  }
   0xd   :  { %480 = vmatpush3.bf16.msra.mxu1 %v508_v11  ;;  %459 = vmatprep.subr.bf16.mxu0 %v509_v12  ;;  %v529_v32 = vld [vmem:[%s684_s0] ss:$16 sps:$4 sm:$0xff]   ;;  %v531_v33 = vld [vmem:[%s684_s0 + $0x4] ss:$16 sps:$4 sm:$0xff]   ;;  %v532_v34 = vld [vmem:[%s684_s0 + $0x8] ss:$16 sps:$4 sm:$0xff]  }
   0xe   :  { %481 = vmatprep.subr.bf16.mxu1 %v510_v13  ;;  %v534_v35 = vld [vmem:[%s684_s0 + $0xc] ss:$16 sps:$4 sm:$0xff]   ;;  %338 = vmatprep.mubr.bf16.mxu0 %v531_v33 }
   0xf   :  { %379 = vmatprep.mubr.bf16.mxu1 %v534_v35 }
  0x10   :  { %460 = vmatpush3.bf16.msra.mxu0 %v511_v14 }
  0x11   :  { %482 = vmatpush3.bf16.msra.mxu1 %v512_v15  ;;  %461 = vmatprep.subr.bf16.mxu0 %v513_v16 }
  0x12   :  { %483 = vmatprep.subr.bf16.mxu1 %v514_v17 }
  0x14   :  { %462 = vmatpush3.bf16.msra.mxu0 %v515_v18 }
  0x15   :  { %484 = vmatpush3.bf16.msra.mxu1 %v516_v19  ;;  %463 = vmatprep.subr.bf16.mxu0 %v517_v20 }
  0x16   :  { %485 = vmatprep.subr.bf16.mxu1 %v518_v21 }
  0x18   :  { %464 = vmatpush3.bf16.msra.mxu0 %v519_v22 }
  0x19   :  { %486 = vmatpush3.bf16.msra.mxu1 %v520_v23  ;;  %465 = vmatprep.subr.bf16.mxu0 %v521_v24 }
  0x1a   :  { %487 = vmatprep.subr.bf16.mxu1 %v522_v25 }
  0x1c   :  { %466 = vmatpush3.bf16.msra.mxu0 %v523_v26 }
  0x1d   :  { %488 = vmatpush3.bf16.msra.mxu1 %v524_v27  ;;  %467 = vmatprep.subr.bf16.mxu0 %v525_v28 }
  0x1e   :  { %489 = vmatprep.subr.bf16.mxu1 %v526_v29 }
  0x20   :  { %468 = vmatpush3.bf16.msra.mxu0 %v527_v30 }
  0x21   :  { %490 = vmatpush3.bf16.msra.mxu1 %v528_v31 }
  0x23   :  { %339 = vmatmul.mubr.bf16.vlgmr.msra.gmra.mrb[0].mxu0 %v529_v32 }
  0x24   :  { %380 = vmatmul.mubr.bf16.vlgmr.msra.gmra.mrb[0].mxu1 %v532_v34 }
  0xf6   :  { %v469_v36 = vpop.f32.mrb[0].mxu0 }
  0xf7   :  { %v491_v37 = vpop.f32.mrb[0].mxu1  ;;  %v470_v38 = vpop.f32.mrb[1].mxu0 }
  0xf8   :  { %v471_v39 = vadd.f32 %v470_v38, %v469_v36  ;;  %v492_v40 = vpop.f32.mrb[1].mxu1  ;;  %v472_v41 = vpop.f32.mrb[2].mxu0 }
  0xf9   :  { %v493_v42 = vadd.f32 %v492_v40, %v491_v37  ;;  %v494_v43 = vpop.f32.mrb[2].mxu1  ;;  %v473_v44 = vpop.f32.mrb[3].mxu0 }
  0xfa   :  { %v474_v46 = vadd.f32 %v473_v44, %v472_v41  ;;  %v495_v47 = vpop.f32.mrb[3].mxu1 }
  0xfb   :  { %v382_v48 = vadd.f32 %v493_v42, %v471_v39  ;;  %v496_v49 = vadd.f32 %v495_v47, %v494_v43 }
  0xfd   :  { %v404_v51 = vadd.f32 %v452_v45, %v382_v48  ;;  %v385_v52 = vadd.f32 %v496_v49, %v474_v46 }
  0xff   :  { %v408_v54 = vadd.f32 %v406_v50, %v404_v51  ;;  %v405_v55 = vadd.f32 %v452_v45, %v385_v52 }
 0x101   :  { %410 = vst [vmem:[%s687_s4] sm:$0xff] %v408_v54  ;;  %v409_v56 = vadd.f32 %v407_v53, %v405_v55 }
 0x103   :  { %411 = vst [vmem:[%s687_s4 + $0x8] sm:$0xff] %v409_v56 }

// kernel: transformer_forward.31
= control target key start
LH: loop header
LB: loop body
LE: loop exit
PB: predicated region body
PF: predicated region fallthrough
CT: control target
= control target key end

     0   :  { %v232_v1 = vmov 0.0   ;;  %vm233_vm0 = vmmov 0   ;;  %vm17_vm1 = vcmask 64512   ;;  %s300_s0 = inlined_call_operand.vmem [shape: f32[16,128], index: 0, kind: input, shape index: {}]   ;;  %s301_s1 = inlined_call_operand.vmem [shape: bf16[128,8], index: 1, kind: input, shape index: {}]   ;;  %s302_s2 = inlined_call_operand.hbm [shape: f32[16,8], index: 2, kind: output, shape index: {}]  }
   0x1   :  { %v200_v0 = vld [vmem:[%s301_s1] sm:$0xff]   ;;  %175 = vmatprep.subr.bf16.mxu0 %v232_v1  ;;  %v201_v2 = vld [vmem:[%s301_s1 + $0x8] sm:$0xff]   ;;  %191 = vmatprep.mubr.msk.bf16.mxu0 %vm233_vm0, %v232_v1  ;;  %18 = vst.msk [vmem:[#allocation2] sm:$0xff] %vm17_vm1, %v232_v1  ;;  %19 = vst.msk [vmem:[#allocation2 + $0x8] sm:$0xff] %vm17_vm1, %v232_v1 }
   0x2   :  { %176 = vmatpush3.bf16.msra.mxu0 %v200_v0  ;;  %v202_v3 = vld [vmem:[%s301_s1 + $0x10] sm:$0xff]  }
   0x3   :  { %177 = vmatprep.subr.bf16.mxu0 %v232_v1 }
   0x6   :  { %178 = vmatpush3.bf16.msra.mxu0 %v201_v2 }
   0x7   :  { %179 = vmatprep.subr.bf16.mxu0 %v232_v1 }
   0x8   :  { %7 = vsyncpa [#allocation4], 0  ;;  %v203_v4 = vld [vmem:[%s301_s1 + $0x18] sm:$0xff]   ;;  %v204_v5 = vld [vmem:[%s301_s1 + $0x20] sm:$0xff]  }
   0x9   :  { %v205_v6 = vld [vmem:[%s301_s1 + $0x28] sm:$0xff]   ;;  %v206_v7 = vld [vmem:[%s301_s1 + $0x30] sm:$0xff]   ;;  %v207_v8 = vld [vmem:[%s301_s1 + $0x38] sm:$0xff]   ;;  %s234_s1 = smov [#allocation3]  }
   0xa   :  { %180 = vmatpush3.bf16.msra.mxu0 %v202_v3  ;;  %v22_v9 = vld [vmem:[%s300_s0] sm:$0xff]  ;;  %v23_v10 = vld [vmem:[%s300_s0 + $0x8] sm:$0xff]  ;;  %s147_s29 = sshll.u32 %s234_s1, 4  ;;  %s148_s29 = int_to_ptr.vmem [resolvable:$true] %s147_s29 }
   0xb   :  { %181 = vmatprep.subr.bf16.mxu0 %v232_v1  ;;  %v24_v11 = vpack.c.bf16 %v23_v10, %v22_v9  ;;  %v20_v12 = vld [vmem:[#allocation2] sm:$0xff]  ;;  %v21_v14 = vld [vmem:[#allocation2 + $0x8] sm:$0xff]  ;;  %s208_s0 = scalar_lea.vmem %s148_s29, 256  ;;  %p213_p1 = scmp.lt.s32.totalorder %s148_s29, %s148_s29 }
   0xc   :  { %p209_p0 = scmp.ne.s32.totalorder %s148_s29, %s208_s0  ;;  %p214_p2 = scmp.lt.s32.totalorder %s208_s0, %s208_s0 }
   0xe   :  { %182 = vmatpush3.bf16.msra.mxu0 %v203_v4  ;;  %p215_p3 = por %p214_p2, %p213_p1 }
   0xf   :  { %183 = vmatprep.subr.bf16.mxu0 %v232_v1 }
  0x10   :  { %p216_p4 = pnand %p215_p3, %p209_p0 }
  0x12   :  { %184 = vmatpush3.bf16.msra.mxu0 %v204_v5 }
  0x13   :  { %185 = vmatprep.subr.bf16.mxu0 %v232_v1 }
  0x16   :  { %186 = vmatpush3.bf16.msra.mxu0 %v205_v6 }
  0x17   :  { %187 = vmatprep.subr.bf16.mxu0 %v232_v1 }
  0x1a   :  { %188 = vmatpush3.bf16.msra.mxu0 %v206_v7 }
  0x1b   :  { %189 = vmatprep.subr.bf16.mxu0 %v232_v1 }
  0x1e   :  { %190 = vmatpush3.bf16.msra.mxu0 %v207_v8 }
  0x21   :  { %192 = vmatmul.mubr.bf16.vlgmr.msra.gmra.mrb[0].mxu0 %v24_v11 }
  0xf4   :  { %v123_v13 = vpop.f32.mrb[0].mxu0 }
  0xf5   :  { %v130_v15 = vadd.f32 %v123_v13, %v20_v12  ;;  %v193_v16 = vpop.f32.mrb[1].mxu0 }
  0xf6   :  { %v126_v17 = vpop.f32.mrb[2].mxu0 }
  0xf7   :  { %133 = vst.msk [vmem:[#allocation2] sm:$0xff] %vm17_vm1, %v130_v15  ;;  %v131_v18 = vadd.f32 %v126_v17, %v21_v14  ;;  %v194_v19 = vpop.f32.mrb[3].mxu0 }
  0xf9   :  { %134 = vst.msk [vmem:[#allocation2 + $0x8] sm:$0xff] %vm17_vm1, %v131_v18 }
  0xfe   :  { %v138_v20 = vld [vmem:[#allocation2] sm:$0xff] }
  0xff   :  { %140 = vst.msk [vmem:[#allocation3] sm:$0xff] %vm17_vm1, %v138_v20 }
 0x100   :  { %v139_v21 = vld [vmem:[#allocation2 + $0x8] sm:$0xff] }
 0x101   :  { %141 = vst.msk [vmem:[#allocation3 + $0x8] sm:$0xff] %vm17_vm1, %v139_v21 }
 0x102   :  { %219 = shalt.err (!%p216_p4)
}
 0x103   :  { %s220_s4 = scalar_lea.hbm %s302_s2, 256 }
 0x104   :  { %p221_p5 = scmp.ne.s32.totalorder %s302_s2, %s220_s4  ;;  %p224_p6 = scmp.lt.u32.totalorder %s220_s4, %s302_s2 }
 0x106   :  { %p226_p7 = pnand %p224_p6, %p221_p5 }
 0x108   :  { %229 = shalt.err (!%p226_p7)
}
 0x109   :  { %s235_s9 = smov 128   ;;  %s236_s10 = smov 8  }
 0x10a   :  { %153 = dma.vmem_to_hbm [thread:$0]  %s148_s29, 256, %s302_s2, [#allocation4], %s235_s9, %s235_s9, %s236_s10  }
 0x10b   :  { %230 = dma.done.wait [#allocation4], 256  }
 0x10c   :  { %231 = vsyncadd [#allocation4], 4294967040 }
 0x10d   :  { %157 = vsyncpa [#allocation4], 1 }

</bundles_post_ra>
